<compile_context>
chip_gen: v6e
topology: v6e:2x2x1
jax: 0.10.0
libtpu: 0.0.40
codegen_flags: <defaults>
</compile_context>

<pallas_src>
import jax
import jax.numpy as jnp
from jax.experimental import pallas as pl
from jax.experimental.pallas import tpu as pltpu

NUM_CLASSES = 11
FEAT_C = 2048      # resnet50 fc.in_features
HIDDEN = 1024
OUT_PAD = 128      # lane-dense padded logits width; slice [:, :NUM_CLASSES] outside
BN_EPS = 1e-5


def head_kernel(x_ref, w1_ref, b1_ref, w2_ref, b2_ref, out_ref):
    # Linear(2048 -> 1024) with eval-mode BatchNorm1d pre-folded into (w1, b1).
    # bf16 inputs, f32 accumulation on the MXU.
    h = jnp.dot(x_ref[...], w1_ref[...], preferred_element_type=jnp.float32)
    h = h + b1_ref[...]

    # ReLU; Dropout(p=0.3) is identity in eval mode (no masking, no scaling).
    h = jnp.maximum(h, 0.0)

    # Linear(1024 -> num_classes), output padded to 128 lanes.
    logits = jnp.dot(h, w2_ref[...], preferred_element_type=jnp.float32)
    out_ref[...] = (logits + b2_ref[...]).astype(out_ref.dtype)


def _round_up(n, m):
    return ((n + m - 1) // m) * m


def trash_classifier_head(feat_nchw, params):
    """feat_nchw: [B, 2048, H, W] frozen-backbone feature maps (PyTorch NCHW)."""
    B, C, H, W = feat_nchw.shape
    assert C == FEAT_C

    # ResNet50 adaptive average pool, done in the wrapper (XLA fuses this with
    # the backbone; avoids a standalone NCHW->NHWC transpose over HBM).
    feats = jnp.mean(feat_nchw.astype(jnp.float32), axis=(2, 3))         # [B, C]

    # Fold eval-mode BatchNorm1d into the first Linear:
    #   (x @ w1 + b1 - mean) * scale + beta == x @ (w1*scale) + ((b1-mean)*scale + beta)
    scale = params["gamma"] * jax.lax.rsqrt(params["var"] + BN_EPS)      # [1, HIDDEN]
    w1 = (params["w1"] * scale).astype(jnp.bfloat16)                     # [C, HIDDEN] bf16
    b1 = (params["b1"] - params["mean"]) * scale + params["beta"]        # [1, HIDDEN] f32

    # Pad the tiny classifier to 128 output lanes (unmasked stores / dense MXU tile).
    w2 = jnp.zeros((HIDDEN, OUT_PAD), jnp.float32).at[:, :NUM_CLASSES].set(params["w2"])
    b2 = jnp.zeros((1, OUT_PAD), jnp.float32).at[:, :NUM_CLASSES].set(params["b2"])

    # Batch tiling: bf16 activations, weights VMEM-resident across grid steps.
    tb = 128 if B >= 128 else _round_up(B, 8)
    Bp = _round_up(B, tb)
    x = feats.astype(jnp.bfloat16)
    if Bp != B:
        x = jnp.pad(x, ((0, Bp - B), (0, 0)))

    out = pl.pallas_call(
        head_kernel,
        out_shape=jax.ShapeDtypeStruct((Bp, OUT_PAD), jnp.float32),
        grid=(Bp // tb,),
        in_specs=[
            pl.BlockSpec((tb, FEAT_C), lambda i: (i, 0)),        # x tile per batch step
            pl.BlockSpec((FEAT_C, HIDDEN), lambda i: (0, 0)),    # w1 resident
            pl.BlockSpec((1, HIDDEN), lambda i: (0, 0)),         # b1 resident
            pl.BlockSpec((HIDDEN, OUT_PAD), lambda i: (0, 0)),   # w2 resident
            pl.BlockSpec((1, OUT_PAD), lambda i: (0, 0)),        # b2 resident
        ],
        out_specs=pl.BlockSpec((tb, OUT_PAD), lambda i: (i, 0)),
        compiler_params=pltpu.CompilerParams(
            dimension_semantics=("parallel",)),
    )(x, w1, b1, w2, b2)

    return out[:B, :NUM_CLASSES]


def init_params(key):
    k1, k2, k3, k4, k5, k6, k7 = jax.random.split(key, 7)
    # PyTorch Linear stores weight as [out, in]; we keep the transposed [in, out].
    w1 = jax.random.normal(k1, (FEAT_C, HIDDEN), jnp.float32) * 0.02
    b1 = jax.random.normal(k2, (1, HIDDEN), jnp.float32) * 0.02
    gamma = 1.0 + 0.1 * jax.random.normal(k3, (1, HIDDEN), jnp.float32)
    beta = 0.1 * jax.random.normal(k4, (1, HIDDEN), jnp.float32)
    mean = 0.1 * jax.random.normal(k5, (1, HIDDEN), jnp.float32)
    var = jax.random.uniform(k6, (1, HIDDEN), jnp.float32, 0.5, 1.5)
    w2 = jax.random.normal(k7, (HIDDEN, NUM_CLASSES), jnp.float32) * 0.02
    b2 = jnp.zeros((1, NUM_CLASSES), jnp.float32)
    return dict(w1=w1, b1=b1, gamma=gamma, beta=beta, mean=mean, var=var,
                w2=w2, b2=b2)


def reference_head(feat_nchw, p):
    feats = jnp.mean(feat_nchw, axis=(2, 3))                              # [B, C]
    h = feats @ p["w1"] + p["b1"]
    h = (h - p["mean"]) * jax.lax.rsqrt(p["var"] + BN_EPS) * p["gamma"] + p["beta"]
    h = jnp.maximum(h, 0.0)
    return h @ p["w2"] + p["b2"]


if __name__ == "__main__":
    key = jax.random.PRNGKey(0)
    kx, kp = jax.random.split(key)

    # Small deterministic example: batch=2, ResNet50 final feature maps 2048x7x7.
    B, H, W = 2, 7, 7
    x = jax.random.normal(kx, (B, FEAT_C, H, W), jnp.float32)
    params = init_params(kp)

    out = trash_classifier_head(x, params)
    out = jax.block_until_ready(out)
    assert out.shape == (B, NUM_CLASSES)

    ref = reference_head(x, params)
    # bf16 activation/weight storage -> loosened tolerance vs the f32 reference.
    assert jnp.allclose(out, ref, atol=3e-2, rtol=3e-2), "mismatch vs JAX reference"

    print("KERNEL_OK")
</pallas_src>

<mosaic_0001>
module attributes {stable_mosaic.version = 11 : i64} {
  func.func @head_kernel(%arg0: i32, %arg1: memref<8x2048xbf16, #tpu.memory_space<vmem>>, %arg2: memref<2048x1024xbf16, #tpu.memory_space<vmem>>, %arg3: memref<1x1024xf32, #tpu.memory_space<vmem>>, %arg4: memref<1024x128xf32, #tpu.memory_space<vmem>>, %arg5: memref<1x128xf32, #tpu.memory_space<vmem>>, %arg6: memref<8x128xf32, #tpu.memory_space<vmem>>) attributes {dimension_semantics = [#tpu.dimension_semantics<parallel>], iteration_bounds = array<i64: 1>, scalar_prefetch = 0 : i64, scratch_operands = 0 : i64, tpu.core_type = #tpu.core_type<tc>, window_params = [{transform_indices = @transform_0, window_bounds = array<i64: 8, 2048>}, {pipeline_mode = #tpu.pipeline_mode<synchronous>, transform_indices = @transform_1, window_bounds = array<i64: 2048, 1024>}, {pipeline_mode = #tpu.pipeline_mode<synchronous>, transform_indices = @transform_2, window_bounds = array<i64: 1, 1024>}, {pipeline_mode = #tpu.pipeline_mode<synchronous>, transform_indices = @transform_3, window_bounds = array<i64: 1024, 128>}, {pipeline_mode = #tpu.pipeline_mode<synchronous>, transform_indices = @transform_4, window_bounds = array<i64: 1, 128>}, {transform_indices = @transform_5, window_bounds = array<i64: 8, 128>}]} {
    %c0 = arith.constant 0 : index
    %c0_0 = arith.constant 0 : index
    %0 = vector.load %arg1[%c0, %c0_0] : memref<8x2048xbf16, #tpu.memory_space<vmem>>, vector<8x2048xbf16>
    %c0_1 = arith.constant 0 : index
    %c0_2 = arith.constant 0 : index
    %1 = vector.load %arg2[%c0_1, %c0_2] : memref<2048x1024xbf16, #tpu.memory_space<vmem>>, vector<2048x1024xbf16>
    %cst = arith.constant dense<0.000000e+00> : vector<8x1024xf32>
    %2 = tpu.matmul %0, %1, %cst {dimension_numbers = #tpu.dot_dimension_numbers<[1], [0], [0], [1], [0, 0, 1, 1], [], []>} : vector<8x2048xbf16>, vector<2048x1024xbf16>, vector<8x1024xf32> -> vector<8x1024xf32>
    %c0_3 = arith.constant 0 : index
    %c0_4 = arith.constant 0 : index
    %3 = vector.load %arg3[%c0_3, %c0_4] : memref<1x1024xf32, #tpu.memory_space<vmem>>, vector<1x1024xf32>
    %4 = vector.broadcast %3 : vector<1x1024xf32> to vector<8x1024xf32>
    %5 = arith.addf %2, %4 : vector<8x1024xf32>
    %cst_5 = arith.constant 0.000000e+00 : f32
    %6 = vector.broadcast %cst_5 : f32 to vector<8x1024xf32>
    %7 = arith.maximumf %5, %6 : vector<8x1024xf32>
    %c0_6 = arith.constant 0 : index
    %c0_7 = arith.constant 0 : index
    %8 = vector.load %arg4[%c0_6, %c0_7] : memref<1024x128xf32, #tpu.memory_space<vmem>>, vector<1024x128xf32>
    %cst_8 = arith.constant dense<0.000000e+00> : vector<8x128xf32>
    %9 = tpu.matmul %7, %8, %cst_8 {dimension_numbers = #tpu.dot_dimension_numbers<[1], [0], [0], [1], [0, 0, 1, 1], [], []>} : vector<8x1024xf32>, vector<1024x128xf32>, vector<8x128xf32> -> vector<8x128xf32>
    %c0_9 = arith.constant 0 : index
    %c0_10 = arith.constant 0 : index
    %10 = vector.load %arg5[%c0_9, %c0_10] : memref<1x128xf32, #tpu.memory_space<vmem>>, vector<1x128xf32>
    %11 = vector.broadcast %10 : vector<1x128xf32> to vector<8x128xf32>
    %12 = arith.addf %9, %11 : vector<8x128xf32>
    %c0_11 = arith.constant 0 : index
    %c0_12 = arith.constant 0 : index
    %13 = vector.load %arg6[%c0_11, %c0_12] : memref<8x128xf32, #tpu.memory_space<vmem>>, vector<8x128xf32>
    tpu.vector_store %arg6[%c0_11, %c0_12], %12 {strides = array<i32>} : memref<8x128xf32, #tpu.memory_space<vmem>>, vector<8x128xf32>,
    return
  }
  func.func @transform_0(%arg0: i32) -> (i32, i32) {
    %c0_i32 = arith.constant 0 : i32
    %c0_i32_0 = arith.constant 0 : i32
    return %arg0, %c0_i32 : i32, i32
  }
  func.func @transform_1(%arg0: i32) -> (i32, i32) {
    %c0_i32 = arith.constant 0 : i32
    %c0_i32_0 = arith.constant 0 : i32
    %c0_i32_1 = arith.constant 0 : i32
    return %c0_i32, %c0_i32_0 : i32, i32
  }
  func.func @transform_2(%arg0: i32) -> (i32, i32) {
    %c0_i32 = arith.constant 0 : i32
    %c0_i32_0 = arith.constant 0 : i32
    %c0_i32_1 = arith.constant 0 : i32
    return %c0_i32, %c0_i32_0 : i32, i32
  }
  func.func @transform_3(%arg0: i32) -> (i32, i32) {
    %c0_i32 = arith.constant 0 : i32
    %c0_i32_0 = arith.constant 0 : i32
    %c0_i32_1 = arith.constant 0 : i32
    return %c0_i32, %c0_i32_0 : i32, i32
  }
  func.func @transform_4(%arg0: i32) -> (i32, i32) {
    %c0_i32 = arith.constant 0 : i32
    %c0_i32_0 = arith.constant 0 : i32
    %c0_i32_1 = arith.constant 0 : i32
    return %c0_i32, %c0_i32_0 : i32, i32
  }
  func.func @transform_5(%arg0: i32) -> (i32, i32) {
    %c0_i32 = arith.constant 0 : i32
    %c0_i32_0 = arith.constant 0 : i32
    return %arg0, %c0_i32 : i32, i32
  }
}

</mosaic_0001>

<bundles_post_ra>
// kernel: tpu_custom_call.1
= control target key start
LH: loop header
LB: loop body
LE: loop exit
PB: predicated region body
PF: predicated region fallthrough
CT: control target
= control target key end

     0   :  { %10 = vsyncpa [#allocation3], 0  ;;  %s9714_s0 = inlined_call_operand.hbm [shape: bf16[8,2048], index: 0, kind: input, shape index: {}]   ;;  %s9715_s1 = inlined_call_operand.hbm [shape: bf16[2048,1024], index: 1, kind: input, shape index: {}]   ;;  %s9716_s2 = inlined_call_operand.hbm [shape: f32[1,1024], index: 2, kind: input, shape index: {}]   ;;  %s9717_s3 = inlined_call_operand.hbm [shape: f32[1024,128], index: 3, kind: input, shape index: {}]   ;;  %s9718_s4 = inlined_call_operand.hbm [shape: f32[1,128], index: 4, kind: input, shape index: {}]   ;;  %s9719_s5 = inlined_call_operand.hbm [shape: f32[8,128], index: 5, kind: output, shape index: {}]  }
   0x1   :  { %11 = vsyncpa [#allocation6], 0 }
   0x2   :  { %12 = vsyncpa [#allocation9], 0 }
   0x3   :  { %13 = vsyncpa [#allocation4], 0  ;;  %s9424_s18 = smov [#allocation5]  }
   0x4   :  { %s29_s19 = sshll.u32 %s9424_s18, 4  ;;  %s30_s19 = int_to_ptr.vmem [resolvable:$true] %s29_s19 }
   0x5   :  { %s9304_s20 = scalar_lea.vmem %s30_s19, 131072  ;;  %p9309_p1 = scmp.lt.s32.totalorder %s30_s19, %s30_s19 }
   0x6   :  { %p9305_p0 = scmp.ne.s32.totalorder %s30_s19, %s9304_s20  ;;  %p9310_p2 = scmp.lt.s32.totalorder %s9304_s20, %s9304_s20 }
   0x8   :  { %p9311_p3 = por %p9310_p2, %p9309_p1 }
   0xa   :  { %p9312_p4 = pnand %p9311_p3, %p9305_p0 }
   0xc   :  { %9315 = shalt.err (!%p9312_p4)
}
   0xd   :  { %s9425_s21 = smov 512   ;;  %s9426_s22 = smov 32  }
   0xe   :  { %35 = dma.hbm_to_vmem [thread:$0]  %s9715_s1, 131072, %s30_s19, [#allocation6], %s9425_s21, %s9425_s21, %s9426_s22  }
   0xf   :  { %s9427_s25 = smov [#allocation8]  }
  0x10   :  { %s51_s26 = sshll.u32 %s9427_s25, 4  ;;  %s52_s26 = int_to_ptr.vmem [resolvable:$true] %s51_s26 }
  0x11   :  { %s9324_s27 = scalar_lea.vmem %s52_s26, 16384  ;;  %p9329_p6 = scmp.lt.s32.totalorder %s52_s26, %s52_s26 }
  0x12   :  { %p9325_p5 = scmp.ne.s32.totalorder %s52_s26, %s9324_s27  ;;  %p9330_p7 = scmp.lt.s32.totalorder %s9324_s27, %s9324_s27 }
  0x14   :  { %p9331_p8 = por %p9330_p7, %p9329_p6 }
  0x16   :  { %p9332_p9 = pnand %p9331_p8, %p9325_p5 }
  0x18   :  { %9335 = shalt.err (!%p9332_p9)
}
  0x19   :  { %s9428_s28 = smov 128   ;;  %s9429_s29 = smov 8  }
  0x1a   :  { %57 = dma.hbm_to_vmem [thread:$0]  %s9717_s3, 16384, %s52_s26, [#allocation9], %s9428_s28, %s9428_s28, %s9429_s29  }
  0x1b   :  { %s9430_s7 = smov [#allocation2]   ;;  %s9431_s9 = smov [#allocation7]  }
  0x1c   :  { %s20_s8 = sshll.u32 %s9430_s7, 4  ;;  %s42_s1 = sshll.u32 %s9431_s9, 4  ;;  %s21_s8 = int_to_ptr.vmem [resolvable:$true] %s20_s8  ;;  %s43_s1 = int_to_ptr.vmem [resolvable:$true] %s42_s1 }
  0x1d   :  { %s9344_s10 = scalar_lea.vmem %s21_s8, 1024  ;;  %p9349_p11 = scmp.lt.s32.totalorder %s21_s8, %s21_s8 }
  0x1e   :  { %p9345_p10 = scmp.ne.s32.totalorder %s21_s8, %s9344_s10  ;;  %p9350_p12 = scmp.lt.s32.totalorder %s9344_s10, %s9344_s10 }
  0x20   :  { %p9351_p13 = por %p9350_p12, %p9349_p11 }
  0x22   :  { %p9352_p0 = pnand %p9351_p13, %p9345_p10 }
  0x24   :  { %9355 = shalt.err (!%p9352_p0)
}
  0x25   :  { %23 = dma.hbm_to_vmem [thread:$0]  %s9714_s0, 1024, %s21_s8, [#allocation3]  }
  0x26   :  { %s9364_s13 = scalar_lea.vmem %s43_s1, 128  ;;  %p9369_p2 = scmp.lt.s32.totalorder %s43_s1, %s43_s1 }
  0x27   :  { %p9365_p1 = scmp.ne.s32.totalorder %s43_s1, %s9364_s13  ;;  %p9370_p3 = scmp.lt.s32.totalorder %s9364_s13, %s9364_s13 }
  0x29   :  { %p9371_p4 = por %p9370_p3, %p9369_p2 }
  0x2b   :  { %p9372_p5 = pnand %p9371_p4, %p9365_p1 }
  0x2d   :  { %9375 = shalt.err (!%p9372_p5)
}
  0x2e   :  { %45 = dma.hbm_to_vmem [thread:$0]  %s9716_s2, 128, %s43_s1, [#allocation6]  }
  0x2f   :  { %s9432_s15 = smov [#allocation10]  }
  0x30   :  { %s64_s16 = sshll.u32 %s9432_s15, 4  ;;  %s65_s16 = int_to_ptr.vmem [resolvable:$true] %s64_s16 }
  0x31   :  { %s9384_s17 = scalar_lea.vmem %s65_s16, 16  ;;  %s9388_s18 = scalar_lea.vmem %s65_s16, 32 }
  0x32   :  { %p9385_p6 = scmp.ne.s32.totalorder %s65_s16, %s9384_s17  ;;  %p9389_p7 = scmp.lt.s32.totalorder %s65_s16, %s65_s16 }
  0x33   :  { %p9390_p8 = scmp.lt.s32.totalorder %s9388_s18, %s9384_s17 }
  0x35   :  { %p9391_p9 = por %p9390_p8, %p9389_p7 }
  0x37   :  { %p9392_p10 = pnand %p9391_p9, %p9385_p6 }
  0x39   :  { %9395 = shalt.err (!%p9392_p10)
}
  0x3a   :  { %67 = dma.hbm_to_vmem [thread:$0]  %s9718_s4, 16, %s65_s16, [#allocation9]  }
  0x3b   :  { %9416 = dma.done.wait [#allocation3], 1024  }
  0x3c   :  { %9417 = vsyncadd [#allocation3], 4294966272 }
  0x3d   :  { %9418 = dma.done.wait [#allocation6], 131200  }
  0x3e   :  { %9419 = vsyncadd [#allocation6], 4294836096 }
  0x3f   :  { %9420 = dma.done.wait [#allocation9], 16400  }
  0x40   :  { %9421 = vsyncadd [#allocation9], 4294950896  ;;  %v147_v0 = vld [vmem:[#allocation5 + $0x1c0] sm:$0xff]  ;;  %v9481_v54 = vld [vmem:[#allocation2 + $0x8] sm:$0xff]  ;;  %s9433_s2 = smov [#allocation11]  }
  0x41   :  { %v151_v1 = vld [vmem:[#allocation5 + $0x1e0] sm:$0xff]  ;;  %v9489_v59 = vcombine.high %v9481_v54, %v9481_v54  ;;  %s8075_s4 = sshll.u32 %s9433_s2, 4  ;;  %s8076_s4 = int_to_ptr.vmem [resolvable:$true] %s8075_s4 }
  0x42   :  { %v275_v2 = vld [vmem:[#allocation5 + $0x5c0] sm:$0xff]  ;;  %v8159_v3 = vcombine.high %v147_v0, %v151_v1  ;;  %v8158_v5 = vcombine.low %v147_v0, %v151_v1  ;;  %s9396_s20 = scalar_lea.vmem %s8076_s4, 128  ;;  %p9401_p12 = scmp.lt.s32.totalorder %s8076_s4, %s8076_s4 }
  0x43   :  { %v279_v4 = vld [vmem:[#allocation5 + $0x5e0] sm:$0xff]  ;;  %6406 = vmatprep.mubr.bf16.mxu1 %v9489_v59  ;;  %p9397_p11 = scmp.ne.s32.totalorder %s8076_s4, %s9396_s20  ;;  %p9402_p13 = scmp.lt.s32.totalorder %s9396_s20, %s9396_s20 }
  0x44   :  { %v139_v6 = vld [vmem:[#allocation5 + $0x180] sm:$0xff]  ;;  %v8287_v8 = vcombine.high %v275_v2, %v279_v4  ;;  %v8286_v9 = vcombine.low %v275_v2, %v279_v4  ;;  %6333 = vmatprep.subr.bf16.mxu0 %v8159_v3 }
  0x45   :  { %v143_v7 = vld [vmem:[#allocation5 + $0x1a0] sm:$0xff]  ;;  %6334 = vmatpush1.bf16.msra.mxu0 %v8158_v5  ;;  %p9403_p0 = por %p9402_p13, %p9401_p12 }
  0x46   :  { %v8151_v10 = vcombine.high %v139_v6, %v143_v7  ;;  %v267_v11 = vld [vmem:[#allocation5 + $0x580] sm:$0xff]  ;;  %6374 = vmatprep.subr.bf16.mxu1 %v8287_v8  ;;  %v8150_v18 = vcombine.low %v139_v6, %v143_v7 }
  0x47   :  { %v271_v12 = vld [vmem:[#allocation5 + $0x5a0] sm:$0xff]  ;;  %6375 = vmatpush1.bf16.msra.mxu1 %v8286_v9  ;;  %p9404_p1 = pnand %p9403_p0, %p9397_p11 }
  0x48   :  { %v131_v13 = vld [vmem:[#allocation5 + $0x140] sm:$0xff]  ;;  %v8279_v14 = vcombine.high %v267_v11, %v271_v12  ;;  %6335 = vmatprep.subr.bf16.mxu0 %v8151_v10  ;;  %v8278_v19 = vcombine.low %v267_v11, %v271_v12 }
  0x49   :  { %v135_v15 = vld [vmem:[#allocation5 + $0x160] sm:$0xff]  ;;  %6336 = vmatpush1.bf16.msra.mxu0 %v8150_v18 }
  0x4a   :  { %v259_v16 = vld [vmem:[#allocation5 + $0x540] sm:$0xff]  ;;  %v8143_v20 = vcombine.high %v131_v13, %v135_v15  ;;  %6376 = vmatprep.subr.bf16.mxu1 %v8279_v14  ;;  %v8142_v26 = vcombine.low %v131_v13, %v135_v15 }
  0x4b   :  { %v263_v17 = vld [vmem:[#allocation5 + $0x560] sm:$0xff]  ;;  %6377 = vmatpush1.bf16.msra.mxu1 %v8278_v19 }
  0x4c   :  { %v8271_v21 = vcombine.high %v259_v16, %v263_v17  ;;  %v123_v22 = vld [vmem:[#allocation5 + $0x100] sm:$0xff]  ;;  %6337 = vmatprep.subr.bf16.mxu0 %v8143_v20  ;;  %v8270_v27 = vcombine.low %v259_v16, %v263_v17 }
  0x4d   :  { %v127_v23 = vld [vmem:[#allocation5 + $0x120] sm:$0xff]  ;;  %6338 = vmatpush1.bf16.msra.mxu0 %v8142_v26 }
  0x4e   :  { %v251_v24 = vld [vmem:[#allocation5 + $0x500] sm:$0xff]  ;;  %v8135_v28 = vcombine.high %v123_v22, %v127_v23  ;;  %6378 = vmatprep.subr.bf16.mxu1 %v8271_v21  ;;  %v8134_v34 = vcombine.low %v123_v22, %v127_v23 }
  0x4f   :  { %v255_v25 = vld [vmem:[#allocation5 + $0x520] sm:$0xff]  ;;  %6379 = vmatpush1.bf16.msra.mxu1 %v8270_v27 }
  0x50   :  { %v8263_v29 = vcombine.high %v251_v24, %v255_v25  ;;  %v115_v30 = vld [vmem:[#allocation5 + $0xc0] sm:$0xff]  ;;  %6339 = vmatprep.subr.bf16.mxu0 %v8135_v28  ;;  %v8262_v35 = vcombine.low %v251_v24, %v255_v25 }
  0x51   :  { %v119_v31 = vld [vmem:[#allocation5 + $0xe0] sm:$0xff]  ;;  %6340 = vmatpush1.bf16.msra.mxu0 %v8134_v34 }
  0x52   :  { %v243_v32 = vld [vmem:[#allocation5 + $0x4c0] sm:$0xff]  ;;  %v8127_v36 = vcombine.high %v115_v30, %v119_v31  ;;  %6380 = vmatprep.subr.bf16.mxu1 %v8263_v29  ;;  %v8126_v42 = vcombine.low %v115_v30, %v119_v31 }
  0x53   :  { %v247_v33 = vld [vmem:[#allocation5 + $0x4e0] sm:$0xff]  ;;  %6381 = vmatpush1.bf16.msra.mxu1 %v8262_v35 }
  0x54   :  { %v8255_v37 = vcombine.high %v243_v32, %v247_v33  ;;  %v107_v38 = vld [vmem:[#allocation5 + $0x80] sm:$0xff]  ;;  %6341 = vmatprep.subr.bf16.mxu0 %v8127_v36  ;;  %v8254_v43 = vcombine.low %v243_v32, %v247_v33 }
  0x55   :  { %v111_v39 = vld [vmem:[#allocation5 + $0xa0] sm:$0xff]  ;;  %6342 = vmatpush1.bf16.msra.mxu0 %v8126_v42 }
  0x56   :  { %v235_v40 = vld [vmem:[#allocation5 + $0x480] sm:$0xff]  ;;  %v8119_v44 = vcombine.high %v107_v38, %v111_v39  ;;  %6382 = vmatprep.subr.bf16.mxu1 %v8255_v37  ;;  %v8118_v50 = vcombine.low %v107_v38, %v111_v39 }
  0x57   :  { %v239_v41 = vld [vmem:[#allocation5 + $0x4a0] sm:$0xff]  ;;  %6383 = vmatpush1.bf16.msra.mxu1 %v8254_v43 }
  0x58   :  { %v8247_v45 = vcombine.high %v235_v40, %v239_v41  ;;  %v99_v46 = vld [vmem:[#allocation5 + $0x40] sm:$0xff]  ;;  %6343 = vmatprep.subr.bf16.mxu0 %v8119_v44  ;;  %v8246_v51 = vcombine.low %v235_v40, %v239_v41 }
  0x59   :  { %v103_v47 = vld [vmem:[#allocation5 + $0x60] sm:$0xff]  ;;  %6344 = vmatpush1.bf16.msra.mxu0 %v8118_v50 }
  0x5a   :  { %v227_v48 = vld [vmem:[#allocation5 + $0x440] sm:$0xff]  ;;  %v8111_v52 = vcombine.high %v99_v46, %v103_v47  ;;  %6384 = vmatprep.subr.bf16.mxu1 %v8247_v45  ;;  %v8110_v62 = vcombine.low %v99_v46, %v103_v47 }
  0x5b   :  { %v231_v49 = vld [vmem:[#allocation5 + $0x460] sm:$0xff]  ;;  %6385 = vmatpush1.bf16.msra.mxu1 %v8246_v51 }
  0x5c   :  { %v9479_v53 = vld [vmem:[#allocation2] sm:$0xff]  ;;  %v8239_v55 = vcombine.high %v227_v48, %v231_v49  ;;  %6345 = vmatprep.subr.bf16.mxu0 %v8111_v52  ;;  %v8238_v63 = vcombine.low %v227_v48, %v231_v49 }
  0x5d   :  { %v91_v56 = vld [vmem:[#allocation5] sm:$0xff]  ;;  %v9485_v58 = vcombine.high %v9479_v53, %v9479_v53  ;;  %6346 = vmatpush1.bf16.msra.mxu0 %v8110_v62 }
  0x5e   :  { %v95_v57 = vld [vmem:[#allocation5 + $0x20] sm:$0xff]  ;;  %6386 = vmatprep.subr.bf16.mxu1 %v8239_v55 }
  0x5f   :  { %v219_v60 = vld [vmem:[#allocation5 + $0x400] sm:$0xff]  ;;  %6365 = vmatprep.mubr.bf16.mxu0 %v9485_v58  ;;  %v8103_v0 = vcombine.high %v91_v56, %v95_v57  ;;  %v8102_v6 = vcombine.low %v91_v56, %v95_v57  ;;  %6387 = vmatpush1.bf16.msra.mxu1 %v8238_v63 }
  0x60   :  { %v223_v61 = vld [vmem:[#allocation5 + $0x420] sm:$0xff] }
  0x61   :  { %v8231_v1 = vcombine.high %v219_v60, %v223_v61  ;;  %v211_v2 = vld [vmem:[#allocation5 + $0x3c0] sm:$0xff]  ;;  %6347 = vmatprep.subr.bf16.mxu0 %v8103_v0  ;;  %v8230_v7 = vcombine.low %v219_v60, %v223_v61 }
  0x62   :  { %v215_v3 = vld [vmem:[#allocation5 + $0x3e0] sm:$0xff]  ;;  %6348 = vmatpush1.bf16.msra.mxu0 %v8102_v6 }
  0x63   :  { %v339_v4 = vld [vmem:[#allocation5 + $0x7c0] sm:$0xff]  ;;  %v8223_v8 = vcombine.high %v211_v2, %v215_v3  ;;  %6388 = vmatprep.subr.bf16.mxu1 %v8231_v1  ;;  %v8222_v14 = vcombine.low %v211_v2, %v215_v3 }
  0x64   :  { %v343_v5 = vld [vmem:[#allocation5 + $0x7e0] sm:$0xff]  ;;  %6389 = vmatpush1.bf16.msra.mxu1 %v8230_v7 }
  0x65   :  { %v8351_v9 = vcombine.high %v339_v4, %v343_v5  ;;  %v203_v10 = vld [vmem:[#allocation5 + $0x380] sm:$0xff]  ;;  %6349 = vmatprep.subr.bf16.mxu0 %v8223_v8  ;;  %v8350_v15 = vcombine.low %v339_v4, %v343_v5 }
  0x66   :  { %v207_v11 = vld [vmem:[#allocation5 + $0x3a0] sm:$0xff]  ;;  %6350 = vmatpush2.bf16.msra.mxu0 %v8222_v14 }
  0x67   :  { %v331_v12 = vld [vmem:[#allocation5 + $0x780] sm:$0xff]  ;;  %v8215_v16 = vcombine.high %v203_v10, %v207_v11  ;;  %6390 = vmatprep.subr.bf16.mxu1 %v8351_v9  ;;  %v8214_v22 = vcombine.low %v203_v10, %v207_v11 }
  0x68   :  { %v335_v13 = vld [vmem:[#allocation5 + $0x7a0] sm:$0xff]  ;;  %6391 = vmatpush2.bf16.msra.mxu1 %v8350_v15 }
  0x69   :  { %v8343_v17 = vcombine.high %v331_v12, %v335_v13  ;;  %v195_v18 = vld [vmem:[#allocation5 + $0x340] sm:$0xff]  ;;  %6351 = vmatprep.subr.bf16.mxu0 %v8215_v16  ;;  %v8342_v23 = vcombine.low %v331_v12, %v335_v13  ;;  %v9495_v16 = vcombine.low %v9479_v53, %v9479_v53 }
  0x6a   :  { %v199_v19 = vld [vmem:[#allocation5 + $0x360] sm:$0xff]  ;;  %6352 = vmatpush2.bf16.msra.mxu0 %v8214_v22  ;;  %v9503_v22 = vld [vmem:[#allocation2 + $0x18] sm:$0xff] }
  0x6b   :  { %v323_v20 = vld [vmem:[#allocation5 + $0x740] sm:$0xff]  ;;  %v8207_v24 = vcombine.high %v195_v18, %v199_v19  ;;  %6392 = vmatprep.subr.bf16.mxu1 %v8343_v17  ;;  %v8206_v30 = vcombine.low %v195_v18, %v199_v19  ;;  %v9497_v19 = vld [vmem:[#allocation2 + $0x10] sm:$0xff] }
  0x6c   :  { %v327_v21 = vld [vmem:[#allocation5 + $0x760] sm:$0xff]  ;;  %6393 = vmatpush2.bf16.msra.mxu1 %v8342_v23 }
  0x6d   :  { %v8335_v25 = vcombine.high %v323_v20, %v327_v21  ;;  %v187_v26 = vld [vmem:[#allocation5 + $0x300] sm:$0xff]  ;;  %6353 = vmatprep.subr.bf16.mxu0 %v8207_v24  ;;  %v8334_v31 = vcombine.low %v323_v20, %v327_v21  ;;  %v9501_v20 = vcombine.low %v9481_v54, %v9481_v54 }
  0x6e   :  { %v191_v27 = vld [vmem:[#allocation5 + $0x320] sm:$0xff]  ;;  %6354 = vmatpush2.bf16.msra.mxu0 %v8206_v30 }
  0x6f   :  { %v315_v28 = vld [vmem:[#allocation5 + $0x700] sm:$0xff]  ;;  %v8199_v32 = vcombine.high %v187_v26, %v191_v27  ;;  %6394 = vmatprep.subr.bf16.mxu1 %v8335_v25  ;;  %v8198_v38 = vcombine.low %v187_v26, %v191_v27  ;;  %v9507_v27 = vcombine.high %v9497_v19, %v9497_v19 }
  0x70   :  { %v319_v29 = vld [vmem:[#allocation5 + $0x720] sm:$0xff]  ;;  %6395 = vmatpush2.bf16.msra.mxu1 %v8334_v31 }
  0x71   :  { %v8327_v33 = vcombine.high %v315_v28, %v319_v29  ;;  %v179_v34 = vld [vmem:[#allocation5 + $0x2c0] sm:$0xff]  ;;  %6355 = vmatprep.subr.bf16.mxu0 %v8199_v32  ;;  %v8326_v39 = vcombine.low %v315_v28, %v319_v29  ;;  %v9512_v29 = vcombine.high %v9503_v22, %v9503_v22 }
  0x72   :  { %v183_v35 = vld [vmem:[#allocation5 + $0x2e0] sm:$0xff]  ;;  %6356 = vmatpush2.bf16.msra.mxu0 %v8198_v38 }
  0x73   :  { %v307_v36 = vld [vmem:[#allocation5 + $0x6c0] sm:$0xff]  ;;  %v8191_v40 = vcombine.high %v179_v34, %v183_v35  ;;  %6396 = vmatprep.subr.bf16.mxu1 %v8327_v33  ;;  %v8190_v46 = vcombine.low %v179_v34, %v183_v35 }
  0x74   :  { %v311_v37 = vld [vmem:[#allocation5 + $0x6e0] sm:$0xff]  ;;  %6397 = vmatpush2.bf16.msra.mxu1 %v8326_v39 }
  0x75   :  { %v8319_v41 = vcombine.high %v307_v36, %v311_v37  ;;  %v171_v42 = vld [vmem:[#allocation5 + $0x280] sm:$0xff]  ;;  %6357 = vmatprep.subr.bf16.mxu0 %v8191_v40  ;;  %v8318_v47 = vcombine.low %v307_v36, %v311_v37 }
  0x76   :  { %v175_v43 = vld [vmem:[#allocation5 + $0x2a0] sm:$0xff]  ;;  %6358 = vmatpush2.bf16.msra.mxu0 %v8190_v46 }
  0x77   :  { %v299_v44 = vld [vmem:[#allocation5 + $0x680] sm:$0xff]  ;;  %v8183_v48 = vcombine.high %v171_v42, %v175_v43  ;;  %6398 = vmatprep.subr.bf16.mxu1 %v8319_v41  ;;  %v8182_v56 = vcombine.low %v171_v42, %v175_v43 }
  0x78   :  { %v303_v45 = vld [vmem:[#allocation5 + $0x6a0] sm:$0xff]  ;;  %6399 = vmatpush2.bf16.msra.mxu1 %v8318_v47 }
  0x79   :  { %v8311_v49 = vcombine.high %v299_v44, %v303_v45  ;;  %v163_v50 = vld [vmem:[#allocation5 + $0x240] sm:$0xff]  ;;  %6359 = vmatprep.subr.bf16.mxu0 %v8183_v48  ;;  %v8310_v57 = vcombine.low %v299_v44, %v303_v45 }
  0x7a   :  { %v167_v51 = vld [vmem:[#allocation5 + $0x260] sm:$0xff]  ;;  %6360 = vmatpush2.bf16.msra.mxu0 %v8182_v56 }
  0x7b   :  { %v291_v52 = vld [vmem:[#allocation5 + $0x640] sm:$0xff]  ;;  %v8175_v60 = vcombine.high %v163_v50, %v167_v51  ;;  %6400 = vmatprep.subr.bf16.mxu1 %v8311_v49  ;;  %v8174_v2 = vcombine.low %v163_v50, %v167_v51 }
  0x7c   :  { %v295_v55 = vld [vmem:[#allocation5 + $0x660] sm:$0xff]  ;;  %6401 = vmatpush2.bf16.msra.mxu1 %v8310_v57 }
  0x7d   :  { %v8303_v61 = vcombine.high %v291_v52, %v295_v55  ;;  %v155_v62 = vld [vmem:[#allocation5 + $0x200] sm:$0xff]  ;;  %6361 = vmatprep.subr.bf16.mxu0 %v8175_v60  ;;  %v8302_v3 = vcombine.low %v291_v52, %v295_v55 }
  0x7e   :  { %v159_v63 = vld [vmem:[#allocation5 + $0x220] sm:$0xff]  ;;  %6362 = vmatpush2.bf16.msra.mxu0 %v8174_v2 }
  0x7f   :  { %v283_v0 = vld [vmem:[#allocation5 + $0x600] sm:$0xff]  ;;  %v8167_v4 = vcombine.high %v155_v62, %v159_v63  ;;  %6402 = vmatprep.subr.bf16.mxu1 %v8303_v61  ;;  %v8166_v10 = vcombine.low %v155_v62, %v159_v63 }
  0x80   :  { %v287_v1 = vld [vmem:[#allocation5 + $0x620] sm:$0xff]  ;;  %6403 = vmatpush2.bf16.msra.mxu1 %v8302_v3 }
  0x81   :  { %v8295_v5 = vcombine.high %v283_v0, %v287_v1  ;;  %v403_v6 = vld [vmem:[#allocation5 + $0x9c0] sm:$0xff]  ;;  %6363 = vmatprep.subr.bf16.mxu0 %v8167_v4  ;;  %v8294_v11 = vcombine.low %v283_v0, %v287_v1 }
  0x82   :  { %v407_v7 = vld [vmem:[#allocation5 + $0x9e0] sm:$0xff]  ;;  %6364 = vmatpush2.bf16.msra.mxu0 %v8166_v10 }
  0x83   :  { %v531_v8 = vld [vmem:[#allocation5 + $0xdc0] sm:$0xff]  ;;  %v8415_v12 = vcombine.high %v403_v6, %v407_v7  ;;  %6404 = vmatprep.subr.bf16.mxu1 %v8295_v5  ;;  %v8414_v21 = vcombine.low %v403_v6, %v407_v7 }
  0x84   :  { %v535_v9 = vld [vmem:[#allocation5 + $0xde0] sm:$0xff]  ;;  %6405 = vmatpush2.bf16.msra.mxu1 %v8294_v11 }
  0x85   :  { %v8543_v13 = vcombine.high %v531_v8, %v535_v9  ;;  %v395_v14 = vld [vmem:[#allocation5 + $0x980] sm:$0xff]  ;;  %6415 = vmatprep.subr.bf16.mxu0 %v8415_v12  ;;  %v8542_v23 = vcombine.low %v531_v8, %v535_v9  ;;  %6366 = vmatmul.mubr.bf16.vlgmr.msra.gmra.mxu0 %v9495_v16 }
  0x86   :  { %v399_v15 = vld [vmem:[#allocation5 + $0x9a0] sm:$0xff]  ;;  %6416 = vmatpush1.bf16.msra.mxu0 %v8414_v21  ;;  %6447 = vmatprep.mubr.bf16.mxu0 %v9507_v27 }
  0x87   :  { %v523_v17 = vld [vmem:[#allocation5 + $0xd80] sm:$0xff]  ;;  %v8407_v24 = vcombine.high %v395_v14, %v399_v15  ;;  %6456 = vmatprep.subr.bf16.mxu1 %v8543_v13  ;;  %6407 = vmatmul.mubr.bf16.vlgmr.msra.gmra.mxu1 %v9501_v20  ;;  %v8406_v30 = vcombine.low %v395_v14, %v399_v15 }
  0x88   :  { %v527_v18 = vld [vmem:[#allocation5 + $0xda0] sm:$0xff]  ;;  %6457 = vmatpush1.bf16.msra.mxu1 %v8542_v23  ;;  %6488 = vmatprep.mubr.bf16.mxu1 %v9512_v29 }
  0x89   :  { %v8535_v25 = vcombine.high %v523_v17, %v527_v18  ;;  %v387_v53 = vld [vmem:[#allocation5 + $0x940] sm:$0xff]  ;;  %6417 = vmatprep.subr.bf16.mxu0 %v8407_v24  ;;  %v8534_v31 = vcombine.low %v523_v17, %v527_v18 }
  0x8a   :  { %v391_v26 = vld [vmem:[#allocation5 + $0x960] sm:$0xff]  ;;  %6418 = vmatpush1.bf16.msra.mxu0 %v8406_v30 }
  0x8b   :  { %v515_v28 = vld [vmem:[#allocation5 + $0xd40] sm:$0xff]  ;;  %v8399_v32 = vcombine.high %v387_v53, %v391_v26  ;;  %6458 = vmatprep.subr.bf16.mxu1 %v8535_v25  ;;  %v8398_v38 = vcombine.low %v387_v53, %v391_v26 }
  0x8c   :  { %v519_v54 = vld [vmem:[#allocation5 + $0xd60] sm:$0xff]  ;;  %6459 = vmatpush1.bf16.msra.mxu1 %v8534_v31 }
  0x8d   :  { %v8527_v33 = vcombine.high %v515_v28, %v519_v54  ;;  %v379_v34 = vld [vmem:[#allocation5 + $0x900] sm:$0xff]  ;;  %6419 = vmatprep.subr.bf16.mxu0 %v8399_v32  ;;  %v8526_v39 = vcombine.low %v515_v28, %v519_v54 }
  0x8e   :  { %v383_v35 = vld [vmem:[#allocation5 + $0x920] sm:$0xff]  ;;  %6420 = vmatpush1.bf16.msra.mxu0 %v8398_v38 }
  0x8f   :  { %v507_v36 = vld [vmem:[#allocation5 + $0xd00] sm:$0xff]  ;;  %v8391_v40 = vcombine.high %v379_v34, %v383_v35  ;;  %6460 = vmatprep.subr.bf16.mxu1 %v8527_v33  ;;  %v8390_v46 = vcombine.low %v379_v34, %v383_v35 }
  0x90   :  { %v511_v37 = vld [vmem:[#allocation5 + $0xd20] sm:$0xff]  ;;  %6461 = vmatpush1.bf16.msra.mxu1 %v8526_v39 }
  0x91   :  { %v8519_v41 = vcombine.high %v507_v36, %v511_v37  ;;  %v371_v42 = vld [vmem:[#allocation5 + $0x8c0] sm:$0xff]  ;;  %6421 = vmatprep.subr.bf16.mxu0 %v8391_v40  ;;  %v8518_v47 = vcombine.low %v507_v36, %v511_v37 }
  0x92   :  { %v375_v43 = vld [vmem:[#allocation5 + $0x8e0] sm:$0xff]  ;;  %6422 = vmatpush1.bf16.msra.mxu0 %v8390_v46 }
  0x93   :  { %v499_v44 = vld [vmem:[#allocation5 + $0xcc0] sm:$0xff]  ;;  %v8383_v48 = vcombine.high %v371_v42, %v375_v43  ;;  %6462 = vmatprep.subr.bf16.mxu1 %v8519_v41  ;;  %v8382_v56 = vcombine.low %v371_v42, %v375_v43 }
  0x94   :  { %v503_v45 = vld [vmem:[#allocation5 + $0xce0] sm:$0xff]  ;;  %6463 = vmatpush1.bf16.msra.mxu1 %v8518_v47 }
  0x95   :  { %v8511_v49 = vcombine.high %v499_v44, %v503_v45  ;;  %v363_v50 = vld [vmem:[#allocation5 + $0x880] sm:$0xff]  ;;  %6423 = vmatprep.subr.bf16.mxu0 %v8383_v48  ;;  %v8510_v57 = vcombine.low %v499_v44, %v503_v45 }
  0x96   :  { %v367_v51 = vld [vmem:[#allocation5 + $0x8a0] sm:$0xff]  ;;  %6424 = vmatpush1.bf16.msra.mxu0 %v8382_v56 }
  0x97   :  { %v491_v52 = vld [vmem:[#allocation5 + $0xc80] sm:$0xff]  ;;  %v8375_v60 = vcombine.high %v363_v50, %v367_v51  ;;  %6464 = vmatprep.subr.bf16.mxu1 %v8511_v49  ;;  %v8374_v2 = vcombine.low %v363_v50, %v367_v51 }
  0x98   :  { %v495_v55 = vld [vmem:[#allocation5 + $0xca0] sm:$0xff]  ;;  %6465 = vmatpush1.bf16.msra.mxu1 %v8510_v57 }
  0x99   :  { %v8503_v61 = vcombine.high %v491_v52, %v495_v55  ;;  %v355_v62 = vld [vmem:[#allocation5 + $0x840] sm:$0xff]  ;;  %6425 = vmatprep.subr.bf16.mxu0 %v8375_v60  ;;  %v8502_v3 = vcombine.low %v491_v52, %v495_v55 }
  0x9a   :  { %v359_v63 = vld [vmem:[#allocation5 + $0x860] sm:$0xff]  ;;  %6426 = vmatpush1.bf16.msra.mxu0 %v8374_v2 }
  0x9b   :  { %v483_v0 = vld [vmem:[#allocation5 + $0xc40] sm:$0xff]  ;;  %v8367_v4 = vcombine.high %v355_v62, %v359_v63  ;;  %6466 = vmatprep.subr.bf16.mxu1 %v8503_v61  ;;  %v8366_v10 = vcombine.low %v355_v62, %v359_v63 }
  0x9c   :  { %v487_v1 = vld [vmem:[#allocation5 + $0xc60] sm:$0xff]  ;;  %6467 = vmatpush1.bf16.msra.mxu1 %v8502_v3 }
  0x9d   :  { %v8495_v5 = vcombine.high %v483_v0, %v487_v1  ;;  %v347_v6 = vld [vmem:[#allocation5 + $0x800] sm:$0xff]  ;;  %6427 = vmatprep.subr.bf16.mxu0 %v8367_v4  ;;  %v8494_v11 = vcombine.low %v483_v0, %v487_v1 }
  0x9e   :  { %v351_v7 = vld [vmem:[#allocation5 + $0x820] sm:$0xff]  ;;  %6428 = vmatpush1.bf16.msra.mxu0 %v8366_v10 }
  0x9f   :  { %v475_v8 = vld [vmem:[#allocation5 + $0xc00] sm:$0xff]  ;;  %v8359_v12 = vcombine.high %v347_v6, %v351_v7  ;;  %6468 = vmatprep.subr.bf16.mxu1 %v8495_v5  ;;  %v8358_v21 = vcombine.low %v347_v6, %v351_v7 }
  0xa0   :  { %v479_v9 = vld [vmem:[#allocation5 + $0xc20] sm:$0xff]  ;;  %6469 = vmatpush1.bf16.msra.mxu1 %v8494_v11 }
  0xa1   :  { %v8487_v13 = vcombine.high %v475_v8, %v479_v9  ;;  %v467_v14 = vld [vmem:[#allocation5 + $0xbc0] sm:$0xff]  ;;  %6429 = vmatprep.subr.bf16.mxu0 %v8359_v12  ;;  %v8486_v23 = vcombine.low %v475_v8, %v479_v9 }
  0xa2   :  { %v471_v15 = vld [vmem:[#allocation5 + $0xbe0] sm:$0xff]  ;;  %6430 = vmatpush1.bf16.msra.mxu0 %v8358_v21 }
  0xa3   :  { %v595_v17 = vld [vmem:[#allocation5 + $0xfc0] sm:$0xff]  ;;  %v8479_v24 = vcombine.high %v467_v14, %v471_v15  ;;  %6470 = vmatprep.subr.bf16.mxu1 %v8487_v13  ;;  %v8478_v30 = vcombine.low %v467_v14, %v471_v15 }
  0xa4   :  { %v599_v18 = vld [vmem:[#allocation5 + $0xfe0] sm:$0xff]  ;;  %6471 = vmatpush1.bf16.msra.mxu1 %v8486_v23 }
  0xa5   :  { %v8607_v25 = vcombine.high %v595_v17, %v599_v18  ;;  %v459_v53 = vld [vmem:[#allocation5 + $0xb80] sm:$0xff]  ;;  %6431 = vmatprep.subr.bf16.mxu0 %v8479_v24  ;;  %v8606_v31 = vcombine.low %v595_v17, %v599_v18 }
  0xa6   :  { %v463_v26 = vld [vmem:[#allocation5 + $0xba0] sm:$0xff]  ;;  %6432 = vmatpush2.bf16.msra.mxu0 %v8478_v30 }
  0xa7   :  { %v587_v28 = vld [vmem:[#allocation5 + $0xf80] sm:$0xff]  ;;  %v8471_v32 = vcombine.high %v459_v53, %v463_v26  ;;  %6472 = vmatprep.subr.bf16.mxu1 %v8607_v25  ;;  %v8470_v38 = vcombine.low %v459_v53, %v463_v26 }
  0xa8   :  { %v591_v54 = vld [vmem:[#allocation5 + $0xfa0] sm:$0xff]  ;;  %6473 = vmatpush2.bf16.msra.mxu1 %v8606_v31 }
  0xa9   :  { %v8599_v33 = vcombine.high %v587_v28, %v591_v54  ;;  %v451_v34 = vld [vmem:[#allocation5 + $0xb40] sm:$0xff]  ;;  %6433 = vmatprep.subr.bf16.mxu0 %v8471_v32  ;;  %v8598_v39 = vcombine.low %v587_v28, %v591_v54 }
  0xaa   :  { %v455_v35 = vld [vmem:[#allocation5 + $0xb60] sm:$0xff]  ;;  %6434 = vmatpush2.bf16.msra.mxu0 %v8470_v38 }
  0xab   :  { %v579_v36 = vld [vmem:[#allocation5 + $0xf40] sm:$0xff]  ;;  %v8463_v40 = vcombine.high %v451_v34, %v455_v35  ;;  %6474 = vmatprep.subr.bf16.mxu1 %v8599_v33  ;;  %v8462_v46 = vcombine.low %v451_v34, %v455_v35 }
  0xac   :  { %v583_v37 = vld [vmem:[#allocation5 + $0xf60] sm:$0xff]  ;;  %6475 = vmatpush2.bf16.msra.mxu1 %v8598_v39 }
  0xad   :  { %v8591_v41 = vcombine.high %v579_v36, %v583_v37  ;;  %v443_v42 = vld [vmem:[#allocation5 + $0xb00] sm:$0xff]  ;;  %6435 = vmatprep.subr.bf16.mxu0 %v8463_v40  ;;  %v8590_v47 = vcombine.low %v579_v36, %v583_v37  ;;  %v9519_v36 = vcombine.low %v9497_v19, %v9497_v19  ;;  %v9525_v40 = vcombine.low %v9503_v22, %v9503_v22 }
  0xae   :  { %v447_v43 = vld [vmem:[#allocation5 + $0xb20] sm:$0xff]  ;;  %6436 = vmatpush2.bf16.msra.mxu0 %v8462_v46 }
  0xaf   :  { %v571_v44 = vld [vmem:[#allocation5 + $0xf00] sm:$0xff]  ;;  %v8455_v48 = vcombine.high %v443_v42, %v447_v43  ;;  %6476 = vmatprep.subr.bf16.mxu1 %v8591_v41  ;;  %v8454_v56 = vcombine.low %v443_v42, %v447_v43  ;;  %v9527_v42 = vld [vmem:[#allocation2 + $0x28] sm:$0xff] }
  0xb0   :  { %v575_v45 = vld [vmem:[#allocation5 + $0xf20] sm:$0xff]  ;;  %6477 = vmatpush2.bf16.msra.mxu1 %v8590_v47 }
  0xb1   :  { %v8583_v49 = vcombine.high %v571_v44, %v575_v45  ;;  %v435_v50 = vld [vmem:[#allocation5 + $0xac0] sm:$0xff]  ;;  %6437 = vmatprep.subr.bf16.mxu0 %v8455_v48  ;;  %v8582_v57 = vcombine.low %v571_v44, %v575_v45 }
  0xb2   :  { %v439_v51 = vld [vmem:[#allocation5 + $0xae0] sm:$0xff]  ;;  %6438 = vmatpush2.bf16.msra.mxu0 %v8454_v56 }
  0xb3   :  { %v563_v52 = vld [vmem:[#allocation5 + $0xec0] sm:$0xff]  ;;  %v8447_v60 = vcombine.high %v435_v50, %v439_v51  ;;  %6478 = vmatprep.subr.bf16.mxu1 %v8583_v49  ;;  %v8446_v2 = vcombine.low %v435_v50, %v439_v51  ;;  %v9536_v49 = vcombine.high %v9527_v42, %v9527_v42 }
  0xb4   :  { %v567_v55 = vld [vmem:[#allocation5 + $0xee0] sm:$0xff]  ;;  %6479 = vmatpush2.bf16.msra.mxu1 %v8582_v57 }
  0xb5   :  { %v8575_v61 = vcombine.high %v563_v52, %v567_v55  ;;  %v427_v62 = vld [vmem:[#allocation5 + $0xa80] sm:$0xff]  ;;  %6439 = vmatprep.subr.bf16.mxu0 %v8447_v60  ;;  %v8574_v3 = vcombine.low %v563_v52, %v567_v55 }
  0xb6   :  { %v431_v63 = vld [vmem:[#allocation5 + $0xaa0] sm:$0xff]  ;;  %6440 = vmatpush2.bf16.msra.mxu0 %v8446_v2 }
  0xb7   :  { %v555_v0 = vld [vmem:[#allocation5 + $0xe80] sm:$0xff]  ;;  %v8439_v4 = vcombine.high %v427_v62, %v431_v63  ;;  %6480 = vmatprep.subr.bf16.mxu1 %v8575_v61  ;;  %v8438_v10 = vcombine.low %v427_v62, %v431_v63 }
  0xb8   :  { %v559_v1 = vld [vmem:[#allocation5 + $0xea0] sm:$0xff]  ;;  %6481 = vmatpush2.bf16.msra.mxu1 %v8574_v3 }
  0xb9   :  { %v8567_v5 = vcombine.high %v555_v0, %v559_v1  ;;  %v419_v6 = vld [vmem:[#allocation5 + $0xa40] sm:$0xff]  ;;  %6441 = vmatprep.subr.bf16.mxu0 %v8439_v4  ;;  %v8566_v11 = vcombine.low %v555_v0, %v559_v1 }
  0xba   :  { %v423_v7 = vld [vmem:[#allocation5 + $0xa60] sm:$0xff]  ;;  %6442 = vmatpush2.bf16.msra.mxu0 %v8438_v10 }
  0xbb   :  { %v547_v8 = vld [vmem:[#allocation5 + $0xe40] sm:$0xff]  ;;  %v8431_v12 = vcombine.high %v419_v6, %v423_v7  ;;  %6482 = vmatprep.subr.bf16.mxu1 %v8567_v5  ;;  %v8430_v21 = vcombine.low %v419_v6, %v423_v7 }
  0xbc   :  { %v551_v9 = vld [vmem:[#allocation5 + $0xe60] sm:$0xff]  ;;  %6483 = vmatpush2.bf16.msra.mxu1 %v8566_v11 }
  0xbd   :  { %v8559_v13 = vcombine.high %v547_v8, %v551_v9  ;;  %v411_v14 = vld [vmem:[#allocation5 + $0xa00] sm:$0xff]  ;;  %6443 = vmatprep.subr.bf16.mxu0 %v8431_v12  ;;  %v8558_v23 = vcombine.low %v547_v8, %v551_v9 }
  0xbe   :  { %v415_v15 = vld [vmem:[#allocation5 + $0xa20] sm:$0xff]  ;;  %6444 = vmatpush2.bf16.msra.mxu0 %v8430_v21 }
  0xbf   :  { %v539_v17 = vld [vmem:[#allocation5 + $0xe00] sm:$0xff]  ;;  %v8423_v24 = vcombine.high %v411_v14, %v415_v15  ;;  %6484 = vmatprep.subr.bf16.mxu1 %v8559_v13  ;;  %v8422_v30 = vcombine.low %v411_v14, %v415_v15 }
  0xc0   :  { %v543_v18 = vld [vmem:[#allocation5 + $0xe20] sm:$0xff]  ;;  %6485 = vmatpush2.bf16.msra.mxu1 %v8558_v23 }
  0xc1   :  { %v8551_v25 = vcombine.high %v539_v17, %v543_v18  ;;  %v659_v53 = vld [vmem:[#allocation5 + $0x11c0] sm:$0xff]  ;;  %6445 = vmatprep.subr.bf16.mxu0 %v8423_v24  ;;  %v8550_v31 = vcombine.low %v539_v17, %v543_v18 }
  0xc2   :  { %v663_v26 = vld [vmem:[#allocation5 + $0x11e0] sm:$0xff]  ;;  %6446 = vmatpush2.bf16.msra.mxu0 %v8422_v30 }
  0xc3   :  { %v787_v28 = vld [vmem:[#allocation5 + $0x15c0] sm:$0xff]  ;;  %v8671_v32 = vcombine.high %v659_v53, %v663_v26  ;;  %6486 = vmatprep.subr.bf16.mxu1 %v8551_v25  ;;  %v8670_v41 = vcombine.low %v659_v53, %v663_v26 }
  0xc4   :  { %v791_v54 = vld [vmem:[#allocation5 + $0x15e0] sm:$0xff]  ;;  %6487 = vmatpush2.bf16.msra.mxu1 %v8550_v31 }
  0xc5   :  { %v8799_v33 = vcombine.high %v787_v28, %v791_v54  ;;  %v651_v34 = vld [vmem:[#allocation5 + $0x1180] sm:$0xff]  ;;  %6497 = vmatprep.subr.bf16.mxu0 %v8671_v32  ;;  %v8798_v43 = vcombine.low %v787_v28, %v791_v54  ;;  %6448 = vmatmul.mubr.bf16.vlgmr.msra.gmra.mxu0 %v9519_v36 }
  0xc6   :  { %v655_v35 = vld [vmem:[#allocation5 + $0x11a0] sm:$0xff]  ;;  %6498 = vmatpush1.bf16.msra.mxu0 %v8670_v41 }
  0xc7   :  { %v779_v37 = vld [vmem:[#allocation5 + $0x1580] sm:$0xff]  ;;  %v8663_v44 = vcombine.high %v651_v34, %v655_v35  ;;  %6538 = vmatprep.subr.bf16.mxu1 %v8799_v33  ;;  %6489 = vmatmul.mubr.bf16.vlgmr.msra.gmra.mxu1 %v9525_v40  ;;  %v8662_v50 = vcombine.low %v651_v34, %v655_v35 }
  0xc8   :  { %v783_v38 = vld [vmem:[#allocation5 + $0x15a0] sm:$0xff]  ;;  %6539 = vmatpush1.bf16.msra.mxu1 %v8798_v43  ;;  %6570 = vmatprep.mubr.bf16.mxu1 %v9536_v49 }
  0xc9   :  { %v9521_v39 = vld [vmem:[#allocation2 + $0x20] sm:$0xff]  ;;  %v8791_v45 = vcombine.high %v779_v37, %v783_v38  ;;  %6499 = vmatprep.subr.bf16.mxu0 %v8663_v44  ;;  %v8790_v51 = vcombine.low %v779_v37, %v783_v38 }
  0xca   :  { %v643_v19 = vld [vmem:[#allocation5 + $0x1140] sm:$0xff]  ;;  %v9531_v47 = vcombine.high %v9521_v39, %v9521_v39  ;;  %6500 = vmatpush1.bf16.msra.mxu0 %v8662_v50 }
  0xcb   :  { %v647_v46 = vld [vmem:[#allocation5 + $0x1160] sm:$0xff]  ;;  %6540 = vmatprep.subr.bf16.mxu1 %v8791_v45 }
  0xcc   :  { %v771_v48 = vld [vmem:[#allocation5 + $0x1540] sm:$0xff]  ;;  %v8655_v52 = vcombine.high %v643_v19, %v647_v46  ;;  %6529 = vmatprep.mubr.bf16.mxu0 %v9531_v47  ;;  %v8654_v62 = vcombine.low %v643_v19, %v647_v46  ;;  %6541 = vmatpush1.bf16.msra.mxu1 %v8790_v51 }
  0xcd   :  { %v775_v22 = vld [vmem:[#allocation5 + $0x1560] sm:$0xff] }
  0xce   :  { %v8783_v55 = vcombine.high %v771_v48, %v775_v22  ;;  %v635_v56 = vld [vmem:[#allocation5 + $0x1100] sm:$0xff]  ;;  %6501 = vmatprep.subr.bf16.mxu0 %v8655_v52  ;;  %v8782_v63 = vcombine.low %v771_v48, %v775_v22 }
  0xcf   :  { %v639_v57 = vld [vmem:[#allocation5 + $0x1120] sm:$0xff]  ;;  %6502 = vmatpush1.bf16.msra.mxu0 %v8654_v62 }
  0xd0   :  { %v763_v60 = vld [vmem:[#allocation5 + $0x1500] sm:$0xff]  ;;  %v8647_v0 = vcombine.high %v635_v56, %v639_v57  ;;  %6542 = vmatprep.subr.bf16.mxu1 %v8783_v55  ;;  %v8646_v6 = vcombine.low %v635_v56, %v639_v57 }
  0xd1   :  { %v767_v61 = vld [vmem:[#allocation5 + $0x1520] sm:$0xff]  ;;  %6543 = vmatpush1.bf16.msra.mxu1 %v8782_v63 }
  0xd2   :  { %v8775_v1 = vcombine.high %v763_v60, %v767_v61  ;;  %v627_v2 = vld [vmem:[#allocation5 + $0x10c0] sm:$0xff]  ;;  %6503 = vmatprep.subr.bf16.mxu0 %v8647_v0  ;;  %v8774_v7 = vcombine.low %v763_v60, %v767_v61 }
  0xd3   :  { %v631_v3 = vld [vmem:[#allocation5 + $0x10e0] sm:$0xff]  ;;  %6504 = vmatpush1.bf16.msra.mxu0 %v8646_v6 }
  0xd4   :  { %v755_v4 = vld [vmem:[#allocation5 + $0x14c0] sm:$0xff]  ;;  %v8639_v8 = vcombine.high %v627_v2, %v631_v3  ;;  %6544 = vmatprep.subr.bf16.mxu1 %v8775_v1  ;;  %v8638_v14 = vcombine.low %v627_v2, %v631_v3 }
  0xd5   :  { %v759_v5 = vld [vmem:[#allocation5 + $0x14e0] sm:$0xff]  ;;  %6545 = vmatpush1.bf16.msra.mxu1 %v8774_v7 }
  0xd6   :  { %v8767_v9 = vcombine.high %v755_v4, %v759_v5  ;;  %v619_v10 = vld [vmem:[#allocation5 + $0x1080] sm:$0xff]  ;;  %6505 = vmatprep.subr.bf16.mxu0 %v8639_v8  ;;  %v8766_v15 = vcombine.low %v755_v4, %v759_v5 }
  0xd7   :  { %v623_v11 = vld [vmem:[#allocation5 + $0x10a0] sm:$0xff]  ;;  %6506 = vmatpush1.bf16.msra.mxu0 %v8638_v14 }
  0xd8   :  { %v747_v12 = vld [vmem:[#allocation5 + $0x1480] sm:$0xff]  ;;  %v8631_v17 = vcombine.high %v619_v10, %v623_v11  ;;  %6546 = vmatprep.subr.bf16.mxu1 %v8767_v9  ;;  %v8630_v53 = vcombine.low %v619_v10, %v623_v11 }
  0xd9   :  { %v751_v13 = vld [vmem:[#allocation5 + $0x14a0] sm:$0xff]  ;;  %6547 = vmatpush1.bf16.msra.mxu1 %v8766_v15 }
  0xda   :  { %v8759_v18 = vcombine.high %v747_v12, %v751_v13  ;;  %v611_v21 = vld [vmem:[#allocation5 + $0x1040] sm:$0xff]  ;;  %6507 = vmatprep.subr.bf16.mxu0 %v8631_v17  ;;  %v8758_v26 = vcombine.low %v747_v12, %v751_v13 }
  0xdb   :  { %v615_v23 = vld [vmem:[#allocation5 + $0x1060] sm:$0xff]  ;;  %6508 = vmatpush1.bf16.msra.mxu0 %v8630_v53 }
  0xdc   :  { %v739_v24 = vld [vmem:[#allocation5 + $0x1440] sm:$0xff]  ;;  %v8623_v28 = vcombine.high %v611_v21, %v615_v23  ;;  %6548 = vmatprep.subr.bf16.mxu1 %v8759_v18  ;;  %v8622_v34 = vcombine.low %v611_v21, %v615_v23 }
  0xdd   :  { %v743_v25 = vld [vmem:[#allocation5 + $0x1460] sm:$0xff]  ;;  %6549 = vmatpush1.bf16.msra.mxu1 %v8758_v26 }
  0xde   :  { %v8751_v54 = vcombine.high %v739_v24, %v743_v25  ;;  %v603_v30 = vld [vmem:[#allocation5 + $0x1000] sm:$0xff]  ;;  %6509 = vmatprep.subr.bf16.mxu0 %v8623_v28  ;;  %v8750_v35 = vcombine.low %v739_v24, %v743_v25 }
  0xdf   :  { %v607_v31 = vld [vmem:[#allocation5 + $0x1020] sm:$0xff]  ;;  %6510 = vmatpush1.bf16.msra.mxu0 %v8622_v34 }
  0xe0   :  { %v731_v32 = vld [vmem:[#allocation5 + $0x1400] sm:$0xff]  ;;  %v8615_v37 = vcombine.high %v603_v30, %v607_v31  ;;  %6550 = vmatprep.subr.bf16.mxu1 %v8751_v54  ;;  %v8614_v19 = vcombine.low %v603_v30, %v607_v31 }
  0xe1   :  { %v735_v33 = vld [vmem:[#allocation5 + $0x1420] sm:$0xff]  ;;  %6551 = vmatpush1.bf16.msra.mxu1 %v8750_v35 }
  0xe2   :  { %v8743_v38 = vcombine.high %v731_v32, %v735_v33  ;;  %v723_v41 = vld [vmem:[#allocation5 + $0x13c0] sm:$0xff]  ;;  %6511 = vmatprep.subr.bf16.mxu0 %v8615_v37  ;;  %v8742_v46 = vcombine.low %v731_v32, %v735_v33 }
  0xe3   :  { %v727_v43 = vld [vmem:[#allocation5 + $0x13e0] sm:$0xff]  ;;  %6512 = vmatpush1.bf16.msra.mxu0 %v8614_v19 }
  0xe4   :  { %v851_v44 = vld [vmem:[#allocation5 + $0x17c0] sm:$0xff]  ;;  %v8735_v48 = vcombine.high %v723_v41, %v727_v43  ;;  %6552 = vmatprep.subr.bf16.mxu1 %v8743_v38  ;;  %v8734_v56 = vcombine.low %v723_v41, %v727_v43 }
  0xe5   :  { %v855_v45 = vld [vmem:[#allocation5 + $0x17e0] sm:$0xff]  ;;  %6553 = vmatpush1.bf16.msra.mxu1 %v8742_v46 }
  0xe6   :  { %v8863_v22 = vcombine.high %v851_v44, %v855_v45  ;;  %v715_v50 = vld [vmem:[#allocation5 + $0x1380] sm:$0xff]  ;;  %6513 = vmatprep.subr.bf16.mxu0 %v8735_v48  ;;  %v8862_v57 = vcombine.low %v851_v44, %v855_v45 }
  0xe7   :  { %v719_v51 = vld [vmem:[#allocation5 + $0x13a0] sm:$0xff]  ;;  %6514 = vmatpush2.bf16.msra.mxu0 %v8734_v56 }
  0xe8   :  { %v843_v52 = vld [vmem:[#allocation5 + $0x1780] sm:$0xff]  ;;  %v8727_v60 = vcombine.high %v715_v50, %v719_v51  ;;  %6554 = vmatprep.subr.bf16.mxu1 %v8863_v22  ;;  %v8726_v2 = vcombine.low %v715_v50, %v719_v51 }
  0xe9   :  { %v847_v55 = vld [vmem:[#allocation5 + $0x17a0] sm:$0xff]  ;;  %6555 = vmatpush2.bf16.msra.mxu1 %v8862_v57 }
  0xea   :  { %v8855_v61 = vcombine.high %v843_v52, %v847_v55  ;;  %v707_v62 = vld [vmem:[#allocation5 + $0x1340] sm:$0xff]  ;;  %6515 = vmatprep.subr.bf16.mxu0 %v8727_v60  ;;  %v8854_v3 = vcombine.low %v843_v52, %v847_v55 }
  0xeb   :  { %v711_v63 = vld [vmem:[#allocation5 + $0x1360] sm:$0xff]  ;;  %6516 = vmatpush2.bf16.msra.mxu0 %v8726_v2 }
  0xec   :  { %v835_v0 = vld [vmem:[#allocation5 + $0x1740] sm:$0xff]  ;;  %v8719_v4 = vcombine.high %v707_v62, %v711_v63  ;;  %6556 = vmatprep.subr.bf16.mxu1 %v8855_v61  ;;  %v8718_v10 = vcombine.low %v707_v62, %v711_v63 }
  0xed   :  { %v839_v1 = vld [vmem:[#allocation5 + $0x1760] sm:$0xff]  ;;  %6557 = vmatpush2.bf16.msra.mxu1 %v8854_v3 }
  0xee   :  { %v8847_v5 = vcombine.high %v835_v0, %v839_v1  ;;  %v699_v6 = vld [vmem:[#allocation5 + $0x1300] sm:$0xff]  ;;  %6517 = vmatprep.subr.bf16.mxu0 %v8719_v4  ;;  %v8846_v11 = vcombine.low %v835_v0, %v839_v1  ;;  %v9543_v4 = vcombine.low %v9521_v39, %v9521_v39 }
  0xef   :  { %v703_v7 = vld [vmem:[#allocation5 + $0x1320] sm:$0xff]  ;;  %6518 = vmatpush2.bf16.msra.mxu0 %v8718_v10  ;;  %v9551_v10 = vld [vmem:[#allocation2 + $0x38] sm:$0xff] }
  0xf0   :  { %v827_v8 = vld [vmem:[#allocation5 + $0x1700] sm:$0xff]  ;;  %v8711_v12 = vcombine.high %v699_v6, %v703_v7  ;;  %6558 = vmatprep.subr.bf16.mxu1 %v8847_v5  ;;  %v8710_v21 = vcombine.low %v699_v6, %v703_v7  ;;  %v9545_v7 = vld [vmem:[#allocation2 + $0x30] sm:$0xff] }
  0xf1   :  { %v831_v9 = vld [vmem:[#allocation5 + $0x1720] sm:$0xff]  ;;  %6559 = vmatpush2.bf16.msra.mxu1 %v8846_v11 }
  0xf2   :  { %v8839_v13 = vcombine.high %v827_v8, %v831_v9  ;;  %v691_v14 = vld [vmem:[#allocation5 + $0x12c0] sm:$0xff]  ;;  %6519 = vmatprep.subr.bf16.mxu0 %v8711_v12  ;;  %v8838_v23 = vcombine.low %v827_v8, %v831_v9  ;;  %v9549_v8 = vcombine.low %v9527_v42, %v9527_v42 }
  0xf3   :  { %v695_v15 = vld [vmem:[#allocation5 + $0x12e0] sm:$0xff]  ;;  %6520 = vmatpush2.bf16.msra.mxu0 %v8710_v21 }
  0xf4   :  { %v819_v17 = vld [vmem:[#allocation5 + $0x16c0] sm:$0xff]  ;;  %v8703_v24 = vcombine.high %v691_v14, %v695_v15  ;;  %6560 = vmatprep.subr.bf16.mxu1 %v8839_v13  ;;  %v8702_v30 = vcombine.low %v691_v14, %v695_v15  ;;  %v9555_v15 = vcombine.high %v9545_v7, %v9545_v7 }
  0xf5   :  { %v823_v18 = vld [vmem:[#allocation5 + $0x16e0] sm:$0xff]  ;;  %6561 = vmatpush2.bf16.msra.mxu1 %v8838_v23 }
  0xf6   :  { %v8831_v25 = vcombine.high %v819_v17, %v823_v18  ;;  %v683_v53 = vld [vmem:[#allocation5 + $0x1280] sm:$0xff]  ;;  %6521 = vmatprep.subr.bf16.mxu0 %v8703_v24  ;;  %v8830_v31 = vcombine.low %v819_v17, %v823_v18  ;;  %v9560_v18 = vcombine.high %v9551_v10, %v9551_v10 }
  0xf7   :  { %v687_v26 = vld [vmem:[#allocation5 + $0x12a0] sm:$0xff]  ;;  %6522 = vmatpush2.bf16.msra.mxu0 %v8702_v30 }
  0xf8   :  { %v811_v28 = vld [vmem:[#allocation5 + $0x1680] sm:$0xff]  ;;  %v8695_v32 = vcombine.high %v683_v53, %v687_v26  ;;  %6562 = vmatprep.subr.bf16.mxu1 %v8831_v25  ;;  %v8694_v41 = vcombine.low %v683_v53, %v687_v26 }
  0xf9   :  { %v815_v54 = vld [vmem:[#allocation5 + $0x16a0] sm:$0xff]  ;;  %6563 = vmatpush2.bf16.msra.mxu1 %v8830_v31 }
  0xfa   :  { %v8823_v33 = vcombine.high %v811_v28, %v815_v54  ;;  %v675_v34 = vld [vmem:[#allocation5 + $0x1240] sm:$0xff]  ;;  %6523 = vmatprep.subr.bf16.mxu0 %v8695_v32  ;;  %v8822_v43 = vcombine.low %v811_v28, %v815_v54 }
  0xfb   :  { %v679_v35 = vld [vmem:[#allocation5 + $0x1260] sm:$0xff]  ;;  %6524 = vmatpush2.bf16.msra.mxu0 %v8694_v41 }
  0xfc   :  { %v803_v37 = vld [vmem:[#allocation5 + $0x1640] sm:$0xff]  ;;  %v8687_v44 = vcombine.high %v675_v34, %v679_v35  ;;  %6564 = vmatprep.subr.bf16.mxu1 %v8823_v33  ;;  %v8686_v50 = vcombine.low %v675_v34, %v679_v35 }
  0xfd   :  { %v807_v38 = vld [vmem:[#allocation5 + $0x1660] sm:$0xff]  ;;  %6565 = vmatpush2.bf16.msra.mxu1 %v8822_v43 }
  0xfe   :  { %v8815_v45 = vcombine.high %v803_v37, %v807_v38  ;;  %v667_v19 = vld [vmem:[#allocation5 + $0x1200] sm:$0xff]  ;;  %6525 = vmatprep.subr.bf16.mxu0 %v8687_v44  ;;  %v8814_v51 = vcombine.low %v803_v37, %v807_v38 }
  0xff   :  { %v671_v46 = vld [vmem:[#allocation5 + $0x1220] sm:$0xff]  ;;  %6526 = vmatpush2.bf16.msra.mxu0 %v8686_v50 }
 0x100   :  { %v795_v48 = vld [vmem:[#allocation5 + $0x1600] sm:$0xff]  ;;  %v8679_v52 = vcombine.high %v667_v19, %v671_v46  ;;  %6566 = vmatprep.subr.bf16.mxu1 %v8815_v45  ;;  %v8678_v62 = vcombine.low %v667_v19, %v671_v46 }
 0x101   :  { %v799_v22 = vld [vmem:[#allocation5 + $0x1620] sm:$0xff]  ;;  %6567 = vmatpush2.bf16.msra.mxu1 %v8814_v51 }
 0x102   :  { %v8807_v55 = vcombine.high %v795_v48, %v799_v22  ;;  %v915_v56 = vld [vmem:[#allocation5 + $0x19c0] sm:$0xff]  ;;  %6527 = vmatprep.subr.bf16.mxu0 %v8679_v52  ;;  %v8806_v63 = vcombine.low %v795_v48, %v799_v22 }
 0x103   :  { %v919_v57 = vld [vmem:[#allocation5 + $0x19e0] sm:$0xff]  ;;  %6528 = vmatpush2.bf16.msra.mxu0 %v8678_v62 }
 0x104   :  { %v1043_v60 = vld [vmem:[#allocation5 + $0x1dc0] sm:$0xff]  ;;  %v8927_v0 = vcombine.high %v915_v56, %v919_v57  ;;  %6568 = vmatprep.subr.bf16.mxu1 %v8807_v55  ;;  %v8926_v9 = vcombine.low %v915_v56, %v919_v57 }
 0x105   :  { %v1047_v61 = vld [vmem:[#allocation5 + $0x1de0] sm:$0xff]  ;;  %6569 = vmatpush2.bf16.msra.mxu1 %v8806_v63 }
 0x106   :  { %v9055_v1 = vcombine.high %v1043_v60, %v1047_v61  ;;  %v907_v2 = vld [vmem:[#allocation5 + $0x1980] sm:$0xff]  ;;  %6579 = vmatprep.subr.bf16.mxu0 %v8927_v0  ;;  %v9054_v11 = vcombine.low %v1043_v60, %v1047_v61  ;;  %6530 = vmatmul.mubr.bf16.vlgmr.msra.gmra.mxu0 %v9543_v4 }
 0x107   :  { %v911_v3 = vld [vmem:[#allocation5 + $0x19a0] sm:$0xff]  ;;  %6580 = vmatpush1.bf16.msra.mxu0 %v8926_v9  ;;  %6611 = vmatprep.mubr.bf16.mxu0 %v9555_v15 }
 0x108   :  { %v1035_v5 = vld [vmem:[#allocation5 + $0x1d80] sm:$0xff]  ;;  %v8919_v12 = vcombine.high %v907_v2, %v911_v3  ;;  %6620 = vmatprep.subr.bf16.mxu1 %v9055_v1  ;;  %6571 = vmatmul.mubr.bf16.vlgmr.msra.gmra.mxu1 %v9549_v8  ;;  %v8918_v21 = vcombine.low %v907_v2, %v911_v3 }
 0x109   :  { %v1039_v6 = vld [vmem:[#allocation5 + $0x1da0] sm:$0xff]  ;;  %6621 = vmatpush1.bf16.msra.mxu1 %v9054_v11  ;;  %6652 = vmatprep.mubr.bf16.mxu1 %v9560_v18 }
 0x10a   :  { %v9047_v13 = vcombine.high %v1035_v5, %v1039_v6  ;;  %v899_v39 = vld [vmem:[#allocation5 + $0x1940] sm:$0xff]  ;;  %6581 = vmatprep.subr.bf16.mxu0 %v8919_v12  ;;  %v9046_v23 = vcombine.low %v1035_v5, %v1039_v6 }
 0x10b   :  { %v903_v14 = vld [vmem:[#allocation5 + $0x1960] sm:$0xff]  ;;  %6582 = vmatpush1.bf16.msra.mxu0 %v8918_v21 }
 0x10c   :  { %v1027_v17 = vld [vmem:[#allocation5 + $0x1d40] sm:$0xff]  ;;  %v8911_v24 = vcombine.high %v899_v39, %v903_v14  ;;  %6622 = vmatprep.subr.bf16.mxu1 %v9047_v13  ;;  %v8910_v30 = vcombine.low %v899_v39, %v903_v14 }
 0x10d   :  { %v1031_v42 = vld [vmem:[#allocation5 + $0x1d60] sm:$0xff]  ;;  %6623 = vmatpush1.bf16.msra.mxu1 %v9046_v23 }
 0x10e   :  { %v9039_v25 = vcombine.high %v1027_v17, %v1031_v42  ;;  %v891_v53 = vld [vmem:[#allocation5 + $0x1900] sm:$0xff]  ;;  %6583 = vmatprep.subr.bf16.mxu0 %v8911_v24  ;;  %v9038_v31 = vcombine.low %v1027_v17, %v1031_v42 }
 0x10f   :  { %v895_v26 = vld [vmem:[#allocation5 + $0x1920] sm:$0xff]  ;;  %6584 = vmatpush1.bf16.msra.mxu0 %v8910_v30 }
 0x110   :  { %v1019_v28 = vld [vmem:[#allocation5 + $0x1d00] sm:$0xff]  ;;  %v8903_v32 = vcombine.high %v891_v53, %v895_v26  ;;  %6624 = vmatprep.subr.bf16.mxu1 %v9039_v25  ;;  %v8902_v41 = vcombine.low %v891_v53, %v895_v26 }
 0x111   :  { %v1023_v54 = vld [vmem:[#allocation5 + $0x1d20] sm:$0xff]  ;;  %6625 = vmatpush1.bf16.msra.mxu1 %v9038_v31 }
 0x112   :  { %v9031_v33 = vcombine.high %v1019_v28, %v1023_v54  ;;  %v883_v34 = vld [vmem:[#allocation5 + $0x18c0] sm:$0xff]  ;;  %6585 = vmatprep.subr.bf16.mxu0 %v8903_v32  ;;  %v9030_v43 = vcombine.low %v1019_v28, %v1023_v54 }
 0x113   :  { %v887_v35 = vld [vmem:[#allocation5 + $0x18e0] sm:$0xff]  ;;  %6586 = vmatpush1.bf16.msra.mxu0 %v8902_v41 }
 0x114   :  { %v1011_v37 = vld [vmem:[#allocation5 + $0x1cc0] sm:$0xff]  ;;  %v8895_v44 = vcombine.high %v883_v34, %v887_v35  ;;  %6626 = vmatprep.subr.bf16.mxu1 %v9031_v33  ;;  %v8894_v50 = vcombine.low %v883_v34, %v887_v35 }
 0x115   :  { %v1015_v38 = vld [vmem:[#allocation5 + $0x1ce0] sm:$0xff]  ;;  %6627 = vmatpush1.bf16.msra.mxu1 %v9030_v43 }
 0x116   :  { %v9023_v45 = vcombine.high %v1011_v37, %v1015_v38  ;;  %v875_v19 = vld [vmem:[#allocation5 + $0x1880] sm:$0xff]  ;;  %6587 = vmatprep.subr.bf16.mxu0 %v8895_v44  ;;  %v9022_v51 = vcombine.low %v1011_v37, %v1015_v38 }
 0x117   :  { %v879_v46 = vld [vmem:[#allocation5 + $0x18a0] sm:$0xff]  ;;  %6588 = vmatpush1.bf16.msra.mxu0 %v8894_v50 }
 0x118   :  { %v1003_v48 = vld [vmem:[#allocation5 + $0x1c80] sm:$0xff]  ;;  %v8887_v52 = vcombine.high %v875_v19, %v879_v46  ;;  %6628 = vmatprep.subr.bf16.mxu1 %v9023_v45  ;;  %v8886_v62 = vcombine.low %v875_v19, %v879_v46 }
 0x119   :  { %v1007_v22 = vld [vmem:[#allocation5 + $0x1ca0] sm:$0xff]  ;;  %6629 = vmatpush1.bf16.msra.mxu1 %v9022_v51 }
 0x11a   :  { %v9015_v55 = vcombine.high %v1003_v48, %v1007_v22  ;;  %v867_v56 = vld [vmem:[#allocation5 + $0x1840] sm:$0xff]  ;;  %6589 = vmatprep.subr.bf16.mxu0 %v8887_v52  ;;  %v9014_v63 = vcombine.low %v1003_v48, %v1007_v22 }
 0x11b   :  { %v871_v57 = vld [vmem:[#allocation5 + $0x1860] sm:$0xff]  ;;  %6590 = vmatpush1.bf16.msra.mxu0 %v8886_v62 }
 0x11c   :  { %v995_v60 = vld [vmem:[#allocation5 + $0x1c40] sm:$0xff]  ;;  %v8879_v0 = vcombine.high %v867_v56, %v871_v57  ;;  %6630 = vmatprep.subr.bf16.mxu1 %v9015_v55  ;;  %v8878_v9 = vcombine.low %v867_v56, %v871_v57 }
 0x11d   :  { %v999_v61 = vld [vmem:[#allocation5 + $0x1c60] sm:$0xff]  ;;  %6631 = vmatpush1.bf16.msra.mxu1 %v9014_v63 }
 0x11e   :  { %v9007_v1 = vcombine.high %v995_v60, %v999_v61  ;;  %v859_v2 = vld [vmem:[#allocation5 + $0x1800] sm:$0xff]  ;;  %6591 = vmatprep.subr.bf16.mxu0 %v8879_v0  ;;  %v9006_v11 = vcombine.low %v995_v60, %v999_v61 }
 0x11f   :  { %v863_v3 = vld [vmem:[#allocation5 + $0x1820] sm:$0xff]  ;;  %6592 = vmatpush1.bf16.msra.mxu0 %v8878_v9 }
 0x120   :  { %v987_v5 = vld [vmem:[#allocation5 + $0x1c00] sm:$0xff]  ;;  %v8871_v12 = vcombine.high %v859_v2, %v863_v3  ;;  %6632 = vmatprep.subr.bf16.mxu1 %v9007_v1  ;;  %v8870_v21 = vcombine.low %v859_v2, %v863_v3 }
 0x121   :  { %v991_v6 = vld [vmem:[#allocation5 + $0x1c20] sm:$0xff]  ;;  %6633 = vmatpush1.bf16.msra.mxu1 %v9006_v11 }
 0x122   :  { %v8999_v13 = vcombine.high %v987_v5, %v991_v6  ;;  %v979_v39 = vld [vmem:[#allocation5 + $0x1bc0] sm:$0xff]  ;;  %6593 = vmatprep.subr.bf16.mxu0 %v8871_v12  ;;  %v8998_v23 = vcombine.low %v987_v5, %v991_v6 }
 0x123   :  { %v983_v14 = vld [vmem:[#allocation5 + $0x1be0] sm:$0xff]  ;;  %6594 = vmatpush1.bf16.msra.mxu0 %v8870_v21 }
 0x124   :  { %v1107_v17 = vld [vmem:[#allocation5 + $0x1fc0] sm:$0xff]  ;;  %v8991_v24 = vcombine.high %v979_v39, %v983_v14  ;;  %6634 = vmatprep.subr.bf16.mxu1 %v8999_v13  ;;  %v8990_v30 = vcombine.low %v979_v39, %v983_v14 }
 0x125   :  { %v1111_v42 = vld [vmem:[#allocation5 + $0x1fe0] sm:$0xff]  ;;  %6635 = vmatpush1.bf16.msra.mxu1 %v8998_v23  ;;  %v1117_v23 = vlaneseq }
 0x126   :  { %v9119_v25 = vcombine.high %v1107_v17, %v1111_v42  ;;  %v971_v53 = vld [vmem:[#allocation5 + $0x1b80] sm:$0xff]  ;;  %6595 = vmatprep.subr.bf16.mxu0 %v8991_v24  ;;  %v9118_v31 = vcombine.low %v1107_v17, %v1111_v42 }
 0x127   :  { %v975_v26 = vld [vmem:[#allocation5 + $0x1ba0] sm:$0xff]  ;;  %6596 = vmatpush2.bf16.msra.mxu0 %v8990_v30 }
 0x128   :  { %v1099_v28 = vld [vmem:[#allocation5 + $0x1f80] sm:$0xff]  ;;  %v8983_v32 = vcombine.high %v971_v53, %v975_v26  ;;  %6636 = vmatprep.subr.bf16.mxu1 %v9119_v25  ;;  %v8982_v41 = vcombine.low %v971_v53, %v975_v26 }
 0x129   :  { %v1103_v54 = vld [vmem:[#allocation5 + $0x1fa0] sm:$0xff]  ;;  %6637 = vmatpush2.bf16.msra.mxu1 %v9118_v31 }
 0x12a   :  { %v9111_v33 = vcombine.high %v1099_v28, %v1103_v54  ;;  %v963_v34 = vld [vmem:[#allocation5 + $0x1b40] sm:$0xff]  ;;  %6597 = vmatprep.subr.bf16.mxu0 %v8983_v32  ;;  %v9110_v43 = vcombine.low %v1099_v28, %v1103_v54  ;;  %v9565_v32 = vshrl.u32 %v1117_v23, 7 }
 0x12b   :  { %v967_v35 = vld [vmem:[#allocation5 + $0x1b60] sm:$0xff]  ;;  %6598 = vmatpush2.bf16.msra.mxu0 %v8982_v41  ;;  %v276_v41 = vld [vmem:[#allocation5 + $0x5c8] sm:$0xff] }
 0x12c   :  { %v1091_v37 = vld [vmem:[#allocation5 + $0x1f40] sm:$0xff]  ;;  %v8975_v44 = vcombine.high %v963_v34, %v967_v35  ;;  %6638 = vmatprep.subr.bf16.mxu1 %v9111_v33  ;;  %v8974_v50 = vcombine.low %v963_v34, %v967_v35 }
 0x12d   :  { %v1095_v38 = vld [vmem:[#allocation5 + $0x1f60] sm:$0xff]  ;;  %6639 = vmatpush2.bf16.msra.mxu1 %v9110_v43  ;;  %v280_v43 = vld [vmem:[#allocation5 + $0x5e8] sm:$0xff] }
 0x12e   :  { %v9103_v45 = vcombine.high %v1091_v37, %v1095_v38  ;;  %v955_v19 = vld [vmem:[#allocation5 + $0x1b00] sm:$0xff]  ;;  %6599 = vmatprep.subr.bf16.mxu0 %v8975_v44  ;;  %v9102_v51 = vcombine.low %v1091_v37, %v1095_v38  ;;  %v148_v37 = vld [vmem:[#allocation5 + $0x1c8] sm:$0xff] }
 0x12f   :  { %v959_v46 = vld [vmem:[#allocation5 + $0x1b20] sm:$0xff]  ;;  %6600 = vmatpush2.bf16.msra.mxu0 %v8974_v50  ;;  %v152_v38 = vld [vmem:[#allocation5 + $0x1e8] sm:$0xff]  ;;  %v1123_v50 = vsub.s32 1, %v9565_v32 }
 0x130   :  { %v1083_v48 = vld [vmem:[#allocation5 + $0x1f00] sm:$0xff]  ;;  %v8967_v52 = vcombine.high %v955_v19, %v959_v46  ;;  %6640 = vmatprep.subr.bf16.mxu1 %v9103_v45  ;;  %v8966_v62 = vcombine.low %v955_v19, %v959_v46  ;;  %v1119_v45 = vsub.s32 0, %v9565_v32 }
 0x131   :  { %v1087_v22 = vld [vmem:[#allocation5 + $0x1f20] sm:$0xff]  ;;  %6641 = vmatpush2.bf16.msra.mxu1 %v9102_v51  ;;  %v140_v51 = vld [vmem:[#allocation5 + $0x188] sm:$0xff] }
 0x132   :  { %v9095_v55 = vcombine.high %v1083_v48, %v1087_v22  ;;  %v947_v56 = vld [vmem:[#allocation5 + $0x1ac0] sm:$0xff]  ;;  %6601 = vmatprep.subr.bf16.mxu0 %v8967_v52  ;;  %v9094_v63 = vcombine.low %v1083_v48, %v1087_v22  ;;  %v8161_v48 = vcombine.high %v148_v37, %v152_v38  ;;  %v8289_v22 = vcombine.high %v276_v41, %v280_v43  ;;  %v144_v52 = vld [vmem:[#allocation5 + $0x1a8] sm:$0xff] }
 0x133   :  { %v951_v57 = vld [vmem:[#allocation5 + $0x1ae0] sm:$0xff]  ;;  %6602 = vmatpush2.bf16.msra.mxu0 %v8966_v62  ;;  %v8160_v62 = vcombine.low %v148_v37, %v152_v38 }
 0x134   :  { %v1075_v60 = vld [vmem:[#allocation5 + $0x1ec0] sm:$0xff]  ;;  %v8959_v0 = vcombine.high %v947_v56, %v951_v57  ;;  %6642 = vmatprep.subr.bf16.mxu1 %v9095_v55  ;;  %v8958_v9 = vcombine.low %v947_v56, %v951_v57  ;;  %v9571_v55 = vcombine.low %v9545_v7, %v9545_v7  ;;  %v268_v56 = vld [vmem:[#allocation5 + $0x588] sm:$0xff] }
 0x135   :  { %v1079_v61 = vld [vmem:[#allocation5 + $0x1ee0] sm:$0xff]  ;;  %6643 = vmatpush2.bf16.msra.mxu1 %v9094_v63  ;;  %v272_v57 = vld [vmem:[#allocation5 + $0x5a8] sm:$0xff]  ;;  %v8288_v63 = vcombine.low %v276_v41, %v280_v43 }
 0x136   :  { %v9087_v1 = vcombine.high %v1075_v60, %v1079_v61  ;;  %v939_v2 = vld [vmem:[#allocation5 + $0x1a80] sm:$0xff]  ;;  %6603 = vmatprep.subr.bf16.mxu0 %v8959_v0  ;;  %v9086_v11 = vcombine.low %v1075_v60, %v1079_v61  ;;  %v9575_v61 = vcombine.low %v9551_v10, %v9551_v10  ;;  %v8153_v0 = vcombine.high %v140_v51, %v144_v52  ;;  %v116_v41 = vld [vmem:[#allocation5 + $0xc8] sm:$0xff] }
 0x137   :  { %v943_v3 = vld [vmem:[#allocation5 + $0x1aa0] sm:$0xff]  ;;  %6604 = vmatpush2.bf16.msra.mxu0 %v8958_v9  ;;  %v264_v9 = vld [vmem:[#allocation5 + $0x568] sm:$0xff]  ;;  %v8152_v10 = vcombine.low %v140_v51, %v144_v52 }
 0x138   :  { %v1067_v5 = vld [vmem:[#allocation5 + $0x1e80] sm:$0xff]  ;;  %v8951_v12 = vcombine.high %v939_v2, %v943_v3  ;;  %6644 = vmatprep.subr.bf16.mxu1 %v9087_v1  ;;  %v8950_v21 = vcombine.low %v939_v2, %v943_v3  ;;  %v8281_v2 = vcombine.high %v268_v56, %v272_v57  ;;  %v132_v3 = vld [vmem:[#allocation5 + $0x148] sm:$0xff] }
 0x139   :  { %v1071_v6 = vld [vmem:[#allocation5 + $0x1ea0] sm:$0xff]  ;;  %6645 = vmatpush2.bf16.msra.mxu1 %v9086_v11  ;;  %v120_v43 = vld [vmem:[#allocation5 + $0xe8] sm:$0xff] }
 0x13a   :  { %v9079_v13 = vcombine.high %v1067_v5, %v1071_v6  ;;  %v931_v39 = vld [vmem:[#allocation5 + $0x1a40] sm:$0xff]  ;;  %6605 = vmatprep.subr.bf16.mxu0 %v8951_v12  ;;  %v9078_v24 = vcombine.low %v1067_v5, %v1071_v6  ;;  %v136_v5 = vld [vmem:[#allocation5 + $0x168] sm:$0xff] }
 0x13b   :  { %v935_v14 = vld [vmem:[#allocation5 + $0x1a60] sm:$0xff]  ;;  %6606 = vmatpush2.bf16.msra.mxu0 %v8950_v21  ;;  %v260_v6 = vld [vmem:[#allocation5 + $0x548] sm:$0xff] }
 0x13c   :  { %v1059_v17 = vld [vmem:[#allocation5 + $0x1e40] sm:$0xff]  ;;  %v8943_v25 = vcombine.high %v931_v39, %v935_v14  ;;  %6646 = vmatprep.subr.bf16.mxu1 %v9079_v13  ;;  %v8942_v31 = vcombine.low %v931_v39, %v935_v14  ;;  %v8280_v39 = vcombine.low %v268_v56, %v272_v57  ;;  %v8145_v14 = vcombine.high %v132_v3, %v136_v5  ;;  %v112_v51 = vld [vmem:[#allocation5 + $0xa8] sm:$0xff] }
 0x13d   :  { %v1063_v42 = vld [vmem:[#allocation5 + $0x1e60] sm:$0xff]  ;;  %6647 = vmatpush2.bf16.msra.mxu1 %v9078_v24  ;;  %v8273_v23 = vcombine.high %v260_v6, %v264_v9  ;;  %v124_v24 = vld [vmem:[#allocation5 + $0x108] sm:$0xff]  ;;  %v8128_v57 = vcombine.low %v116_v41, %v120_v43 }
 0x13e   :  { %v9071_v53 = vcombine.high %v1059_v17, %v1063_v42  ;;  %v923_v26 = vld [vmem:[#allocation5 + $0x1a00] sm:$0xff]  ;;  %6607 = vmatprep.subr.bf16.mxu0 %v8943_v25  ;;  %v9070_v33 = vcombine.low %v1059_v17, %v1063_v42  ;;  %v128_v25 = vld [vmem:[#allocation5 + $0x128] sm:$0xff] }
 0x13f   :  { %v927_v28 = vld [vmem:[#allocation5 + $0x1a20] sm:$0xff]  ;;  %6608 = vmatpush2.bf16.msra.mxu0 %v8942_v31  ;;  %v8144_v31 = vcombine.low %v132_v3, %v136_v5  ;;  %v236_v52 = vld [vmem:[#allocation5 + $0x488] sm:$0xff] }
 0x140   :  { %v1051_v54 = vld [vmem:[#allocation5 + $0x1e00] sm:$0xff]  ;;  %v8935_v34 = vcombine.high %v923_v26, %v927_v28  ;;  %6648 = vmatprep.subr.bf16.mxu1 %v9071_v53  ;;  %v8934_v44 = vcombine.low %v923_v26, %v927_v28  ;;  %v252_v26 = vld [vmem:[#allocation5 + $0x508] sm:$0xff] }
 0x141   :  { %v1055_v30 = vld [vmem:[#allocation5 + $0x1e20] sm:$0xff]  ;;  %6649 = vmatpush2.bf16.msra.mxu1 %v9070_v33  ;;  %v256_v28 = vld [vmem:[#allocation5 + $0x528] sm:$0xff] }
 0x142   :  { %v9063_v35 = vcombine.high %v1051_v54, %v1055_v30  ;;  %6609 = vmatprep.subr.bf16.mxu0 %v8935_v34  ;;  %v9062_v19 = vcombine.low %v1051_v54, %v1055_v30  ;;  %v1115_v46 = vld [vmem:[#allocation7] sm:$0xff]  ;;  %v8272_v34 = vcombine.low %v260_v6, %v264_v9  ;;  %v8265_v38 = vcombine.high %v252_v26, %v256_v28  ;;  %v240_v56 = vld [vmem:[#allocation5 + $0x4a8] sm:$0xff] }
 0x143   :  { %6610 = vmatpush2.bf16.msra.mxu0 %v8934_v44  ;;  %v1120_v60 = vrot.slane %v1115_v46, %v1119_v45  ;;  %v1124_v1 = vrot.slane %v1115_v46, %v1123_v50  ;;  %v244_v44 = vld [vmem:[#allocation5 + $0x4c8] sm:$0xff]  ;;  %v8264_v46 = vcombine.low %v252_v26, %v256_v28 }
 0x144   :  { %6650 = vmatprep.subr.bf16.mxu1 %v9063_v35  ;;  %6661 = vmatprep.subr.bf16.mxu0 %v8161_v48  ;;  %v8137_v35 = vcombine.high %v124_v24, %v128_v25  ;;  %v248_v45 = vld [vmem:[#allocation5 + $0x4e8] sm:$0xff]  ;;  %v8129_v48 = vcombine.high %v116_v41, %v120_v43 }
 0x145   :  { %6651 = vmatpush2.bf16.msra.mxu1 %v9062_v19  ;;  %v6367_v7 = vpop.f32.mrf.mxu0  ;;  %v8136_v19 = vcombine.low %v124_v24, %v128_v25  ;;  %v108_v50 = vld [vmem:[#allocation5 + $0x88] sm:$0xff] }
 0x146   :  { %6702 = vmatprep.subr.bf16.mxu1 %v8289_v22  ;;  %6612 = vmatmul.mubr.bf16.vlgmr.msra.gmra.mxu0 %v9571_v55  ;;  %v6368_v11 = vadd.f32 %v6367_v7, %v1120_v60  ;;  %v8257_v22 = vcombine.high %v244_v44, %v248_v45  ;;  %v8256_v60 = vcombine.low %v244_v44, %v248_v45  ;;  %v232_v3 = vld [vmem:[#allocation5 + $0x468] sm:$0xff] }
 0x147   :  { %v6408_v12 = vpop.f32.mrf.mxu1  ;;  %6662 = vmatpush1.bf16.msra.mxu0 %v8160_v62  ;;  %v6369_v13 = vpop.f32.mrf.mxu0  ;;  %6693 = vmatprep.mubr.bf16.mxu0 %v9485_v58  ;;  %v8121_v62 = vcombine.high %v108_v50, %v112_v51  ;;  %v8120_v5 = vcombine.low %v108_v50, %v112_v51  ;;  %v8248_v7 = vcombine.low %v236_v52, %v240_v56  ;;  %v216_v24 = vld [vmem:[#allocation5 + $0x3e8] sm:$0xff] }
 0x148   :  { %6653 = vmatmul.mubr.bf16.vlgmr.msra.gmra.mxu1 %v9575_v61  ;;  %6663 = vmatprep.subr.bf16.mxu0 %v8153_v0  ;;  %v9579_v17 = vadd.f32 %v6408_v12, %v6368_v11  ;;  %v6370_v42 = vadd.f32 %v6369_v13, %v1124_v1  ;;  %v100_v0 = vld [vmem:[#allocation5 + $0x48] sm:$0xff] }
 0x149   :  { %6703 = vmatpush1.bf16.msra.mxu1 %v8288_v63  ;;  %v6410_v21 = vpop.f32.mrf.mxu1  ;;  %v6371_v53 = vpop.f32.mrf.mxu0  ;;  %6734 = vmatprep.mubr.bf16.mxu1 %v9489_v59  ;;  %v8249_v63 = vcombine.high %v236_v52, %v240_v56  ;;  %v104_v1 = vld [vmem:[#allocation5 + $0x68] sm:$0xff] }
 0x14a   :  { %6704 = vmatprep.subr.bf16.mxu1 %v8281_v2  ;;  %v9583_v54 = vadd.f32 %v6410_v21, %v6370_v42  ;;  %v228_v2 = vld [vmem:[#allocation5 + $0x448] sm:$0xff]  ;;  %v8113_v6 = vcombine.high %v100_v0, %v104_v1 }
 0x14b   :  { %v6412_v30 = vpop.f32.mrf.mxu1  ;;  %6664 = vmatpush1.bf16.msra.mxu0 %v8152_v10  ;;  %v6372_v33 = vpop.f32.mrf.mxu0  ;;  %v8241_v9 = vcombine.high %v228_v2, %v232_v3  ;;  %v92_v11 = vld [vmem:[#allocation5 + $0x8] sm:$0xff] }
 0x14c   :  { %6665 = vmatprep.subr.bf16.mxu0 %v8145_v14  ;;  %v96_v12 = vld [vmem:[#allocation5 + $0x28] sm:$0xff]  ;;  %v8240_v14 = vcombine.low %v228_v2, %v232_v3 }
 0x14d   :  { %6705 = vmatpush1.bf16.msra.mxu1 %v8280_v39  ;;  %v6413_v37 = vpop.f32.mrf.mxu1  ;;  %v220_v10 = vld [vmem:[#allocation5 + $0x408] sm:$0xff]  ;;  %v8112_v39 = vcombine.low %v100_v0, %v104_v1  ;;  %v8105_v42 = vcombine.high %v92_v11, %v96_v12  ;;  %v8104_v26 = vcombine.low %v92_v11, %v96_v12 }
 0x14e   :  { %6706 = vmatprep.subr.bf16.mxu1 %v8273_v23  ;;  %v224_v13 = vld [vmem:[#allocation5 + $0x428] sm:$0xff] }
 0x14f   :  { %6666 = vmatpush1.bf16.msra.mxu0 %v8144_v31  ;;  %v8233_v21 = vcombine.high %v220_v10, %v224_v13  ;;  %v212_v23 = vld [vmem:[#allocation5 + $0x3c8] sm:$0xff]  ;;  %v8232_v28 = vcombine.low %v220_v10, %v224_v13 }
 0x150   :  { %6667 = vmatprep.subr.bf16.mxu0 %v8137_v35  ;;  %v340_v25 = vld [vmem:[#allocation5 + $0x7c8] sm:$0xff]  ;;  %v8225_v30 = vcombine.high %v212_v23, %v216_v24 }
 0x151   :  { %6707 = vmatpush1.bf16.msra.mxu1 %v8272_v34  ;;  %v344_v53 = vld [vmem:[#allocation5 + $0x7e8] sm:$0xff] }
 0x152   :  { %6708 = vmatprep.subr.bf16.mxu1 %v8265_v38  ;;  %v8353_v31 = vcombine.high %v340_v25, %v344_v53  ;;  %v204_v33 = vld [vmem:[#allocation5 + $0x388] sm:$0xff]  ;;  %v8224_v38 = vcombine.low %v212_v23, %v216_v24  ;;  %v8352_v41 = vcombine.low %v340_v25, %v344_v53 }
 0x153   :  { %6668 = vmatpush1.bf16.msra.mxu0 %v8136_v19  ;;  %v208_v34 = vld [vmem:[#allocation5 + $0x3a8] sm:$0xff] }
 0x154   :  { %6669 = vmatprep.subr.bf16.mxu0 %v8129_v48  ;;  %v332_v35 = vld [vmem:[#allocation5 + $0x788] sm:$0xff]  ;;  %v8217_v43 = vcombine.high %v204_v33, %v208_v34 }
 0x155   :  { %6709 = vmatpush1.bf16.msra.mxu1 %v8264_v46  ;;  %v336_v37 = vld [vmem:[#allocation5 + $0x7a8] sm:$0xff] }
 0x156   :  { %6710 = vmatprep.subr.bf16.mxu1 %v8257_v22  ;;  %v8345_v44 = vcombine.high %v332_v35, %v336_v37  ;;  %v196_v45 = vld [vmem:[#allocation5 + $0x348] sm:$0xff]  ;;  %v8216_v22 = vcombine.low %v204_v33, %v208_v34  ;;  %v8344_v50 = vcombine.low %v332_v35, %v336_v37 }
 0x157   :  { %6670 = vmatpush1.bf16.msra.mxu0 %v8128_v57  ;;  %v200_v19 = vld [vmem:[#allocation5 + $0x368] sm:$0xff] }
 0x158   :  { %6671 = vmatprep.subr.bf16.mxu0 %v8121_v62  ;;  %v324_v46 = vld [vmem:[#allocation5 + $0x748] sm:$0xff]  ;;  %v8209_v51 = vcombine.high %v196_v45, %v200_v19 }
 0x159   :  { %6711 = vmatpush1.bf16.msra.mxu1 %v8256_v60  ;;  %v328_v48 = vld [vmem:[#allocation5 + $0x768] sm:$0xff] }
 0x15a   :  { %6712 = vmatprep.subr.bf16.mxu1 %v8249_v63  ;;  %v8337_v52 = vcombine.high %v324_v46, %v328_v48  ;;  %v188_v56 = vld [vmem:[#allocation5 + $0x308] sm:$0xff]  ;;  %v8208_v63 = vcombine.low %v196_v45, %v200_v19  ;;  %v8336_v0 = vcombine.low %v324_v46, %v328_v48 }
 0x15b   :  { %6672 = vmatpush1.bf16.msra.mxu0 %v8120_v5  ;;  %v192_v57 = vld [vmem:[#allocation5 + $0x328] sm:$0xff] }
 0x15c   :  { %6673 = vmatprep.subr.bf16.mxu0 %v8113_v6  ;;  %v316_v60 = vld [vmem:[#allocation5 + $0x708] sm:$0xff]  ;;  %v8201_v1 = vcombine.high %v188_v56, %v192_v57 }
 0x15d   :  { %6713 = vmatpush1.bf16.msra.mxu1 %v8248_v7  ;;  %v320_v62 = vld [vmem:[#allocation5 + $0x728] sm:$0xff] }
 0x15e   :  { %6714 = vmatprep.subr.bf16.mxu1 %v8241_v9  ;;  %v8329_v2 = vcombine.high %v316_v60, %v320_v62  ;;  %v180_v3 = vld [vmem:[#allocation5 + $0x2c8] sm:$0xff]  ;;  %v8200_v9 = vcombine.low %v188_v56, %v192_v57  ;;  %v8328_v11 = vcombine.low %v316_v60, %v320_v62 }
 0x15f   :  { %6674 = vmatpush1.bf16.msra.mxu0 %v8112_v39  ;;  %v184_v5 = vld [vmem:[#allocation5 + $0x2e8] sm:$0xff] }
 0x160   :  { %6675 = vmatprep.subr.bf16.mxu0 %v8105_v42  ;;  %v308_v7 = vld [vmem:[#allocation5 + $0x6c8] sm:$0xff]  ;;  %v8193_v12 = vcombine.high %v180_v3, %v184_v5 }
 0x161   :  { %6715 = vmatpush1.bf16.msra.mxu1 %v8240_v14  ;;  %v312_v6 = vld [vmem:[#allocation5 + $0x6e8] sm:$0xff] }
 0x162   :  { %6716 = vmatprep.subr.bf16.mxu1 %v8233_v21  ;;  %v8321_v10 = vcombine.high %v308_v7, %v312_v6  ;;  %v172_v13 = vld [vmem:[#allocation5 + $0x288] sm:$0xff]  ;;  %v8192_v21 = vcombine.low %v180_v3, %v184_v5  ;;  %v8320_v23 = vcombine.low %v308_v7, %v312_v6 }
 0x163   :  { %6676 = vmatpush1.bf16.msra.mxu0 %v8104_v26  ;;  %v176_v39 = vld [vmem:[#allocation5 + $0x2a8] sm:$0xff] }
 0x164   :  { %6677 = vmatprep.subr.bf16.mxu0 %v8225_v30  ;;  %v300_v14 = vld [vmem:[#allocation5 + $0x688] sm:$0xff]  ;;  %v8185_v24 = vcombine.high %v172_v13, %v176_v39 }
 0x165   :  { %6717 = vmatpush1.bf16.msra.mxu1 %v8232_v28  ;;  %v304_v42 = vld [vmem:[#allocation5 + $0x6a8] sm:$0xff] }
 0x166   :  { %6718 = vmatprep.subr.bf16.mxu1 %v8353_v31  ;;  %v8313_v25 = vcombine.high %v300_v14, %v304_v42  ;;  %v164_v53 = vld [vmem:[#allocation5 + $0x248] sm:$0xff]  ;;  %v8184_v31 = vcombine.low %v172_v13, %v176_v39  ;;  %v8312_v33 = vcombine.low %v300_v14, %v304_v42 }
 0x167   :  { %6678 = vmatpush2.bf16.msra.mxu0 %v8224_v38  ;;  %v168_v26 = vld [vmem:[#allocation5 + $0x268] sm:$0xff] }
 0x168   :  { %6679 = vmatprep.subr.bf16.mxu0 %v8217_v43  ;;  %v292_v28 = vld [vmem:[#allocation5 + $0x648] sm:$0xff]  ;;  %v8177_v34 = vcombine.high %v164_v53, %v168_v26 }
 0x169   :  { %6719 = vmatpush2.bf16.msra.mxu1 %v8352_v41  ;;  %v296_v30 = vld [vmem:[#allocation5 + $0x668] sm:$0xff] }
 0x16a   :  { %6720 = vmatprep.subr.bf16.mxu1 %v8345_v44  ;;  %v8305_v35 = vcombine.high %v292_v28, %v296_v30  ;;  %v156_v37 = vld [vmem:[#allocation5 + $0x208] sm:$0xff]  ;;  %v8176_v44 = vcombine.low %v164_v53, %v168_v26  ;;  %v8304_v45 = vcombine.low %v292_v28, %v296_v30 }
 0x16b   :  { %6680 = vmatpush2.bf16.msra.mxu0 %v8216_v22  ;;  %v160_v38 = vld [vmem:[#allocation5 + $0x228] sm:$0xff] }
 0x16c   :  { %6681 = vmatprep.subr.bf16.mxu0 %v8209_v51  ;;  %v284_v41 = vld [vmem:[#allocation5 + $0x608] sm:$0xff]  ;;  %v8169_v19 = vcombine.high %v156_v37, %v160_v38 }
 0x16d   :  { %6721 = vmatpush2.bf16.msra.mxu1 %v8344_v50  ;;  %v288_v43 = vld [vmem:[#allocation5 + $0x628] sm:$0xff] }
 0x16e   :  { %6722 = vmatprep.subr.bf16.mxu1 %v8337_v52  ;;  %v8297_v46 = vcombine.high %v284_v41, %v288_v43  ;;  %v404_v48 = vld [vmem:[#allocation5 + $0x9c8] sm:$0xff]  ;;  %v8168_v52 = vcombine.low %v156_v37, %v160_v38  ;;  %v8296_v56 = vcombine.low %v284_v41, %v288_v43 }
 0x16f   :  { %6682 = vmatpush2.bf16.msra.mxu0 %v8208_v63  ;;  %v408_v22 = vld [vmem:[#allocation5 + $0x9e8] sm:$0xff] }
 0x170   :  { %6683 = vmatprep.subr.bf16.mxu0 %v8201_v1  ;;  %v532_v50 = vld [vmem:[#allocation5 + $0xdc8] sm:$0xff]  ;;  %v8417_v57 = vcombine.high %v404_v48, %v408_v22 }
 0x171   :  { %6723 = vmatpush2.bf16.msra.mxu1 %v8336_v0  ;;  %v536_v51 = vld [vmem:[#allocation5 + $0xde8] sm:$0xff] }
 0x172   :  { %6724 = vmatprep.subr.bf16.mxu1 %v8329_v2  ;;  %v8545_v60 = vcombine.high %v532_v50, %v536_v51  ;;  %v396_v62 = vld [vmem:[#allocation5 + $0x988] sm:$0xff]  ;;  %v8416_v2 = vcombine.low %v404_v48, %v408_v22  ;;  %v8544_v3 = vcombine.low %v532_v50, %v536_v51 }
 0x173   :  { %6684 = vmatpush2.bf16.msra.mxu0 %v8200_v9  ;;  %v400_v63 = vld [vmem:[#allocation5 + $0x9a8] sm:$0xff] }
 0x174   :  { %6685 = vmatprep.subr.bf16.mxu0 %v8193_v12  ;;  %v524_v0 = vld [vmem:[#allocation5 + $0xd88] sm:$0xff]  ;;  %v8409_v5 = vcombine.high %v396_v62, %v400_v63  ;;  %v8408_v14 = vcombine.low %v396_v62, %v400_v63 }
 0x175   :  { %6725 = vmatpush2.bf16.msra.mxu1 %v8328_v11  ;;  %v528_v1 = vld [vmem:[#allocation5 + $0xda8] sm:$0xff] }
 0x176   :  { %6726 = vmatprep.subr.bf16.mxu1 %v8321_v10  ;;  %v8537_v7 = vcombine.high %v524_v0, %v528_v1  ;;  %v388_v6 = vld [vmem:[#allocation5 + $0x948] sm:$0xff] }
 0x177   :  { %6686 = vmatpush2.bf16.msra.mxu0 %v8192_v21  ;;  %v392_v9 = vld [vmem:[#allocation5 + $0x968] sm:$0xff]  ;;  %v8536_v21 = vcombine.low %v524_v0, %v528_v1 }
 0x178   :  { %6687 = vmatprep.subr.bf16.mxu0 %v8185_v24  ;;  %v516_v12 = vld [vmem:[#allocation5 + $0xd48] sm:$0xff]  ;;  %v8400_v37 = vcombine.low %v388_v6, %v392_v9 }
 0x179   :  { %6727 = vmatpush2.bf16.msra.mxu1 %v8320_v23  ;;  %v520_v10 = vld [vmem:[#allocation5 + $0xd68] sm:$0xff]  ;;  %v8401_v23 = vcombine.high %v388_v6, %v392_v9 }
 0x17a   :  { %6728 = vmatprep.subr.bf16.mxu1 %v8313_v25  ;;  %v8529_v26 = vcombine.high %v516_v12, %v520_v10  ;;  %v380_v28 = vld [vmem:[#allocation5 + $0x908] sm:$0xff] }
 0x17b   :  { %6688 = vmatpush2.bf16.msra.mxu0 %v8184_v31  ;;  %v384_v30 = vld [vmem:[#allocation5 + $0x928] sm:$0xff] }
 0x17c   :  { %6689 = vmatprep.subr.bf16.mxu0 %v8177_v34  ;;  %v508_v31 = vld [vmem:[#allocation5 + $0xd08] sm:$0xff]  ;;  %v8393_v41 = vcombine.high %v380_v28, %v384_v30  ;;  %v8392_v22 = vcombine.low %v380_v28, %v384_v30 }
 0x17d   :  { %6729 = vmatpush2.bf16.msra.mxu1 %v8312_v33  ;;  %v512_v33 = vld [vmem:[#allocation5 + $0xd28] sm:$0xff] }
 0x17e   :  { %6730 = vmatprep.subr.bf16.mxu1 %v8305_v35  ;;  %v504_v48 = vld [vmem:[#allocation5 + $0xce8] sm:$0xff]  ;;  %v8520_v50 = vcombine.low %v508_v31, %v512_v33 }
 0x17f   :  { %6690 = vmatpush2.bf16.msra.mxu0 %v8176_v44  ;;  %v8521_v44 = vcombine.high %v508_v31, %v512_v33  ;;  %v496_v62 = vld [vmem:[#allocation5 + $0xca8] sm:$0xff] }
 0x180   :  { %6691 = vmatprep.subr.bf16.mxu0 %v8169_v19  ;;  %v376_v19 = vld [vmem:[#allocation5 + $0x8e8] sm:$0xff] }
 0x181   :  { %6731 = vmatpush2.bf16.msra.mxu1 %v8304_v45  ;;  %v372_v45 = vld [vmem:[#allocation5 + $0x8c8] sm:$0xff] }
 0x182   :  { %6732 = vmatprep.subr.bf16.mxu1 %v8297_v46  ;;  %v500_v46 = vld [vmem:[#allocation5 + $0xcc8] sm:$0xff]  ;;  %v8385_v51 = vcombine.high %v372_v45, %v376_v19  ;;  %v8384_v63 = vcombine.low %v372_v45, %v376_v19 }
 0x183   :  { %6692 = vmatpush2.bf16.msra.mxu0 %v8168_v52  ;;  %v8513_v52 = vcombine.high %v500_v46, %v504_v48  ;;  %v8512_v0 = vcombine.low %v500_v46, %v504_v48  ;;  %v488_v6 = vld [vmem:[#allocation5 + $0xc68] sm:$0xff] }
 0x184   :  { %6743 = vmatprep.subr.bf16.mxu0 %v8417_v57  ;;  %v368_v57 = vld [vmem:[#allocation5 + $0x8a8] sm:$0xff] }
 0x185   :  { %6733 = vmatpush2.bf16.msra.mxu1 %v8296_v56  ;;  %v6449_v11 = vpop.f32.mrf.mxu0  ;;  %v364_v56 = vld [vmem:[#allocation5 + $0x888] sm:$0xff] }
 0x186   :  { %6784 = vmatprep.subr.bf16.mxu1 %v8545_v60  ;;  %6694 = vmatmul.mubr.bf16.vlgmr.msra.gmra.mxu0 %v9495_v16  ;;  %v6450_v13 = vadd.f32 %v6449_v11, %v9579_v17  ;;  %v492_v60 = vld [vmem:[#allocation5 + $0xc88] sm:$0xff]  ;;  %v8377_v1 = vcombine.high %v364_v56, %v368_v57  ;;  %v8376_v9 = vcombine.low %v364_v56, %v368_v57 }
 0x187   :  { %v6490_v39 = vpop.f32.mrf.mxu1  ;;  %6744 = vmatpush1.bf16.msra.mxu0 %v8416_v2  ;;  %v6451_v42 = vpop.f32.mrf.mxu0  ;;  %6775 = vmatprep.mubr.bf16.mxu0 %v9507_v27  ;;  %v8505_v2 = vcombine.high %v492_v60, %v496_v62  ;;  %v8504_v11 = vcombine.low %v492_v60, %v496_v62  ;;  %v472_v28 = vld [vmem:[#allocation5 + $0xbe8] sm:$0xff] }
 0x188   :  { %6735 = vmatmul.mubr.bf16.vlgmr.msra.gmra.mxu1 %v9501_v20  ;;  %6745 = vmatprep.subr.bf16.mxu0 %v8409_v5  ;;  %v9588_v24 = vadd.f32 %v6490_v39, %v6450_v13  ;;  %v6452_v25 = vadd.f32 %v6451_v42, %v9583_v54  ;;  %v8528_v54 = vcombine.low %v516_v12, %v520_v10  ;;  %v360_v5 = vld [vmem:[#allocation5 + $0x868] sm:$0xff] }
 0x189   :  { %6785 = vmatpush1.bf16.msra.mxu1 %v8544_v3  ;;  %v6492_v53 = vpop.f32.mrf.mxu1  ;;  %v6453_v17 = vpop.f32.mrf.mxu0  ;;  %6816 = vmatprep.mubr.bf16.mxu1 %v9512_v29  ;;  %v356_v3 = vld [vmem:[#allocation5 + $0x848] sm:$0xff] }
 0x18a   :  { %6786 = vmatprep.subr.bf16.mxu1 %v8537_v7  ;;  %v9593_v34 = vadd.f32 %v6492_v53, %v6452_v25  ;;  %v484_v7 = vld [vmem:[#allocation5 + $0xc48] sm:$0xff]  ;;  %v8369_v12 = vcombine.high %v356_v3, %v360_v5 }
 0x18b   :  { %v6494_v35 = vpop.f32.mrf.mxu1  ;;  %6746 = vmatpush1.bf16.msra.mxu0 %v8408_v14  ;;  %v6454_v38 = vpop.f32.mrf.mxu0  ;;  %v8497_v10 = vcombine.high %v484_v7, %v488_v6  ;;  %v348_v13 = vld [vmem:[#allocation5 + $0x808] sm:$0xff] }
 0x18c   :  { %6747 = vmatprep.subr.bf16.mxu0 %v8401_v23  ;;  %v352_v39 = vld [vmem:[#allocation5 + $0x828] sm:$0xff]  ;;  %v8496_v23 = vcombine.low %v484_v7, %v488_v6 }
 0x18d   :  { %6787 = vmatpush1.bf16.msra.mxu1 %v8536_v21  ;;  %v6495_v43 = vpop.f32.mrf.mxu1  ;;  %v476_v14 = vld [vmem:[#allocation5 + $0xc08] sm:$0xff]  ;;  %v8368_v21 = vcombine.low %v356_v3, %v360_v5  ;;  %v8361_v25 = vcombine.high %v348_v13, %v352_v39  ;;  %v8360_v31 = vcombine.low %v348_v13, %v352_v39 }
 0x18e   :  { %6788 = vmatprep.subr.bf16.mxu1 %v8529_v26  ;;  %v480_v42 = vld [vmem:[#allocation5 + $0xc28] sm:$0xff] }
 0x18f   :  { %6748 = vmatpush1.bf16.msra.mxu0 %v8400_v37  ;;  %v8489_v53 = vcombine.high %v476_v14, %v480_v42  ;;  %v468_v26 = vld [vmem:[#allocation5 + $0xbc8] sm:$0xff]  ;;  %v8488_v33 = vcombine.low %v476_v14, %v480_v42 }
 0x190   :  { %6749 = vmatprep.subr.bf16.mxu0 %v8393_v41  ;;  %v596_v30 = vld [vmem:[#allocation5 + $0xfc8] sm:$0xff]  ;;  %v8481_v35 = vcombine.high %v468_v26, %v472_v28 }
 0x191   :  { %6789 = vmatpush1.bf16.msra.mxu1 %v8528_v54  ;;  %v600_v17 = vld [vmem:[#allocation5 + $0xfe8] sm:$0xff] }
 0x192   :  { %6790 = vmatprep.subr.bf16.mxu1 %v8521_v44  ;;  %v8609_v37 = vcombine.high %v596_v30, %v600_v17  ;;  %v460_v38 = vld [vmem:[#allocation5 + $0xb88] sm:$0xff]  ;;  %v8480_v44 = vcombine.low %v468_v26, %v472_v28  ;;  %v8608_v45 = vcombine.low %v596_v30, %v600_v17 }
 0x193   :  { %6750 = vmatpush1.bf16.msra.mxu0 %v8392_v22  ;;  %v464_v54 = vld [vmem:[#allocation5 + $0xba8] sm:$0xff] }
 0x194   :  { %6751 = vmatprep.subr.bf16.mxu0 %v8385_v51  ;;  %v588_v41 = vld [vmem:[#allocation5 + $0xf88] sm:$0xff]  ;;  %v8473_v19 = vcombine.high %v460_v38, %v464_v54 }
 0x195   :  { %6791 = vmatpush1.bf16.msra.mxu1 %v8520_v50  ;;  %v592_v43 = vld [vmem:[#allocation5 + $0xfa8] sm:$0xff] }
 0x196   :  { %6792 = vmatprep.subr.bf16.mxu1 %v8513_v52  ;;  %v8601_v46 = vcombine.high %v588_v41, %v592_v43  ;;  %v452_v48 = vld [vmem:[#allocation5 + $0xb48] sm:$0xff]  ;;  %v8472_v52 = vcombine.low %v460_v38, %v464_v54  ;;  %v8600_v56 = vcombine.low %v588_v41, %v592_v43 }
 0x197   :  { %6752 = vmatpush1.bf16.msra.mxu0 %v8384_v63  ;;  %v456_v22 = vld [vmem:[#allocation5 + $0xb68] sm:$0xff] }
 0x198   :  { %6753 = vmatprep.subr.bf16.mxu0 %v8377_v1  ;;  %v580_v50 = vld [vmem:[#allocation5 + $0xf48] sm:$0xff]  ;;  %v8465_v57 = vcombine.high %v452_v48, %v456_v22 }
 0x199   :  { %6793 = vmatpush1.bf16.msra.mxu1 %v8512_v0  ;;  %v584_v51 = vld [vmem:[#allocation5 + $0xf68] sm:$0xff] }
 0x19a   :  { %6794 = vmatprep.subr.bf16.mxu1 %v8505_v2  ;;  %v8593_v60 = vcombine.high %v580_v50, %v584_v51  ;;  %v444_v62 = vld [vmem:[#allocation5 + $0xb08] sm:$0xff]  ;;  %v8464_v2 = vcombine.low %v452_v48, %v456_v22  ;;  %v8592_v3 = vcombine.low %v580_v50, %v584_v51 }
 0x19b   :  { %6754 = vmatpush1.bf16.msra.mxu0 %v8376_v9  ;;  %v448_v63 = vld [vmem:[#allocation5 + $0xb28] sm:$0xff] }
 0x19c   :  { %6755 = vmatprep.subr.bf16.mxu0 %v8369_v12  ;;  %v572_v0 = vld [vmem:[#allocation5 + $0xf08] sm:$0xff]  ;;  %v8457_v5 = vcombine.high %v444_v62, %v448_v63 }
 0x19d   :  { %6795 = vmatpush1.bf16.msra.mxu1 %v8504_v11  ;;  %v576_v1 = vld [vmem:[#allocation5 + $0xf28] sm:$0xff] }
 0x19e   :  { %6796 = vmatprep.subr.bf16.mxu1 %v8497_v10  ;;  %v8585_v7 = vcombine.high %v572_v0, %v576_v1  ;;  %v436_v6 = vld [vmem:[#allocation5 + $0xac8] sm:$0xff]  ;;  %v8456_v10 = vcombine.low %v444_v62, %v448_v63  ;;  %v8584_v13 = vcombine.low %v572_v0, %v576_v1 }
 0x19f   :  { %6756 = vmatpush1.bf16.msra.mxu0 %v8368_v21  ;;  %v440_v9 = vld [vmem:[#allocation5 + $0xae8] sm:$0xff] }
 0x1a0   :  { %6757 = vmatprep.subr.bf16.mxu0 %v8361_v25  ;;  %v564_v11 = vld [vmem:[#allocation5 + $0xec8] sm:$0xff]  ;;  %v8449_v39 = vcombine.high %v436_v6, %v440_v9 }
 0x1a1   :  { %6797 = vmatpush1.bf16.msra.mxu1 %v8496_v23  ;;  %v568_v12 = vld [vmem:[#allocation5 + $0xee8] sm:$0xff] }
 0x1a2   :  { %6798 = vmatprep.subr.bf16.mxu1 %v8489_v53  ;;  %v8577_v14 = vcombine.high %v564_v11, %v568_v12  ;;  %v428_v42 = vld [vmem:[#allocation5 + $0xa88] sm:$0xff]  ;;  %v8448_v53 = vcombine.low %v436_v6, %v440_v9  ;;  %v8576_v26 = vcombine.low %v564_v11, %v568_v12 }
 0x1a3   :  { %6758 = vmatpush1.bf16.msra.mxu0 %v8360_v31  ;;  %v432_v21 = vld [vmem:[#allocation5 + $0xaa8] sm:$0xff] }
 0x1a4   :  { %6759 = vmatprep.subr.bf16.mxu0 %v8481_v35  ;;  %v556_v23 = vld [vmem:[#allocation5 + $0xe88] sm:$0xff]  ;;  %v8441_v28 = vcombine.high %v428_v42, %v432_v21 }
 0x1a5   :  { %6799 = vmatpush1.bf16.msra.mxu1 %v8488_v33  ;;  %v560_v25 = vld [vmem:[#allocation5 + $0xea8] sm:$0xff] }
 0x1a6   :  { %6800 = vmatprep.subr.bf16.mxu1 %v8609_v37  ;;  %v8569_v30 = vcombine.high %v556_v23, %v560_v25  ;;  %v420_v17 = vld [vmem:[#allocation5 + $0xa48] sm:$0xff]  ;;  %v8440_v37 = vcombine.low %v428_v42, %v432_v21  ;;  %v8568_v38 = vcombine.low %v556_v23, %v560_v25 }
 0x1a7   :  { %6760 = vmatpush2.bf16.msra.mxu0 %v8480_v44  ;;  %v424_v31 = vld [vmem:[#allocation5 + $0xa68] sm:$0xff] }
 0x1a8   :  { %6761 = vmatprep.subr.bf16.mxu0 %v8473_v19  ;;  %v548_v33 = vld [vmem:[#allocation5 + $0xe48] sm:$0xff]  ;;  %v8433_v54 = vcombine.high %v420_v17, %v424_v31 }
 0x1a9   :  { %6801 = vmatpush2.bf16.msra.mxu1 %v8608_v45  ;;  %v552_v35 = vld [vmem:[#allocation5 + $0xe68] sm:$0xff] }
 0x1aa   :  { %6802 = vmatprep.subr.bf16.mxu1 %v8601_v46  ;;  %v8561_v41 = vcombine.high %v548_v33, %v552_v35  ;;  %v412_v43 = vld [vmem:[#allocation5 + $0xa08] sm:$0xff]  ;;  %v8432_v46 = vcombine.low %v420_v17, %v424_v31  ;;  %v8560_v48 = vcombine.low %v548_v33, %v552_v35 }
 0x1ab   :  { %6762 = vmatpush2.bf16.msra.mxu0 %v8472_v52  ;;  %v416_v44 = vld [vmem:[#allocation5 + $0xa28] sm:$0xff] }
 0x1ac   :  { %6763 = vmatprep.subr.bf16.mxu0 %v8465_v57  ;;  %v540_v45 = vld [vmem:[#allocation5 + $0xe08] sm:$0xff]  ;;  %v8425_v22 = vcombine.high %v412_v43, %v416_v44 }
 0x1ad   :  { %6803 = vmatpush2.bf16.msra.mxu1 %v8600_v56  ;;  %v544_v19 = vld [vmem:[#allocation5 + $0xe28] sm:$0xff] }
 0x1ae   :  { %6804 = vmatprep.subr.bf16.mxu1 %v8593_v60  ;;  %v8553_v50 = vcombine.high %v540_v45, %v544_v19  ;;  %v660_v51 = vld [vmem:[#allocation5 + $0x11c8] sm:$0xff]  ;;  %v8424_v60 = vcombine.low %v412_v43, %v416_v44  ;;  %v8552_v62 = vcombine.low %v540_v45, %v544_v19 }
 0x1af   :  { %6764 = vmatpush2.bf16.msra.mxu0 %v8464_v2  ;;  %v664_v52 = vld [vmem:[#allocation5 + $0x11e8] sm:$0xff] }
 0x1b0   :  { %6765 = vmatprep.subr.bf16.mxu0 %v8457_v5  ;;  %v788_v56 = vld [vmem:[#allocation5 + $0x15c8] sm:$0xff]  ;;  %v8673_v63 = vcombine.high %v660_v51, %v664_v52 }
 0x1b1   :  { %6805 = vmatpush2.bf16.msra.mxu1 %v8592_v3  ;;  %v792_v57 = vld [vmem:[#allocation5 + $0x15e8] sm:$0xff] }
 0x1b2   :  { %6806 = vmatprep.subr.bf16.mxu1 %v8585_v7  ;;  %v8801_v0 = vcombine.high %v788_v56, %v792_v57  ;;  %v652_v1 = vld [vmem:[#allocation5 + $0x1188] sm:$0xff]  ;;  %v8672_v7 = vcombine.low %v660_v51, %v664_v52  ;;  %v8800_v6 = vcombine.low %v788_v56, %v792_v57 }
 0x1b3   :  { %6766 = vmatpush2.bf16.msra.mxu0 %v8456_v10  ;;  %v656_v2 = vld [vmem:[#allocation5 + $0x11a8] sm:$0xff] }
 0x1b4   :  { %6767 = vmatprep.subr.bf16.mxu0 %v8449_v39  ;;  %v780_v3 = vld [vmem:[#allocation5 + $0x1588] sm:$0xff]  ;;  %v8665_v9 = vcombine.high %v652_v1, %v656_v2  ;;  %v8664_v23 = vcombine.low %v652_v1, %v656_v2 }
 0x1b5   :  { %6807 = vmatpush2.bf16.msra.mxu1 %v8584_v13  ;;  %v784_v5 = vld [vmem:[#allocation5 + $0x15a8] sm:$0xff] }
 0x1b6   :  { %6808 = vmatprep.subr.bf16.mxu1 %v8577_v14  ;;  %v8793_v11 = vcombine.high %v780_v3, %v784_v5  ;;  %v644_v12 = vld [vmem:[#allocation5 + $0x1148] sm:$0xff] }
 0x1b7   :  { %6768 = vmatpush2.bf16.msra.mxu0 %v8448_v53  ;;  %v648_v10 = vld [vmem:[#allocation5 + $0x1168] sm:$0xff]  ;;  %v8792_v53 = vcombine.low %v780_v3, %v784_v5 }
 0x1b8   :  { %6769 = vmatprep.subr.bf16.mxu0 %v8441_v28  ;;  %v772_v39 = vld [vmem:[#allocation5 + $0x1548] sm:$0xff]  ;;  %v8656_v43 = vcombine.low %v644_v12, %v648_v10 }
 0x1b9   :  { %6809 = vmatpush2.bf16.msra.mxu1 %v8576_v26  ;;  %v776_v14 = vld [vmem:[#allocation5 + $0x1568] sm:$0xff]  ;;  %v8657_v26 = vcombine.high %v644_v12, %v648_v10 }
 0x1ba   :  { %6810 = vmatprep.subr.bf16.mxu1 %v8569_v30  ;;  %v8785_v31 = vcombine.high %v772_v39, %v776_v14  ;;  %v636_v33 = vld [vmem:[#allocation5 + $0x1108] sm:$0xff] }
 0x1bb   :  { %6770 = vmatpush2.bf16.msra.mxu0 %v8440_v37  ;;  %v640_v35 = vld [vmem:[#allocation5 + $0x1128] sm:$0xff] }
 0x1bc   :  { %6771 = vmatprep.subr.bf16.mxu0 %v8433_v54  ;;  %v764_v37 = vld [vmem:[#allocation5 + $0x1508] sm:$0xff]  ;;  %v8649_v45 = vcombine.high %v636_v33, %v640_v35  ;;  %v8648_v52 = vcombine.low %v636_v33, %v640_v35 }
 0x1bd   :  { %6811 = vmatpush2.bf16.msra.mxu1 %v8568_v38  ;;  %v768_v38 = vld [vmem:[#allocation5 + $0x1528] sm:$0xff] }
 0x1be   :  { %6812 = vmatprep.subr.bf16.mxu1 %v8561_v41  ;;  %v760_v51 = vld [vmem:[#allocation5 + $0x14e8] sm:$0xff]  ;;  %v8776_v56 = vcombine.low %v764_v37, %v768_v38 }
 0x1bf   :  { %6772 = vmatpush2.bf16.msra.mxu0 %v8432_v46  ;;  %v8777_v46 = vcombine.high %v764_v37, %v768_v38  ;;  %v752_v1 = vld [vmem:[#allocation5 + $0x14a8] sm:$0xff] }
 0x1c0   :  { %6773 = vmatprep.subr.bf16.mxu0 %v8425_v22  ;;  %v632_v22 = vld [vmem:[#allocation5 + $0x10e8] sm:$0xff] }
 0x1c1   :  { %6813 = vmatpush2.bf16.msra.mxu1 %v8560_v48  ;;  %v628_v48 = vld [vmem:[#allocation5 + $0x10c8] sm:$0xff] }
 0x1c2   :  { %6814 = vmatprep.subr.bf16.mxu1 %v8553_v50  ;;  %v756_v50 = vld [vmem:[#allocation5 + $0x14c8] sm:$0xff]  ;;  %v8641_v57 = vcombine.high %v628_v48, %v632_v22  ;;  %v8640_v2 = vcombine.low %v628_v48, %v632_v22 }
 0x1c3   :  { %6774 = vmatpush2.bf16.msra.mxu0 %v8424_v60  ;;  %v8769_v60 = vcombine.high %v756_v50, %v760_v51  ;;  %v8768_v3 = vcombine.low %v756_v50, %v760_v51  ;;  %v744_v12 = vld [vmem:[#allocation5 + $0x1468] sm:$0xff] }
 0x1c4   :  { %6825 = vmatprep.subr.bf16.mxu0 %v8673_v63  ;;  %v624_v63 = vld [vmem:[#allocation5 + $0x10a8] sm:$0xff] }
 0x1c5   :  { %6815 = vmatpush2.bf16.msra.mxu1 %v8552_v62  ;;  %v620_v62 = vld [vmem:[#allocation5 + $0x1088] sm:$0xff] }
 0x1c6   :  { %6866 = vmatprep.subr.bf16.mxu1 %v8801_v0  ;;  %v6531_v13 = vpop.f32.mrf.mxu0  ;;  %6776 = vmatmul.mubr.bf16.vlgmr.msra.gmra.mxu0 %v9519_v36  ;;  %v748_v0 = vld [vmem:[#allocation5 + $0x1488] sm:$0xff]  ;;  %v8633_v5 = vcombine.high %v620_v62, %v624_v63  ;;  %v8632_v10 = vcombine.low %v620_v62, %v624_v63 }
 0x1c7   :  { %v6532_v42 = vadd.f32 %v6531_v13, %v9588_v24  ;;  %6826 = vmatpush1.bf16.msra.mxu0 %v8672_v7  ;;  %6857 = vmatprep.mubr.bf16.mxu0 %v9531_v47  ;;  %v8761_v7 = vcombine.high %v748_v0, %v752_v1  ;;  %v8760_v13 = vcombine.low %v748_v0, %v752_v1  ;;  %v728_v33 = vld [vmem:[#allocation5 + $0x13e8] sm:$0xff] }
 0x1c8   :  { %v6572_v21 = vpop.f32.mrf.mxu1  ;;  %6817 = vmatmul.mubr.bf16.vlgmr.msra.gmra.mxu1 %v9525_v40  ;;  %v6533_v25 = vpop.f32.mrf.mxu0  ;;  %6827 = vmatprep.subr.bf16.mxu0 %v8665_v9  ;;  %v616_v9 = vld [vmem:[#allocation5 + $0x1068] sm:$0xff] }
 0x1c9   :  { %6867 = vmatpush1.bf16.msra.mxu1 %v8800_v6  ;;  %v9598_v28 = vadd.f32 %v6572_v21, %v6532_v42  ;;  %v6534_v30 = vadd.f32 %v6533_v25, %v9593_v34  ;;  %6898 = vmatprep.mubr.bf16.mxu1 %v9536_v49  ;;  %v8784_v34 = vcombine.low %v772_v39, %v776_v14  ;;  %v612_v6 = vld [vmem:[#allocation5 + $0x1048] sm:$0xff] }
 0x1ca   :  { %v6574_v17 = vpop.f32.mrf.mxu1  ;;  %6868 = vmatprep.subr.bf16.mxu1 %v8793_v11  ;;  %v6535_v24 = vpop.f32.mrf.mxu0  ;;  %v740_v11 = vld [vmem:[#allocation5 + $0x1448] sm:$0xff]  ;;  %v8625_v39 = vcombine.high %v612_v6, %v616_v9 }
 0x1cb   :  { %v9603_v54 = vadd.f32 %v6574_v17, %v6534_v30  ;;  %6828 = vmatpush1.bf16.msra.mxu0 %v8664_v23  ;;  %v8753_v14 = vcombine.high %v740_v11, %v744_v12  ;;  %v604_v42 = vld [vmem:[#allocation5 + $0x1008] sm:$0xff] }
 0x1cc   :  { %v6576_v41 = vpop.f32.mrf.mxu1  ;;  %v6536_v44 = vpop.f32.mrf.mxu0  ;;  %6829 = vmatprep.subr.bf16.mxu0 %v8657_v26  ;;  %v608_v21 = vld [vmem:[#allocation5 + $0x1028] sm:$0xff]  ;;  %v8752_v26 = vcombine.low %v740_v11, %v744_v12 }
 0x1cd   :  { %6869 = vmatpush1.bf16.msra.mxu1 %v8792_v53  ;;  %v732_v23 = vld [vmem:[#allocation5 + $0x1408] sm:$0xff]  ;;  %v8624_v53 = vcombine.low %v612_v6, %v616_v9  ;;  %v8617_v30 = vcombine.high %v604_v42, %v608_v21  ;;  %v8616_v37 = vcombine.low %v604_v42, %v608_v21 }
 0x1ce   :  { %v6577_v19 = vpop.f32.mrf.mxu1  ;;  %6870 = vmatprep.subr.bf16.mxu1 %v8785_v31  ;;  %v736_v25 = vld [vmem:[#allocation5 + $0x1428] sm:$0xff] }
 0x1cf   :  { %6830 = vmatpush1.bf16.msra.mxu0 %v8656_v43  ;;  %v8745_v17 = vcombine.high %v732_v23, %v736_v25  ;;  %v724_v31 = vld [vmem:[#allocation5 + $0x13c8] sm:$0xff]  ;;  %v8744_v38 = vcombine.low %v732_v23, %v736_v25 }
 0x1d0   :  { %6831 = vmatprep.subr.bf16.mxu0 %v8649_v45  ;;  %v852_v35 = vld [vmem:[#allocation5 + $0x17c8] sm:$0xff]  ;;  %v8737_v41 = vcombine.high %v724_v31, %v728_v33 }
 0x1d1   :  { %6871 = vmatpush1.bf16.msra.mxu1 %v8784_v34  ;;  %v856_v24 = vld [vmem:[#allocation5 + $0x17e8] sm:$0xff] }
 0x1d2   :  { %6872 = vmatprep.subr.bf16.mxu1 %v8777_v46  ;;  %v8865_v43 = vcombine.high %v852_v35, %v856_v24  ;;  %v716_v44 = vld [vmem:[#allocation5 + $0x1388] sm:$0xff]  ;;  %v8736_v46 = vcombine.low %v724_v31, %v728_v33  ;;  %v8864_v48 = vcombine.low %v852_v35, %v856_v24 }
 0x1d3   :  { %6832 = vmatpush1.bf16.msra.mxu0 %v8648_v52  ;;  %v720_v34 = vld [vmem:[#allocation5 + $0x13a8] sm:$0xff] }
 0x1d4   :  { %6833 = vmatprep.subr.bf16.mxu0 %v8641_v57  ;;  %v844_v45 = vld [vmem:[#allocation5 + $0x1788] sm:$0xff]  ;;  %v8729_v22 = vcombine.high %v716_v44, %v720_v34 }
 0x1d5   :  { %6873 = vmatpush1.bf16.msra.mxu1 %v8776_v56  ;;  %v848_v19 = vld [vmem:[#allocation5 + $0x17a8] sm:$0xff] }
 0x1d6   :  { %6874 = vmatprep.subr.bf16.mxu1 %v8769_v60  ;;  %v8857_v50 = vcombine.high %v844_v45, %v848_v19  ;;  %v708_v51 = vld [vmem:[#allocation5 + $0x1348] sm:$0xff]  ;;  %v8728_v60 = vcombine.low %v716_v44, %v720_v34  ;;  %v8856_v62 = vcombine.low %v844_v45, %v848_v19 }
 0x1d7   :  { %6834 = vmatpush1.bf16.msra.mxu0 %v8640_v2  ;;  %v712_v52 = vld [vmem:[#allocation5 + $0x1368] sm:$0xff] }
 0x1d8   :  { %6835 = vmatprep.subr.bf16.mxu0 %v8633_v5  ;;  %v836_v56 = vld [vmem:[#allocation5 + $0x1748] sm:$0xff]  ;;  %v8721_v63 = vcombine.high %v708_v51, %v712_v52 }
 0x1d9   :  { %6875 = vmatpush1.bf16.msra.mxu1 %v8768_v3  ;;  %v840_v57 = vld [vmem:[#allocation5 + $0x1768] sm:$0xff] }
 0x1da   :  { %6876 = vmatprep.subr.bf16.mxu1 %v8761_v7  ;;  %v8849_v0 = vcombine.high %v836_v56, %v840_v57  ;;  %v700_v1 = vld [vmem:[#allocation5 + $0x1308] sm:$0xff]  ;;  %v8720_v7 = vcombine.low %v708_v51, %v712_v52  ;;  %v8848_v6 = vcombine.low %v836_v56, %v840_v57 }
 0x1db   :  { %6836 = vmatpush1.bf16.msra.mxu0 %v8632_v10  ;;  %v704_v2 = vld [vmem:[#allocation5 + $0x1328] sm:$0xff] }
 0x1dc   :  { %6837 = vmatprep.subr.bf16.mxu0 %v8625_v39  ;;  %v828_v3 = vld [vmem:[#allocation5 + $0x1708] sm:$0xff]  ;;  %v8713_v9 = vcombine.high %v700_v1, %v704_v2 }
 0x1dd   :  { %6877 = vmatpush1.bf16.msra.mxu1 %v8760_v13  ;;  %v832_v5 = vld [vmem:[#allocation5 + $0x1728] sm:$0xff] }
 0x1de   :  { %6878 = vmatprep.subr.bf16.mxu1 %v8753_v14  ;;  %v8841_v11 = vcombine.high %v828_v3, %v832_v5  ;;  %v692_v12 = vld [vmem:[#allocation5 + $0x12c8] sm:$0xff]  ;;  %v8712_v14 = vcombine.low %v700_v1, %v704_v2  ;;  %v8840_v42 = vcombine.low %v828_v3, %v832_v5 }
 0x1df   :  { %6838 = vmatpush1.bf16.msra.mxu0 %v8624_v53  ;;  %v696_v10 = vld [vmem:[#allocation5 + $0x12e8] sm:$0xff] }
 0x1e0   :  { %6839 = vmatprep.subr.bf16.mxu0 %v8617_v30  ;;  %v820_v13 = vld [vmem:[#allocation5 + $0x16c8] sm:$0xff]  ;;  %v8705_v21 = vcombine.high %v692_v12, %v696_v10 }
 0x1e1   :  { %6879 = vmatpush1.bf16.msra.mxu1 %v8752_v26  ;;  %v824_v39 = vld [vmem:[#allocation5 + $0x16e8] sm:$0xff] }
 0x1e2   :  { %6880 = vmatprep.subr.bf16.mxu1 %v8745_v17  ;;  %v8833_v23 = vcombine.high %v820_v13, %v824_v39  ;;  %v684_v25 = vld [vmem:[#allocation5 + $0x1288] sm:$0xff]  ;;  %v8704_v17 = vcombine.low %v692_v12, %v696_v10  ;;  %v8832_v31 = vcombine.low %v820_v13, %v824_v39 }
 0x1e3   :  { %6840 = vmatpush1.bf16.msra.mxu0 %v8616_v37  ;;  %v688_v53 = vld [vmem:[#allocation5 + $0x12a8] sm:$0xff] }
 0x1e4   :  { %6841 = vmatprep.subr.bf16.mxu0 %v8737_v41  ;;  %v812_v26 = vld [vmem:[#allocation5 + $0x1688] sm:$0xff]  ;;  %v8697_v33 = vcombine.high %v684_v25, %v688_v53 }
 0x1e5   :  { %6881 = vmatpush1.bf16.msra.mxu1 %v8744_v38  ;;  %v816_v30 = vld [vmem:[#allocation5 + $0x16a8] sm:$0xff] }
 0x1e6   :  { %6882 = vmatprep.subr.bf16.mxu1 %v8865_v43  ;;  %v8825_v35 = vcombine.high %v812_v26, %v816_v30  ;;  %v676_v24 = vld [vmem:[#allocation5 + $0x1248] sm:$0xff]  ;;  %v8696_v43 = vcombine.low %v684_v25, %v688_v53  ;;  %v8824_v44 = vcombine.low %v812_v26, %v816_v30 }
 0x1e7   :  { %6842 = vmatpush2.bf16.msra.mxu0 %v8736_v46  ;;  %v680_v37 = vld [vmem:[#allocation5 + $0x1268] sm:$0xff] }
 0x1e8   :  { %6843 = vmatprep.subr.bf16.mxu0 %v8729_v22  ;;  %v804_v38 = vld [vmem:[#allocation5 + $0x1648] sm:$0xff]  ;;  %v8689_v34 = vcombine.high %v676_v24, %v680_v37 }
 0x1e9   :  { %6883 = vmatpush2.bf16.msra.mxu1 %v8864_v48  ;;  %v808_v41 = vld [vmem:[#allocation5 + $0x1668] sm:$0xff] }
 0x1ea   :  { %6884 = vmatprep.subr.bf16.mxu1 %v8857_v50  ;;  %v8817_v45 = vcombine.high %v804_v38, %v808_v41  ;;  %v668_v19 = vld [vmem:[#allocation5 + $0x1208] sm:$0xff]  ;;  %v8688_v50 = vcombine.low %v676_v24, %v680_v37  ;;  %v8816_v51 = vcombine.low %v804_v38, %v808_v41 }
 0x1eb   :  { %6844 = vmatpush2.bf16.msra.mxu0 %v8728_v60  ;;  %v672_v46 = vld [vmem:[#allocation5 + $0x1228] sm:$0xff] }
 0x1ec   :  { %6845 = vmatprep.subr.bf16.mxu0 %v8721_v63  ;;  %v796_v48 = vld [vmem:[#allocation5 + $0x1608] sm:$0xff]  ;;  %v8681_v52 = vcombine.high %v668_v19, %v672_v46 }
 0x1ed   :  { %6885 = vmatpush2.bf16.msra.mxu1 %v8856_v62  ;;  %v800_v22 = vld [vmem:[#allocation5 + $0x1628] sm:$0xff] }
 0x1ee   :  { %6886 = vmatprep.subr.bf16.mxu1 %v8849_v0  ;;  %v8809_v56 = vcombine.high %v796_v48, %v800_v22  ;;  %v916_v57 = vld [vmem:[#allocation5 + $0x19c8] sm:$0xff]  ;;  %v8680_v0 = vcombine.low %v668_v19, %v672_v46  ;;  %v8808_v1 = vcombine.low %v796_v48, %v800_v22 }
 0x1ef   :  { %6846 = vmatpush2.bf16.msra.mxu0 %v8720_v7  ;;  %v920_v60 = vld [vmem:[#allocation5 + $0x19e8] sm:$0xff] }
 0x1f0   :  { %6847 = vmatprep.subr.bf16.mxu0 %v8713_v9  ;;  %v1044_v62 = vld [vmem:[#allocation5 + $0x1dc8] sm:$0xff]  ;;  %v8929_v2 = vcombine.high %v916_v57, %v920_v60 }
 0x1f1   :  { %6887 = vmatpush2.bf16.msra.mxu1 %v8848_v6  ;;  %v1048_v63 = vld [vmem:[#allocation5 + $0x1de8] sm:$0xff] }
 0x1f2   :  { %6888 = vmatprep.subr.bf16.mxu1 %v8841_v11  ;;  %v9057_v3 = vcombine.high %v1044_v62, %v1048_v63  ;;  %v908_v5 = vld [vmem:[#allocation5 + $0x1988] sm:$0xff]  ;;  %v8928_v11 = vcombine.low %v916_v57, %v920_v60  ;;  %v9056_v12 = vcombine.low %v1044_v62, %v1048_v63 }
 0x1f3   :  { %6848 = vmatpush2.bf16.msra.mxu0 %v8712_v14  ;;  %v912_v7 = vld [vmem:[#allocation5 + $0x19a8] sm:$0xff] }
 0x1f4   :  { %6849 = vmatprep.subr.bf16.mxu0 %v8705_v21  ;;  %v1036_v6 = vld [vmem:[#allocation5 + $0x1d88] sm:$0xff]  ;;  %v8921_v10 = vcombine.high %v908_v5, %v912_v7  ;;  %v8920_v26 = vcombine.low %v908_v5, %v912_v7 }
 0x1f5   :  { %6889 = vmatpush2.bf16.msra.mxu1 %v8840_v42  ;;  %v1040_v9 = vld [vmem:[#allocation5 + $0x1da8] sm:$0xff] }
 0x1f6   :  { %6890 = vmatprep.subr.bf16.mxu1 %v8833_v23  ;;  %v9049_v13 = vcombine.high %v1036_v6, %v1040_v9  ;;  %v900_v39 = vld [vmem:[#allocation5 + $0x1948] sm:$0xff] }
 0x1f7   :  { %6850 = vmatpush2.bf16.msra.mxu0 %v8704_v17  ;;  %v904_v14 = vld [vmem:[#allocation5 + $0x1968] sm:$0xff]  ;;  %v9048_v17 = vcombine.low %v1036_v6, %v1040_v9 }
 0x1f8   :  { %6851 = vmatprep.subr.bf16.mxu0 %v8697_v33  ;;  %v1028_v21 = vld [vmem:[#allocation5 + $0x1d48] sm:$0xff]  ;;  %v8912_v19 = vcombine.low %v900_v39, %v904_v14 }
 0x1f9   :  { %6891 = vmatpush2.bf16.msra.mxu1 %v8832_v31  ;;  %v1032_v23 = vld [vmem:[#allocation5 + $0x1d68] sm:$0xff]  ;;  %v8913_v31 = vcombine.high %v900_v39, %v904_v14 }
 0x1fa   :  { %6892 = vmatprep.subr.bf16.mxu1 %v8825_v35  ;;  %v9041_v37 = vcombine.high %v1028_v21, %v1032_v23  ;;  %v892_v38 = vld [vmem:[#allocation5 + $0x1908] sm:$0xff] }
 0x1fb   :  { %6852 = vmatpush2.bf16.msra.mxu0 %v8696_v43  ;;  %v896_v41 = vld [vmem:[#allocation5 + $0x1928] sm:$0xff] }
 0x1fc   :  { %6853 = vmatprep.subr.bf16.mxu0 %v8689_v34  ;;  %v1020_v43 = vld [vmem:[#allocation5 + $0x1d08] sm:$0xff]  ;;  %v8905_v48 = vcombine.high %v892_v38, %v896_v41  ;;  %v8904_v60 = vcombine.low %v892_v38, %v896_v41 }
 0x1fd   :  { %6893 = vmatpush2.bf16.msra.mxu1 %v8824_v44  ;;  %v1024_v44 = vld [vmem:[#allocation5 + $0x1d28] sm:$0xff] }
 0x1fe   :  { %6894 = vmatprep.subr.bf16.mxu1 %v8817_v45  ;;  %v1016_v57 = vld [vmem:[#allocation5 + $0x1ce8] sm:$0xff]  ;;  %v9032_v62 = vcombine.low %v1020_v43, %v1024_v44 }
 0x1ff   :  { %6854 = vmatpush2.bf16.msra.mxu0 %v8688_v50  ;;  %v9033_v50 = vcombine.high %v1020_v43, %v1024_v44  ;;  %v1008_v5 = vld [vmem:[#allocation5 + $0x1ca8] sm:$0xff] }
 0x200   :  { %6855 = vmatprep.subr.bf16.mxu0 %v8681_v52  ;;  %v888_v52 = vld [vmem:[#allocation5 + $0x18e8] sm:$0xff] }
 0x201   :  { %6895 = vmatpush2.bf16.msra.mxu1 %v8816_v51  ;;  %v884_v51 = vld [vmem:[#allocation5 + $0x18c8] sm:$0xff] }
 0x202   :  { %6896 = vmatprep.subr.bf16.mxu1 %v8809_v56  ;;  %v1012_v56 = vld [vmem:[#allocation5 + $0x1cc8] sm:$0xff]  ;;  %v8897_v63 = vcombine.high %v884_v51, %v888_v52  ;;  %v8896_v7 = vcombine.low %v884_v51, %v888_v52 }
 0x203   :  { %6856 = vmatpush2.bf16.msra.mxu0 %v8680_v0  ;;  %v9025_v0 = vcombine.high %v1012_v56, %v1016_v57  ;;  %v9024_v6 = vcombine.low %v1012_v56, %v1016_v57  ;;  %v1000_v39 = vld [vmem:[#allocation5 + $0x1c68] sm:$0xff] }
 0x204   :  { %6907 = vmatprep.subr.bf16.mxu0 %v8929_v2  ;;  %v880_v2 = vld [vmem:[#allocation5 + $0x18a8] sm:$0xff] }
 0x205   :  { %6897 = vmatpush2.bf16.msra.mxu1 %v8808_v1  ;;  %v876_v1 = vld [vmem:[#allocation5 + $0x1888] sm:$0xff] }
 0x206   :  { %6948 = vmatprep.subr.bf16.mxu1 %v9057_v3  ;;  %v6613_v42 = vpop.f32.mrf.mxu0  ;;  %6858 = vmatmul.mubr.bf16.vlgmr.msra.gmra.mxu0 %v9543_v4  ;;  %v1004_v3 = vld [vmem:[#allocation5 + $0x1c88] sm:$0xff]  ;;  %v8889_v9 = vcombine.high %v876_v1, %v880_v2  ;;  %v8888_v14 = vcombine.low %v876_v1, %v880_v2 }
 0x207   :  { %v6614_v25 = vadd.f32 %v6613_v42, %v9598_v28  ;;  %6908 = vmatpush1.bf16.msra.mxu0 %v8928_v11  ;;  %6939 = vmatprep.mubr.bf16.mxu0 %v9555_v15  ;;  %v9017_v11 = vcombine.high %v1004_v3, %v1008_v5  ;;  %v9016_v42 = vcombine.low %v1004_v3, %v1008_v5  ;;  %v984_v38 = vld [vmem:[#allocation5 + $0x1be8] sm:$0xff] }
 0x208   :  { %v6654_v53 = vpop.f32.mrf.mxu1  ;;  %6899 = vmatmul.mubr.bf16.vlgmr.msra.gmra.mxu1 %v9549_v8  ;;  %v6615_v30 = vpop.f32.mrf.mxu0  ;;  %6909 = vmatprep.subr.bf16.mxu0 %v8921_v10  ;;  %v872_v10 = vld [vmem:[#allocation5 + $0x1868] sm:$0xff] }
 0x209   :  { %6949 = vmatpush1.bf16.msra.mxu1 %v9056_v12  ;;  %v9608_v33 = vadd.f32 %v6654_v53, %v6614_v25  ;;  %v6616_v35 = vadd.f32 %v6615_v30, %v9603_v54  ;;  %6980 = vmatprep.mubr.bf16.mxu1 %v9560_v18  ;;  %v9040_v54 = vcombine.low %v1028_v21, %v1032_v23  ;;  %v868_v12 = vld [vmem:[#allocation5 + $0x1848] sm:$0xff] }
 0x20a   :  { %v6656_v24 = vpop.f32.mrf.mxu1  ;;  %6950 = vmatprep.subr.bf16.mxu1 %v9049_v13  ;;  %v6617_v28 = vpop.f32.mrf.mxu0  ;;  %v996_v13 = vld [vmem:[#allocation5 + $0x1c48] sm:$0xff]  ;;  %v8881_v21 = vcombine.high %v868_v12, %v872_v10 }
 0x20b   :  { %v9613_v34 = vadd.f32 %v6656_v24, %v6616_v35  ;;  %6910 = vmatpush1.bf16.msra.mxu0 %v8920_v26  ;;  %v9009_v23 = vcombine.high %v996_v13, %v1000_v39  ;;  %v860_v25 = vld [vmem:[#allocation5 + $0x1808] sm:$0xff] }
 0x20c   :  { %v6658_v45 = vpop.f32.mrf.mxu1  ;;  %v6618_v46 = vpop.f32.mrf.mxu0  ;;  %6911 = vmatprep.subr.bf16.mxu0 %v8913_v31  ;;  %v864_v53 = vld [vmem:[#allocation5 + $0x1828] sm:$0xff]  ;;  %v9008_v31 = vcombine.low %v996_v13, %v1000_v39 }
 0x20d   :  { %6951 = vmatpush1.bf16.msra.mxu1 %v9048_v17  ;;  %v988_v26 = vld [vmem:[#allocation5 + $0x1c08] sm:$0xff]  ;;  %v8880_v17 = vcombine.low %v868_v12, %v872_v10  ;;  %v8873_v35 = vcombine.high %v860_v25, %v864_v53  ;;  %v8872_v43 = vcombine.low %v860_v25, %v864_v53 }
 0x20e   :  { %v6659_v22 = vpop.f32.mrf.mxu1  ;;  %6952 = vmatprep.subr.bf16.mxu1 %v9041_v37  ;;  %v992_v30 = vld [vmem:[#allocation5 + $0x1c28] sm:$0xff] }
 0x20f   :  { %6912 = vmatpush1.bf16.msra.mxu0 %v8912_v19  ;;  %v9001_v24 = vcombine.high %v988_v26, %v992_v30  ;;  %v980_v37 = vld [vmem:[#allocation5 + $0x1bc8] sm:$0xff]  ;;  %v9000_v44 = vcombine.low %v988_v26, %v992_v30 }
 0x210   :  { %6913 = vmatprep.subr.bf16.mxu0 %v8905_v48  ;;  %v1108_v41 = vld [vmem:[#allocation5 + $0x1fc8] sm:$0xff]  ;;  %v8993_v45 = vcombine.high %v980_v37, %v984_v38 }
 0x211   :  { %6953 = vmatpush1.bf16.msra.mxu1 %v9040_v54  ;;  %v1112_v28 = vld [vmem:[#allocation5 + $0x1fe8] sm:$0xff] }
 0x212   :  { %6954 = vmatprep.subr.bf16.mxu1 %v9033_v50  ;;  %v9121_v19 = vcombine.high %v1108_v41, %v1112_v28  ;;  %v972_v46 = vld [vmem:[#allocation5 + $0x1b88] sm:$0xff]  ;;  %v8992_v50 = vcombine.low %v980_v37, %v984_v38  ;;  %v9120_v51 = vcombine.low %v1108_v41, %v1112_v28 }
 0x213   :  { %6914 = vmatpush1.bf16.msra.mxu0 %v8904_v60  ;;  %v976_v54 = vld [vmem:[#allocation5 + $0x1ba8] sm:$0xff] }
 0x214   :  { %6915 = vmatprep.subr.bf16.mxu0 %v8897_v63  ;;  %v1100_v48 = vld [vmem:[#allocation5 + $0x1f88] sm:$0xff]  ;;  %v8985_v52 = vcombine.high %v972_v46, %v976_v54 }
 0x215   :  { %6955 = vmatpush1.bf16.msra.mxu1 %v9032_v62  ;;  %v1104_v22 = vld [vmem:[#allocation5 + $0x1fa8] sm:$0xff] }
 0x216   :  { %6956 = vmatprep.subr.bf16.mxu1 %v9025_v0  ;;  %v9113_v56 = vcombine.high %v1100_v48, %v1104_v22  ;;  %v964_v57 = vld [vmem:[#allocation5 + $0x1b48] sm:$0xff]  ;;  %v8984_v0 = vcombine.low %v972_v46, %v976_v54  ;;  %v9112_v1 = vcombine.low %v1100_v48, %v1104_v22 }
 0x217   :  { %6916 = vmatpush1.bf16.msra.mxu0 %v8896_v7  ;;  %v968_v60 = vld [vmem:[#allocation5 + $0x1b68] sm:$0xff] }
 0x218   :  { %6917 = vmatprep.subr.bf16.mxu0 %v8889_v9  ;;  %v1092_v62 = vld [vmem:[#allocation5 + $0x1f48] sm:$0xff]  ;;  %v8977_v2 = vcombine.high %v964_v57, %v968_v60 }
 0x219   :  { %6957 = vmatpush1.bf16.msra.mxu1 %v9024_v6  ;;  %v1096_v63 = vld [vmem:[#allocation5 + $0x1f68] sm:$0xff] }
 0x21a   :  { %6958 = vmatprep.subr.bf16.mxu1 %v9017_v11  ;;  %v9105_v3 = vcombine.high %v1092_v62, %v1096_v63  ;;  %v956_v5 = vld [vmem:[#allocation5 + $0x1b08] sm:$0xff]  ;;  %v8976_v11 = vcombine.low %v964_v57, %v968_v60  ;;  %v9104_v12 = vcombine.low %v1092_v62, %v1096_v63  ;;  %v149_v63 = vld [vmem:[#allocation5 + $0x1d0] sm:$0xff] }
 0x21b   :  { %6918 = vmatpush1.bf16.msra.mxu0 %v8888_v14  ;;  %v960_v7 = vld [vmem:[#allocation5 + $0x1b28] sm:$0xff] }
 0x21c   :  { %6919 = vmatprep.subr.bf16.mxu0 %v8881_v21  ;;  %v1084_v6 = vld [vmem:[#allocation5 + $0x1f08] sm:$0xff]  ;;  %v8969_v10 = vcombine.high %v956_v5, %v960_v7 }
 0x21d   :  { %6959 = vmatpush1.bf16.msra.mxu1 %v9016_v42  ;;  %v1088_v9 = vld [vmem:[#allocation5 + $0x1f28] sm:$0xff] }
 0x21e   :  { %6960 = vmatprep.subr.bf16.mxu1 %v9009_v23  ;;  %v9097_v13 = vcombine.high %v1084_v6, %v1088_v9  ;;  %v948_v39 = vld [vmem:[#allocation5 + $0x1ac8] sm:$0xff]  ;;  %v8968_v23 = vcombine.low %v956_v5, %v960_v7  ;;  %v9096_v25 = vcombine.low %v1084_v6, %v1088_v9  ;;  %v1127_v5 = vsub.s32 2, %v9565_v32 }
 0x21f   :  { %6920 = vmatpush1.bf16.msra.mxu0 %v8880_v17  ;;  %v952_v14 = vld [vmem:[#allocation5 + $0x1ae8] sm:$0xff] }
 0x220   :  { %6921 = vmatprep.subr.bf16.mxu0 %v8873_v35  ;;  %v1076_v42 = vld [vmem:[#allocation5 + $0x1ec8] sm:$0xff]  ;;  %v8961_v53 = vcombine.high %v948_v39, %v952_v14 }
 0x221   :  { %6961 = vmatpush1.bf16.msra.mxu1 %v9008_v31  ;;  %v1080_v21 = vld [vmem:[#allocation5 + $0x1ee8] sm:$0xff] }
 0x222   :  { %6962 = vmatprep.subr.bf16.mxu1 %v9001_v24  ;;  %v9089_v26 = vcombine.high %v1076_v42, %v1080_v21  ;;  %v940_v30 = vld [vmem:[#allocation5 + $0x1a88] sm:$0xff]  ;;  %v8960_v24 = vcombine.low %v948_v39, %v952_v14  ;;  %v9088_v37 = vcombine.low %v1076_v42, %v1080_v21  ;;  %v273_v39 = vld [vmem:[#allocation5 + $0x5b0] sm:$0xff]  ;;  %v9293_v14 = vld [vmem:[#allocation7] sm:$0xff] }
 0x223   :  { %6922 = vmatpush1.bf16.msra.mxu0 %v8872_v43  ;;  %v944_v17 = vld [vmem:[#allocation5 + $0x1aa8] sm:$0xff]  ;;  %v1128_v42 = vrot.slane %v9293_v14, %v1127_v5  ;;  %v121_v5 = vld [vmem:[#allocation5 + $0xf0] sm:$0xff] }
 0x224   :  { %6923 = vmatprep.subr.bf16.mxu0 %v8993_v45  ;;  %v1068_v31 = vld [vmem:[#allocation5 + $0x1e88] sm:$0xff]  ;;  %v8953_v38 = vcombine.high %v940_v30, %v944_v17 }
 0x225   :  { %6963 = vmatpush1.bf16.msra.mxu1 %v9000_v44  ;;  %v1072_v35 = vld [vmem:[#allocation5 + $0x1ea8] sm:$0xff] }
 0x226   :  { %6964 = vmatprep.subr.bf16.mxu1 %v9121_v19  ;;  %v9081_v41 = vcombine.high %v1068_v31, %v1072_v35  ;;  %v932_v28 = vld [vmem:[#allocation5 + $0x1a48] sm:$0xff]  ;;  %v8952_v19 = vcombine.low %v940_v30, %v944_v17  ;;  %v9080_v46 = vcombine.low %v1068_v31, %v1072_v35  ;;  %v133_v30 = vld [vmem:[#allocation5 + $0x150] sm:$0xff] }
 0x227   :  { %6924 = vmatpush2.bf16.msra.mxu0 %v8992_v50  ;;  %v936_v43 = vld [vmem:[#allocation5 + $0x1a68] sm:$0xff]  ;;  %v137_v17 = vld [vmem:[#allocation5 + $0x170] sm:$0xff] }
 0x228   :  { %6925 = vmatprep.subr.bf16.mxu0 %v8985_v52  ;;  %v1060_v44 = vld [vmem:[#allocation5 + $0x1e48] sm:$0xff]  ;;  %v8945_v54 = vcombine.high %v932_v28, %v936_v43  ;;  %v261_v35 = vld [vmem:[#allocation5 + $0x550] sm:$0xff] }
 0x229   :  { %6965 = vmatpush2.bf16.msra.mxu1 %v9120_v51  ;;  %v1064_v45 = vld [vmem:[#allocation5 + $0x1e68] sm:$0xff] }
 0x22a   :  { %6966 = vmatprep.subr.bf16.mxu1 %v9113_v56  ;;  %v9073_v48 = vcombine.high %v1060_v44, %v1064_v45  ;;  %v924_v22 = vld [vmem:[#allocation5 + $0x1a08] sm:$0xff]  ;;  %v8944_v56 = vcombine.low %v932_v28, %v936_v43  ;;  %v9072_v57 = vcombine.low %v1060_v44, %v1064_v45  ;;  %v8147_v44 = vcombine.high %v133_v30, %v137_v17 }
 0x22b   :  { %6926 = vmatpush2.bf16.msra.mxu0 %v8984_v0  ;;  %v928_v50 = vld [vmem:[#allocation5 + $0x1a28] sm:$0xff]  ;;  %v153_v0 = vld [vmem:[#allocation5 + $0x1f0] sm:$0xff] }
 0x22c   :  { %6927 = vmatprep.subr.bf16.mxu0 %v8977_v2  ;;  %v1052_v51 = vld [vmem:[#allocation5 + $0x1e08] sm:$0xff]  ;;  %v8937_v60 = vcombine.high %v924_v22, %v928_v50  ;;  %v281_v2 = vld [vmem:[#allocation5 + $0x5f0] sm:$0xff]  ;;  %v8163_v6 = vcombine.high %v149_v63, %v153_v0  ;;  %v8162_v21 = vcombine.low %v149_v63, %v153_v0 }
 0x22d   :  { %6967 = vmatpush2.bf16.msra.mxu1 %v9112_v1  ;;  %v1056_v52 = vld [vmem:[#allocation5 + $0x1e28] sm:$0xff]  ;;  %v277_v1 = vld [vmem:[#allocation5 + $0x5d0] sm:$0xff] }
 0x22e   :  { %6968 = vmatprep.subr.bf16.mxu1 %v9105_v3  ;;  %v9065_v62 = vcombine.high %v1052_v51, %v1056_v52  ;;  %v8936_v3 = vcombine.low %v924_v22, %v928_v50  ;;  %v9064_v7 = vcombine.low %v1052_v51, %v1056_v52  ;;  %v8291_v9 = vcombine.high %v277_v1, %v281_v2  ;;  %v129_v22 = vld [vmem:[#allocation5 + $0x130] sm:$0xff] }
 0x22f   :  { %6928 = vmatpush2.bf16.msra.mxu0 %v8976_v11  ;;  %v1131_v11 = vsub.s32 3, %v9565_v32  ;;  %v253_v51 = vld [vmem:[#allocation5 + $0x510] sm:$0xff] }
 0x230   :  { %6929 = vmatprep.subr.bf16.mxu0 %v8969_v10  ;;  %v145_v10 = vld [vmem:[#allocation5 + $0x1b0] sm:$0xff] }
 0x231   :  { %6969 = vmatpush2.bf16.msra.mxu1 %v9104_v12  ;;  %v141_v12 = vld [vmem:[#allocation5 + $0x190] sm:$0xff] }
 0x232   :  { %6970 = vmatprep.subr.bf16.mxu1 %v9097_v13  ;;  %v269_v13 = vld [vmem:[#allocation5 + $0x590] sm:$0xff] }
 0x233   :  { %6930 = vmatpush2.bf16.msra.mxu0 %v8968_v23  ;;  %v8290_v23 = vcombine.low %v277_v1, %v281_v2  ;;  %v8282_v43 = vcombine.low %v269_v13, %v273_v39  ;;  %v257_v52 = vld [vmem:[#allocation5 + $0x530] sm:$0xff] }
 0x234   :  { %6931 = vmatprep.subr.bf16.mxu0 %v8961_v53  ;;  %v1132_v53 = vrot.slane %v9293_v14, %v1131_v11  ;;  %v8267_v2 = vcombine.high %v253_v51, %v257_v52  ;;  %v8266_v11 = vcombine.low %v253_v51, %v257_v52  ;;  %v237_v14 = vld [vmem:[#allocation5 + $0x490] sm:$0xff] }
 0x235   :  { %6971 = vmatpush2.bf16.msra.mxu1 %v9096_v25  ;;  %v8155_v25 = vcombine.high %v141_v12, %v145_v10  ;;  %v341_v51 = vld [vmem:[#allocation5 + $0x7d0] sm:$0xff] }
 0x236   :  { %6972 = vmatprep.subr.bf16.mxu1 %v9089_v26  ;;  %v8283_v26 = vcombine.high %v269_v13, %v273_v39  ;;  %v109_v13 = vld [vmem:[#allocation5 + $0x90] sm:$0xff] }
 0x237   :  { %6932 = vmatpush2.bf16.msra.mxu0 %v8960_v24  ;;  %v265_v24 = vld [vmem:[#allocation5 + $0x570] sm:$0xff] }
 0x238   :  { %6933 = vmatprep.subr.bf16.mxu0 %v8953_v38  ;;  %v8274_v63 = vcombine.low %v261_v35, %v265_v24  ;;  %v113_v39 = vld [vmem:[#allocation5 + $0xb0] sm:$0xff] }
 0x239   :  { %6973 = vmatpush2.bf16.msra.mxu1 %v9088_v37  ;;  %v345_v52 = vld [vmem:[#allocation5 + $0x7f0] sm:$0xff] }
 0x23a   :  { %6974 = vmatprep.subr.bf16.mxu1 %v9081_v41  ;;  %v8154_v41 = vcombine.low %v141_v12, %v145_v10 }
 0x23b   :  { %6934 = vmatpush2.bf16.msra.mxu0 %v8952_v19 }
 0x23c   :  { %6935 = vmatprep.subr.bf16.mxu0 %v8945_v54  ;;  %v8275_v54 = vcombine.high %v261_v35, %v265_v24  ;;  %v8122_v35 = vcombine.low %v109_v13, %v113_v39 }
 0x23d   :  { %6975 = vmatpush2.bf16.msra.mxu1 %v9080_v46 }
 0x23e   :  { %6976 = vmatprep.subr.bf16.mxu1 %v9073_v48  ;;  %v125_v48 = vld [vmem:[#allocation5 + $0x110] sm:$0xff] }
 0x23f   :  { %6936 = vmatpush2.bf16.msra.mxu0 %v8944_v56  ;;  %v8139_v0 = vcombine.high %v125_v48, %v129_v22 }
 0x240   :  { %6937 = vmatprep.subr.bf16.mxu0 %v8937_v60  ;;  %v8146_v60 = vcombine.low %v133_v30, %v137_v17  ;;  %v105_v30 = vld [vmem:[#allocation5 + $0x70] sm:$0xff] }
 0x241   :  { %6977 = vmatpush2.bf16.msra.mxu1 %v9072_v57  ;;  %v229_v17 = vld [vmem:[#allocation5 + $0x450] sm:$0xff] }
 0x242   :  { %6978 = vmatprep.subr.bf16.mxu1 %v9065_v62 }
 0x243   :  { %6938 = vmatpush2.bf16.msra.mxu0 %v8936_v3  ;;  %v117_v3 = vld [vmem:[#allocation5 + $0xd0] sm:$0xff] }
 0x244   :  { %6989 = vmatprep.subr.bf16.mxu0 %v8163_v6  ;;  %v249_v6 = vld [vmem:[#allocation5 + $0x4f0] sm:$0xff]  ;;  %v8131_v12 = vcombine.high %v117_v3, %v121_v5 }
 0x245   :  { %6979 = vmatpush2.bf16.msra.mxu1 %v9064_v7  ;;  %v245_v7 = vld [vmem:[#allocation5 + $0x4d0] sm:$0xff] }
 0x246   :  { %7030 = vmatprep.subr.bf16.mxu1 %v8291_v9  ;;  %v6695_v31 = vpop.f32.mrf.mxu0  ;;  %6940 = vmatmul.mubr.bf16.vlgmr.msra.gmra.mxu0 %v9571_v55  ;;  %v8138_v9 = vcombine.low %v125_v48, %v129_v22  ;;  %v8259_v10 = vcombine.high %v245_v7, %v249_v6  ;;  %v213_v22 = vld [vmem:[#allocation5 + $0x3d0] sm:$0xff] }
 0x247   :  { %v6696_v37 = vadd.f32 %v6695_v31, %v1128_v42  ;;  %6990 = vmatpush1.bf16.msra.mxu0 %v8162_v21  ;;  %7021 = vmatprep.mubr.bf16.mxu0 %v9485_v58  ;;  %v241_v42 = vld [vmem:[#allocation5 + $0x4b0] sm:$0xff]  ;;  %v8130_v21 = vcombine.low %v117_v3, %v121_v5 }
 0x248   :  { %v6736_v38 = vpop.f32.mrf.mxu1  ;;  %6981 = vmatmul.mubr.bf16.vlgmr.msra.gmra.mxu1 %v9575_v61  ;;  %v6697_v28 = vpop.f32.mrf.mxu0  ;;  %6991 = vmatprep.subr.bf16.mxu0 %v8155_v25  ;;  %v8123_v25 = vcombine.high %v109_v13, %v113_v39  ;;  %v233_v31 = vld [vmem:[#allocation5 + $0x470] sm:$0xff]  ;;  %v8250_v24 = vcombine.low %v237_v14, %v241_v42 }
 0x249   :  { %7031 = vmatpush1.bf16.msra.mxu1 %v8290_v23  ;;  %v9619_v45 = vadd.f32 %v6736_v38, %v6696_v37  ;;  %v6698_v19 = vadd.f32 %v6697_v28, %v1132_v53  ;;  %7062 = vmatprep.mubr.bf16.mxu1 %v9489_v59  ;;  %v8258_v23 = vcombine.low %v245_v7, %v249_v6  ;;  %v97_v28 = vld [vmem:[#allocation5 + $0x30] sm:$0xff] }
 0x24a   :  { %v6738_v46 = vpop.f32.mrf.mxu1  ;;  %7032 = vmatprep.subr.bf16.mxu1 %v8283_v26  ;;  %v6699_v50 = vpop.f32.mrf.mxu0  ;;  %v8251_v53 = vcombine.high %v237_v14, %v241_v42  ;;  %v101_v26 = vld [vmem:[#allocation5 + $0x50] sm:$0xff]  ;;  %v8243_v38 = vcombine.high %v229_v17, %v233_v31  ;;  %v8354_v7 = vcombine.low %v341_v51, %v345_v52 }
 0x24b   :  { %v9623_v56 = vadd.f32 %v6738_v46, %v6698_v19  ;;  %6992 = vmatpush1.bf16.msra.mxu0 %v8154_v41  ;;  %v8115_v37 = vcombine.high %v101_v26, %v105_v30  ;;  %v93_v41 = vld [vmem:[#allocation5 + $0x10] sm:$0xff]  ;;  %v8114_v19 = vcombine.low %v101_v26, %v105_v30  ;;  %v8242_v46 = vcombine.low %v229_v17, %v233_v31 }
 0x24c   :  { %v6740_v57 = vpop.f32.mrf.mxu1  ;;  %v6700_v62 = vpop.f32.mrf.mxu0  ;;  %6993 = vmatprep.subr.bf16.mxu0 %v8147_v44  ;;  %v225_v44 = vld [vmem:[#allocation5 + $0x430] sm:$0xff] }
 0x24d   :  { %7033 = vmatpush1.bf16.msra.mxu1 %v8282_v43  ;;  %v221_v43 = vld [vmem:[#allocation5 + $0x410] sm:$0xff]  ;;  %v8106_v57 = vcombine.low %v93_v41, %v97_v28 }
 0x24e   :  { %v6741_v1 = vpop.f32.mrf.mxu1  ;;  %7034 = vmatprep.subr.bf16.mxu1 %v8275_v54  ;;  %v8107_v54 = vcombine.high %v93_v41, %v97_v28  ;;  %v8235_v48 = vcombine.high %v221_v43, %v225_v44  ;;  %v217_v50 = vld [vmem:[#allocation5 + $0x3f0] sm:$0xff] }
 0x24f   :  { %6994 = vmatpush1.bf16.msra.mxu0 %v8146_v60  ;;  %v8234_v60 = vcombine.low %v221_v43, %v225_v44  ;;  %v8227_v62 = vcombine.high %v213_v22, %v217_v50  ;;  %v209_v1 = vld [vmem:[#allocation5 + $0x3b0] sm:$0xff]  ;;  %v8226_v5 = vcombine.low %v213_v22, %v217_v50 }
 0x250   :  { %6995 = vmatprep.subr.bf16.mxu0 %v8139_v0  ;;  %v205_v0 = vld [vmem:[#allocation5 + $0x390] sm:$0xff] }
 0x251   :  { %7035 = vmatpush1.bf16.msra.mxu1 %v8274_v63  ;;  %v8355_v63 = vcombine.high %v341_v51, %v345_v52  ;;  %v337_v3 = vld [vmem:[#allocation5 + $0x7b0] sm:$0xff]  ;;  %v8219_v6 = vcombine.high %v205_v0, %v209_v1  ;;  %v8218_v39 = vcombine.low %v205_v0, %v209_v1 }
 0x252   :  { %7036 = vmatprep.subr.bf16.mxu1 %v8267_v2  ;;  %v333_v2 = vld [vmem:[#allocation5 + $0x790] sm:$0xff] }
 0x253   :  { %6996 = vmatpush1.bf16.msra.mxu0 %v8138_v9  ;;  %v8347_v9 = vcombine.high %v333_v2, %v337_v3  ;;  %v329_v13 = vld [vmem:[#allocation5 + $0x770] sm:$0xff]  ;;  %v8346_v14 = vcombine.low %v333_v2, %v337_v3 }
 0x254   :  { %6997 = vmatprep.subr.bf16.mxu0 %v8131_v12  ;;  %v201_v12 = vld [vmem:[#allocation5 + $0x370] sm:$0xff] }
 0x255   :  { %7037 = vmatpush1.bf16.msra.mxu1 %v8266_v11  ;;  %v197_v11 = vld [vmem:[#allocation5 + $0x350] sm:$0xff] }
 0x256   :  { %7038 = vmatprep.subr.bf16.mxu1 %v8259_v10  ;;  %v325_v10 = vld [vmem:[#allocation5 + $0x750] sm:$0xff]  ;;  %v8211_v42 = vcombine.high %v197_v11, %v201_v12  ;;  %v8210_v30 = vcombine.low %v197_v11, %v201_v12 }
 0x257   :  { %6998 = vmatpush1.bf16.msra.mxu0 %v8130_v21  ;;  %v8339_v21 = vcombine.high %v325_v10, %v329_v13  ;;  %v321_v26 = vld [vmem:[#allocation5 + $0x730] sm:$0xff]  ;;  %v8338_v17 = vcombine.low %v325_v10, %v329_v13 }
 0x258   :  { %6999 = vmatprep.subr.bf16.mxu0 %v8123_v25  ;;  %v193_v25 = vld [vmem:[#allocation5 + $0x330] sm:$0xff] }
 0x259   :  { %7039 = vmatpush1.bf16.msra.mxu1 %v8258_v23  ;;  %v189_v23 = vld [vmem:[#allocation5 + $0x310] sm:$0xff] }
 0x25a   :  { %7040 = vmatprep.subr.bf16.mxu1 %v8251_v53  ;;  %v317_v53 = vld [vmem:[#allocation5 + $0x710] sm:$0xff]  ;;  %v8203_v31 = vcombine.high %v189_v23, %v193_v25  ;;  %v8202_v28 = vcombine.low %v189_v23, %v193_v25 }
 0x25b   :  { %7000 = vmatpush1.bf16.msra.mxu0 %v8122_v35  ;;  %v8331_v35 = vcombine.high %v317_v53, %v321_v26  ;;  %v313_v41 = vld [vmem:[#allocation5 + $0x6f0] sm:$0xff]  ;;  %v8330_v43 = vcombine.low %v317_v53, %v321_v26 }
 0x25c   :  { %7001 = vmatprep.subr.bf16.mxu0 %v8115_v37  ;;  %v185_v37 = vld [vmem:[#allocation5 + $0x2f0] sm:$0xff] }
 0x25d   :  { %7041 = vmatpush1.bf16.msra.mxu1 %v8250_v24  ;;  %v181_v24 = vld [vmem:[#allocation5 + $0x2d0] sm:$0xff] }
 0x25e   :  { %7042 = vmatprep.subr.bf16.mxu1 %v8243_v38  ;;  %v309_v38 = vld [vmem:[#allocation5 + $0x6d0] sm:$0xff]  ;;  %v8195_v44 = vcombine.high %v181_v24, %v185_v37  ;;  %v8194_v50 = vcombine.low %v181_v24, %v185_v37 }
 0x25f   :  { %7002 = vmatpush1.bf16.msra.mxu0 %v8114_v19  ;;  %v8323_v19 = vcombine.high %v309_v38, %v313_v41  ;;  %v305_v22 = vld [vmem:[#allocation5 + $0x6b0] sm:$0xff]  ;;  %v8322_v51 = vcombine.low %v309_v38, %v313_v41 }
 0x260   :  { %7003 = vmatprep.subr.bf16.mxu0 %v8107_v54  ;;  %v177_v54 = vld [vmem:[#allocation5 + $0x2b0] sm:$0xff] }
 0x261   :  { %7043 = vmatpush1.bf16.msra.mxu1 %v8242_v46  ;;  %v173_v46 = vld [vmem:[#allocation5 + $0x290] sm:$0xff] }
 0x262   :  { %7044 = vmatprep.subr.bf16.mxu1 %v8235_v48  ;;  %v301_v48 = vld [vmem:[#allocation5 + $0x690] sm:$0xff]  ;;  %v8187_v52 = vcombine.high %v173_v46, %v177_v54  ;;  %v8186_v1 = vcombine.low %v173_v46, %v177_v54 }
 0x263   :  { %7004 = vmatpush1.bf16.msra.mxu0 %v8106_v57  ;;  %v8315_v57 = vcombine.high %v301_v48, %v305_v22  ;;  %v297_v0 = vld [vmem:[#allocation5 + $0x670] sm:$0xff]  ;;  %v8314_v2 = vcombine.low %v301_v48, %v305_v22 }
 0x264   :  { %7005 = vmatprep.subr.bf16.mxu0 %v8227_v62  ;;  %v169_v62 = vld [vmem:[#allocation5 + $0x270] sm:$0xff] }
 0x265   :  { %7045 = vmatpush1.bf16.msra.mxu1 %v8234_v60  ;;  %v165_v60 = vld [vmem:[#allocation5 + $0x250] sm:$0xff] }
 0x266   :  { %7046 = vmatprep.subr.bf16.mxu1 %v8355_v63  ;;  %v293_v63 = vld [vmem:[#allocation5 + $0x650] sm:$0xff]  ;;  %v8179_v3 = vcombine.high %v165_v60, %v169_v62  ;;  %v8178_v12 = vcombine.low %v165_v60, %v169_v62 }
 0x267   :  { %7006 = vmatpush2.bf16.msra.mxu0 %v8226_v5  ;;  %v8307_v5 = vcombine.high %v293_v63, %v297_v0  ;;  %v289_v11 = vld [vmem:[#allocation5 + $0x630] sm:$0xff]  ;;  %v8306_v10 = vcombine.low %v293_v63, %v297_v0 }
 0x268   :  { %7007 = vmatprep.subr.bf16.mxu0 %v8219_v6  ;;  %v161_v6 = vld [vmem:[#allocation5 + $0x230] sm:$0xff] }
 0x269   :  { %7047 = vmatpush2.bf16.msra.mxu1 %v8354_v7  ;;  %v157_v7 = vld [vmem:[#allocation5 + $0x210] sm:$0xff] }
 0x26a   :  { %7048 = vmatprep.subr.bf16.mxu1 %v8347_v9  ;;  %v285_v9 = vld [vmem:[#allocation5 + $0x610] sm:$0xff]  ;;  %v8171_v13 = vcombine.high %v157_v7, %v161_v6  ;;  %v8170_v25 = vcombine.low %v157_v7, %v161_v6 }
 0x26b   :  { %7008 = vmatpush2.bf16.msra.mxu0 %v8218_v39  ;;  %v8299_v39 = vcombine.high %v285_v9, %v289_v11  ;;  %v537_v23 = vld [vmem:[#allocation5 + $0xdf0] sm:$0xff]  ;;  %v8298_v53 = vcombine.low %v285_v9, %v289_v11 }
 0x26c   :  { %7009 = vmatprep.subr.bf16.mxu0 %v8211_v42  ;;  %v409_v42 = vld [vmem:[#allocation5 + $0x9f0] sm:$0xff] }
 0x26d   :  { %7049 = vmatpush2.bf16.msra.mxu1 %v8346_v14  ;;  %v405_v14 = vld [vmem:[#allocation5 + $0x9d0] sm:$0xff] }
 0x26e   :  { %7050 = vmatprep.subr.bf16.mxu1 %v8339_v21  ;;  %v533_v21 = vld [vmem:[#allocation5 + $0xdd0] sm:$0xff]  ;;  %v8419_v26 = vcombine.high %v405_v14, %v409_v42  ;;  %v8418_v37 = vcombine.low %v405_v14, %v409_v42 }
 0x26f   :  { %7010 = vmatpush2.bf16.msra.mxu0 %v8210_v30  ;;  %v8547_v30 = vcombine.high %v533_v21, %v537_v23  ;;  %v529_v24 = vld [vmem:[#allocation5 + $0xdb0] sm:$0xff]  ;;  %v8546_v38 = vcombine.low %v533_v21, %v537_v23 }
 0x270   :  { %7011 = vmatprep.subr.bf16.mxu0 %v8203_v31  ;;  %v401_v31 = vld [vmem:[#allocation5 + $0x9b0] sm:$0xff] }
 0x271   :  { %7051 = vmatpush2.bf16.msra.mxu1 %v8338_v17  ;;  %v397_v17 = vld [vmem:[#allocation5 + $0x990] sm:$0xff] }
 0x272   :  { %7052 = vmatprep.subr.bf16.mxu1 %v8331_v35  ;;  %v525_v35 = vld [vmem:[#allocation5 + $0xd90] sm:$0xff]  ;;  %v8411_v41 = vcombine.high %v397_v17, %v401_v31 }
 0x273   :  { %7012 = vmatpush2.bf16.msra.mxu0 %v8202_v28  ;;  %v8539_v28 = vcombine.high %v525_v35, %v529_v24  ;;  %v517_v46 = vld [vmem:[#allocation5 + $0xd50] sm:$0xff] }
 0x274   :  { %7013 = vmatprep.subr.bf16.mxu0 %v8195_v44  ;;  %v393_v44 = vld [vmem:[#allocation5 + $0x970] sm:$0xff] }
 0x275   :  { %7053 = vmatpush2.bf16.msra.mxu1 %v8330_v43  ;;  %v389_v43 = vld [vmem:[#allocation5 + $0x950] sm:$0xff] }
 0x276   :  { %7054 = vmatprep.subr.bf16.mxu1 %v8323_v19  ;;  %v521_v54 = vld [vmem:[#allocation5 + $0xd70] sm:$0xff]  ;;  %v8402_v9 = vcombine.low %v389_v43, %v393_v44 }
 0x277   :  { %7014 = vmatpush2.bf16.msra.mxu0 %v8194_v50  ;;  %v8410_v50 = vcombine.low %v397_v17, %v401_v31  ;;  %v8531_v0 = vcombine.high %v517_v46, %v521_v54  ;;  %v377_v14 = vld [vmem:[#allocation5 + $0x8f0] sm:$0xff] }
 0x278   :  { %7015 = vmatprep.subr.bf16.mxu0 %v8187_v52  ;;  %v8538_v52 = vcombine.low %v525_v35, %v529_v24  ;;  %v501_v42 = vld [vmem:[#allocation5 + $0xcd0] sm:$0xff] }
 0x279   :  { %7055 = vmatpush2.bf16.msra.mxu1 %v8322_v51  ;;  %v505_v21 = vld [vmem:[#allocation5 + $0xcf0] sm:$0xff] }
 0x27a   :  { %7056 = vmatprep.subr.bf16.mxu1 %v8315_v57  ;;  %v8403_v57 = vcombine.high %v389_v43, %v393_v44  ;;  %v369_v17 = vld [vmem:[#allocation5 + $0x8b0] sm:$0xff] }
 0x27b   :  { %7016 = vmatpush2.bf16.msra.mxu0 %v8186_v1  ;;  %v381_v1 = vld [vmem:[#allocation5 + $0x910] sm:$0xff] }
 0x27c   :  { %7017 = vmatprep.subr.bf16.mxu0 %v8179_v3  ;;  %v509_v3 = vld [vmem:[#allocation5 + $0xd10] sm:$0xff] }
 0x27d   :  { %7057 = vmatpush2.bf16.msra.mxu1 %v8314_v2  ;;  %v385_v2 = vld [vmem:[#allocation5 + $0x930] sm:$0xff] }
 0x27e   :  { %7058 = vmatprep.subr.bf16.mxu1 %v8307_v5  ;;  %v513_v5 = vld [vmem:[#allocation5 + $0xd30] sm:$0xff]  ;;  %v8394_v23 = vcombine.low %v381_v1, %v385_v2 }
 0x27f   :  { %7018 = vmatpush2.bf16.msra.mxu0 %v8178_v12  ;;  %v8395_v12 = vcombine.high %v381_v1, %v385_v2  ;;  %v493_v31 = vld [vmem:[#allocation5 + $0xc90] sm:$0xff] }
 0x280   :  { %7019 = vmatprep.subr.bf16.mxu0 %v8171_v13  ;;  %v8523_v13 = vcombine.high %v509_v3, %v513_v5  ;;  %v497_v35 = vld [vmem:[#allocation5 + $0xcb0] sm:$0xff] }
 0x281   :  { %7059 = vmatpush2.bf16.msra.mxu1 %v8306_v10  ;;  %v361_v43 = vld [vmem:[#allocation5 + $0x870] sm:$0xff] }
 0x282   :  { %7060 = vmatprep.subr.bf16.mxu1 %v8299_v39  ;;  %v373_v39 = vld [vmem:[#allocation5 + $0x8d0] sm:$0xff] }
 0x283   :  { %7020 = vmatpush2.bf16.msra.mxu0 %v8170_v25  ;;  %v8522_v25 = vcombine.low %v509_v3, %v513_v5  ;;  %v8386_v24 = vcombine.low %v373_v39, %v377_v14  ;;  %v485_v44 = vld [vmem:[#allocation5 + $0xc50] sm:$0xff] }
 0x284   :  { %7071 = vmatprep.subr.bf16.mxu0 %v8419_v26  ;;  %v8515_v26 = vcombine.high %v501_v42, %v505_v21  ;;  %v469_v2 = vld [vmem:[#allocation5 + $0xbd0] sm:$0xff] }
 0x285   :  { %7061 = vmatpush2.bf16.msra.mxu1 %v8298_v53  ;;  %v8387_v53 = vcombine.high %v373_v39, %v377_v14  ;;  %v597_v3 = vld [vmem:[#allocation5 + $0xfd0] sm:$0xff] }
 0x286   :  { %7112 = vmatprep.subr.bf16.mxu1 %v8547_v30  ;;  %v6777_v19 = vpop.f32.mrf.mxu0  ;;  %7022 = vmatmul.mubr.bf16.vlgmr.msra.gmra.mxu0 %v9495_v16  ;;  %v365_v30 = vld [vmem:[#allocation5 + $0x890] sm:$0xff] }
 0x287   :  { %v6778_v48 = vadd.f32 %v6777_v19, %v9619_v45  ;;  %7072 = vmatpush1.bf16.msra.mxu0 %v8418_v37  ;;  %7103 = vmatprep.mubr.bf16.mxu0 %v9507_v27  ;;  %v8514_v37 = vcombine.low %v501_v42, %v505_v21  ;;  %v489_v19 = vld [vmem:[#allocation5 + $0xc70] sm:$0xff] }
 0x288   :  { %v6818_v22 = vpop.f32.mrf.mxu1  ;;  %7063 = vmatmul.mubr.bf16.vlgmr.msra.gmra.mxu1 %v9501_v20  ;;  %v6779_v51 = vpop.f32.mrf.mxu0  ;;  %7073 = vmatprep.subr.bf16.mxu0 %v8411_v41  ;;  %v8507_v41 = vcombine.high %v493_v31, %v497_v35  ;;  %v601_v5 = vld [vmem:[#allocation5 + $0xff0] sm:$0xff] }
 0x289   :  { %7113 = vmatpush1.bf16.msra.mxu1 %v8546_v38  ;;  %v9628_v60 = vadd.f32 %v6818_v22, %v6778_v48  ;;  %v6780_v62 = vadd.f32 %v6779_v51, %v9623_v56  ;;  %7144 = vmatprep.mubr.bf16.mxu1 %v9512_v29  ;;  %v8530_v56 = vcombine.low %v517_v46, %v521_v54  ;;  %v353_v51 = vld [vmem:[#allocation5 + $0x830] sm:$0xff] }
 0x28a   :  { %v6820_v63 = vpop.f32.mrf.mxu1  ;;  %7114 = vmatprep.subr.bf16.mxu1 %v8539_v28  ;;  %v6781_v45 = vpop.f32.mrf.mxu0  ;;  %v8379_v38 = vcombine.high %v365_v30, %v369_v17  ;;  %v357_v28 = vld [vmem:[#allocation5 + $0x850] sm:$0xff]  ;;  %v8378_v46 = vcombine.low %v365_v30, %v369_v17  ;;  %v8506_v54 = vcombine.low %v493_v31, %v497_v35  ;;  %v8499_v22 = vcombine.high %v485_v44, %v489_v19 }
 0x28b   :  { %v9633_v7 = vadd.f32 %v6820_v63, %v6780_v62  ;;  %7074 = vmatpush1.bf16.msra.mxu0 %v8410_v50  ;;  %v8371_v48 = vcombine.high %v357_v28, %v361_v43  ;;  %v349_v50 = vld [vmem:[#allocation5 + $0x810] sm:$0xff]  ;;  %v8370_v62 = vcombine.low %v357_v28, %v361_v43  ;;  %v8498_v63 = vcombine.low %v485_v44, %v489_v19 }
 0x28c   :  { %v6822_v6 = vpop.f32.mrf.mxu1  ;;  %v6782_v11 = vpop.f32.mrf.mxu0  ;;  %7075 = vmatprep.subr.bf16.mxu0 %v8403_v57  ;;  %v481_v57 = vld [vmem:[#allocation5 + $0xc30] sm:$0xff]  ;;  %v8610_v42 = vcombine.low %v597_v3, %v601_v5 }
 0x28d   :  { %7115 = vmatpush1.bf16.msra.mxu1 %v8538_v52  ;;  %v477_v52 = vld [vmem:[#allocation5 + $0xc10] sm:$0xff]  ;;  %v8362_v6 = vcombine.low %v349_v50, %v353_v51 }
 0x28e   :  { %v6823_v10 = vpop.f32.mrf.mxu1  ;;  %7116 = vmatprep.subr.bf16.mxu1 %v8531_v0  ;;  %v8363_v0 = vcombine.high %v349_v50, %v353_v51  ;;  %v8491_v1 = vcombine.high %v477_v52, %v481_v57  ;;  %v473_v45 = vld [vmem:[#allocation5 + $0xbf0] sm:$0xff] }
 0x28f   :  { %7076 = vmatpush1.bf16.msra.mxu0 %v8402_v9  ;;  %v8490_v9 = vcombine.low %v477_v52, %v481_v57  ;;  %v8483_v11 = vcombine.high %v469_v2, %v473_v45  ;;  %v465_v10 = vld [vmem:[#allocation5 + $0xbb0] sm:$0xff]  ;;  %v8482_v14 = vcombine.low %v469_v2, %v473_v45 }
 0x290   :  { %7077 = vmatprep.subr.bf16.mxu0 %v8395_v12  ;;  %v461_v12 = vld [vmem:[#allocation5 + $0xb90] sm:$0xff] }
 0x291   :  { %7117 = vmatpush1.bf16.msra.mxu1 %v8530_v56  ;;  %v8611_v56 = vcombine.high %v597_v3, %v601_v5  ;;  %v593_v39 = vld [vmem:[#allocation5 + $0xfb0] sm:$0xff]  ;;  %v8475_v21 = vcombine.high %v461_v12, %v465_v10  ;;  %v8474_v17 = vcombine.low %v461_v12, %v465_v10 }
 0x292   :  { %7118 = vmatprep.subr.bf16.mxu1 %v8523_v13  ;;  %v589_v13 = vld [vmem:[#allocation5 + $0xf90] sm:$0xff] }
 0x293   :  { %7078 = vmatpush1.bf16.msra.mxu0 %v8394_v23  ;;  %v8603_v23 = vcombine.high %v589_v13, %v593_v39  ;;  %v585_v30 = vld [vmem:[#allocation5 + $0xf70] sm:$0xff]  ;;  %v8602_v31 = vcombine.low %v589_v13, %v593_v39 }
 0x294   :  { %7079 = vmatprep.subr.bf16.mxu0 %v8387_v53  ;;  %v457_v53 = vld [vmem:[#allocation5 + $0xb70] sm:$0xff] }
 0x295   :  { %7119 = vmatpush1.bf16.msra.mxu1 %v8522_v25  ;;  %v453_v25 = vld [vmem:[#allocation5 + $0xb50] sm:$0xff] }
 0x296   :  { %7120 = vmatprep.subr.bf16.mxu1 %v8515_v26  ;;  %v581_v26 = vld [vmem:[#allocation5 + $0xf50] sm:$0xff]  ;;  %v8467_v35 = vcombine.high %v453_v25, %v457_v53  ;;  %v8466_v43 = vcombine.low %v453_v25, %v457_v53 }
 0x297   :  { %7080 = vmatpush1.bf16.msra.mxu0 %v8386_v24  ;;  %v8595_v24 = vcombine.high %v581_v26, %v585_v30  ;;  %v577_v28 = vld [vmem:[#allocation5 + $0xf30] sm:$0xff]  ;;  %v8594_v44 = vcombine.low %v581_v26, %v585_v30 }
 0x298   :  { %7081 = vmatprep.subr.bf16.mxu0 %v8379_v38  ;;  %v449_v38 = vld [vmem:[#allocation5 + $0xb30] sm:$0xff] }
 0x299   :  { %7121 = vmatpush1.bf16.msra.mxu1 %v8514_v37  ;;  %v445_v37 = vld [vmem:[#allocation5 + $0xb10] sm:$0xff] }
 0x29a   :  { %7122 = vmatprep.subr.bf16.mxu1 %v8507_v41  ;;  %v573_v41 = vld [vmem:[#allocation5 + $0xf10] sm:$0xff]  ;;  %v8459_v19 = vcombine.high %v445_v37, %v449_v38  ;;  %v8458_v51 = vcombine.low %v445_v37, %v449_v38 }
 0x29b   :  { %7082 = vmatpush1.bf16.msra.mxu0 %v8378_v46  ;;  %v8587_v46 = vcombine.high %v573_v41, %v577_v28  ;;  %v569_v50 = vld [vmem:[#allocation5 + $0xef0] sm:$0xff]  ;;  %v8586_v52 = vcombine.low %v573_v41, %v577_v28 }
 0x29c   :  { %7083 = vmatprep.subr.bf16.mxu0 %v8371_v48  ;;  %v441_v48 = vld [vmem:[#allocation5 + $0xaf0] sm:$0xff] }
 0x29d   :  { %7123 = vmatpush1.bf16.msra.mxu1 %v8506_v54  ;;  %v437_v54 = vld [vmem:[#allocation5 + $0xad0] sm:$0xff] }
 0x29e   :  { %7124 = vmatprep.subr.bf16.mxu1 %v8499_v22  ;;  %v565_v22 = vld [vmem:[#allocation5 + $0xed0] sm:$0xff]  ;;  %v8451_v57 = vcombine.high %v437_v54, %v441_v48  ;;  %v8450_v45 = vcombine.low %v437_v54, %v441_v48 }
 0x29f   :  { %7084 = vmatpush1.bf16.msra.mxu0 %v8370_v62  ;;  %v8579_v62 = vcombine.high %v565_v22, %v569_v50  ;;  %v561_v2 = vld [vmem:[#allocation5 + $0xeb0] sm:$0xff]  ;;  %v8578_v3 = vcombine.low %v565_v22, %v569_v50 }
 0x2a0   :  { %7085 = vmatprep.subr.bf16.mxu0 %v8363_v0  ;;  %v433_v0 = vld [vmem:[#allocation5 + $0xab0] sm:$0xff] }
 0x2a1   :  { %7125 = vmatpush1.bf16.msra.mxu1 %v8498_v63  ;;  %v429_v63 = vld [vmem:[#allocation5 + $0xa90] sm:$0xff] }
 0x2a2   :  { %7126 = vmatprep.subr.bf16.mxu1 %v8491_v1  ;;  %v557_v1 = vld [vmem:[#allocation5 + $0xe90] sm:$0xff]  ;;  %v8443_v5 = vcombine.high %v429_v63, %v433_v0  ;;  %v8442_v10 = vcombine.low %v429_v63, %v433_v0 }
 0x2a3   :  { %7086 = vmatpush1.bf16.msra.mxu0 %v8362_v6  ;;  %v8571_v6 = vcombine.high %v557_v1, %v561_v2  ;;  %v553_v12 = vld [vmem:[#allocation5 + $0xe70] sm:$0xff]  ;;  %v8570_v13 = vcombine.low %v557_v1, %v561_v2 }
 0x2a4   :  { %7087 = vmatprep.subr.bf16.mxu0 %v8483_v11  ;;  %v425_v11 = vld [vmem:[#allocation5 + $0xa70] sm:$0xff] }
 0x2a5   :  { %7127 = vmatpush1.bf16.msra.mxu1 %v8490_v9  ;;  %v421_v9 = vld [vmem:[#allocation5 + $0xa50] sm:$0xff] }
 0x2a6   :  { %7128 = vmatprep.subr.bf16.mxu1 %v8611_v56  ;;  %v549_v56 = vld [vmem:[#allocation5 + $0xe50] sm:$0xff]  ;;  %v8435_v39 = vcombine.high %v421_v9, %v425_v11  ;;  %v8434_v53 = vcombine.low %v421_v9, %v425_v11 }
 0x2a7   :  { %7088 = vmatpush2.bf16.msra.mxu0 %v8482_v14  ;;  %v8563_v14 = vcombine.high %v549_v56, %v553_v12  ;;  %v545_v25 = vld [vmem:[#allocation5 + $0xe30] sm:$0xff]  ;;  %v8562_v26 = vcombine.low %v549_v56, %v553_v12 }
 0x2a8   :  { %7089 = vmatprep.subr.bf16.mxu0 %v8475_v21  ;;  %v417_v21 = vld [vmem:[#allocation5 + $0xa30] sm:$0xff] }
 0x2a9   :  { %7129 = vmatpush2.bf16.msra.mxu1 %v8610_v42  ;;  %v413_v42 = vld [vmem:[#allocation5 + $0xa10] sm:$0xff] }
 0x2aa   :  { %7130 = vmatprep.subr.bf16.mxu1 %v8603_v23  ;;  %v541_v23 = vld [vmem:[#allocation5 + $0xe10] sm:$0xff]  ;;  %v8427_v30 = vcombine.high %v413_v42, %v417_v21  ;;  %v8426_v38 = vcombine.low %v413_v42, %v417_v21 }
 0x2ab   :  { %7090 = vmatpush2.bf16.msra.mxu0 %v8474_v17  ;;  %v8555_v17 = vcombine.high %v541_v23, %v545_v25  ;;  %v793_v37 = vld [vmem:[#allocation5 + $0x15f0] sm:$0xff]  ;;  %v8554_v41 = vcombine.low %v541_v23, %v545_v25 }
 0x2ac   :  { %7091 = vmatprep.subr.bf16.mxu0 %v8467_v35  ;;  %v665_v35 = vld [vmem:[#allocation5 + $0x11f0] sm:$0xff] }
 0x2ad   :  { %7131 = vmatpush2.bf16.msra.mxu1 %v8602_v31  ;;  %v661_v31 = vld [vmem:[#allocation5 + $0x11d0] sm:$0xff] }
 0x2ae   :  { %7132 = vmatprep.subr.bf16.mxu1 %v8595_v24  ;;  %v789_v24 = vld [vmem:[#allocation5 + $0x15d0] sm:$0xff]  ;;  %v8675_v28 = vcombine.high %v661_v31, %v665_v35  ;;  %v8674_v48 = vcombine.low %v661_v31, %v665_v35 }
 0x2af   :  { %7092 = vmatpush2.bf16.msra.mxu0 %v8466_v43  ;;  %v8803_v43 = vcombine.high %v789_v24, %v793_v37  ;;  %v785_v54 = vld [vmem:[#allocation5 + $0x15b0] sm:$0xff]  ;;  %v8802_v22 = vcombine.low %v789_v24, %v793_v37 }
 0x2b0   :  { %7093 = vmatprep.subr.bf16.mxu0 %v8459_v19  ;;  %v657_v19 = vld [vmem:[#allocation5 + $0x11b0] sm:$0xff] }
 0x2b1   :  { %7133 = vmatpush2.bf16.msra.mxu1 %v8594_v44  ;;  %v653_v44 = vld [vmem:[#allocation5 + $0x1190] sm:$0xff] }
 0x2b2   :  { %7134 = vmatprep.subr.bf16.mxu1 %v8587_v46  ;;  %v781_v46 = vld [vmem:[#allocation5 + $0x1590] sm:$0xff]  ;;  %v8667_v50 = vcombine.high %v653_v44, %v657_v19 }
 0x2b3   :  { %7094 = vmatpush2.bf16.msra.mxu0 %v8458_v51  ;;  %v8795_v51 = vcombine.high %v781_v46, %v785_v54  ;;  %v773_v63 = vld [vmem:[#allocation5 + $0x1550] sm:$0xff] }
 0x2b4   :  { %7095 = vmatprep.subr.bf16.mxu0 %v8451_v57  ;;  %v649_v57 = vld [vmem:[#allocation5 + $0x1170] sm:$0xff] }
 0x2b5   :  { %7135 = vmatpush2.bf16.msra.mxu1 %v8586_v52  ;;  %v645_v52 = vld [vmem:[#allocation5 + $0x1150] sm:$0xff] }
 0x2b6   :  { %7136 = vmatprep.subr.bf16.mxu1 %v8579_v62  ;;  %v777_v0 = vld [vmem:[#allocation5 + $0x1570] sm:$0xff]  ;;  %v8658_v23 = vcombine.low %v645_v52, %v649_v57 }
 0x2b7   :  { %7096 = vmatpush2.bf16.msra.mxu0 %v8450_v45  ;;  %v8666_v45 = vcombine.low %v653_v44, %v657_v19  ;;  %v8787_v12 = vcombine.high %v773_v63, %v777_v0  ;;  %v633_v31 = vld [vmem:[#allocation5 + $0x10f0] sm:$0xff] }
 0x2b8   :  { %7097 = vmatprep.subr.bf16.mxu0 %v8443_v5  ;;  %v8794_v5 = vcombine.low %v781_v46, %v785_v54  ;;  %v757_v35 = vld [vmem:[#allocation5 + $0x14d0] sm:$0xff] }
 0x2b9   :  { %7137 = vmatpush2.bf16.msra.mxu1 %v8578_v3  ;;  %v761_v24 = vld [vmem:[#allocation5 + $0x14f0] sm:$0xff] }
 0x2ba   :  { %7138 = vmatprep.subr.bf16.mxu1 %v8571_v6  ;;  %v8659_v6 = vcombine.high %v645_v52, %v649_v57  ;;  %v625_v44 = vld [vmem:[#allocation5 + $0x10b0] sm:$0xff] }
 0x2bb   :  { %7098 = vmatpush2.bf16.msra.mxu0 %v8442_v10  ;;  %v637_v10 = vld [vmem:[#allocation5 + $0x1110] sm:$0xff] }
 0x2bc   :  { %7099 = vmatprep.subr.bf16.mxu0 %v8435_v39  ;;  %v765_v39 = vld [vmem:[#allocation5 + $0x1510] sm:$0xff] }
 0x2bd   :  { %7139 = vmatpush2.bf16.msra.mxu1 %v8570_v13  ;;  %v641_v13 = vld [vmem:[#allocation5 + $0x1130] sm:$0xff] }
 0x2be   :  { %7140 = vmatprep.subr.bf16.mxu1 %v8563_v14  ;;  %v769_v14 = vld [vmem:[#allocation5 + $0x1530] sm:$0xff]  ;;  %v8650_v37 = vcombine.low %v637_v10, %v641_v13 }
 0x2bf   :  { %7100 = vmatpush2.bf16.msra.mxu0 %v8434_v53  ;;  %v8651_v53 = vcombine.high %v637_v10, %v641_v13  ;;  %v749_v19 = vld [vmem:[#allocation5 + $0x1490] sm:$0xff] }
 0x2c0   :  { %7101 = vmatprep.subr.bf16.mxu0 %v8427_v30  ;;  %v8779_v30 = vcombine.high %v765_v39, %v769_v14  ;;  %v753_v46 = vld [vmem:[#allocation5 + $0x14b0] sm:$0xff] }
 0x2c1   :  { %7141 = vmatpush2.bf16.msra.mxu1 %v8562_v26  ;;  %v617_v52 = vld [vmem:[#allocation5 + $0x1070] sm:$0xff] }
 0x2c2   :  { %7142 = vmatprep.subr.bf16.mxu1 %v8555_v17  ;;  %v629_v17 = vld [vmem:[#allocation5 + $0x10d0] sm:$0xff] }
 0x2c3   :  { %7102 = vmatpush2.bf16.msra.mxu0 %v8426_v38  ;;  %v8778_v38 = vcombine.low %v765_v39, %v769_v14  ;;  %v8642_v54 = vcombine.low %v629_v17, %v633_v31  ;;  %v741_v57 = vld [vmem:[#allocation5 + $0x1450] sm:$0xff] }
 0x2c4   :  { %7153 = vmatprep.subr.bf16.mxu0 %v8675_v28  ;;  %v8771_v28 = vcombine.high %v757_v35, %v761_v24  ;;  %v725_v13 = vld [vmem:[#allocation5 + $0x13d0] sm:$0xff] }
 0x2c5   :  { %7143 = vmatpush2.bf16.msra.mxu1 %v8554_v41  ;;  %v8643_v41 = vcombine.high %v629_v17, %v633_v31  ;;  %v853_v39 = vld [vmem:[#allocation5 + $0x17d0] sm:$0xff] }
 0x2c6   :  { %7194 = vmatprep.subr.bf16.mxu1 %v8803_v43  ;;  %v6859_v62 = vpop.f32.mrf.mxu0  ;;  %7104 = vmatmul.mubr.bf16.vlgmr.msra.gmra.mxu0 %v9519_v36  ;;  %v621_v43 = vld [vmem:[#allocation5 + $0x1090] sm:$0xff] }
 0x2c7   :  { %v6860_v1 = vadd.f32 %v6859_v62, %v9628_v60  ;;  %7154 = vmatpush1.bf16.msra.mxu0 %v8674_v48  ;;  %7185 = vmatprep.mubr.bf16.mxu0 %v9531_v47  ;;  %v8770_v48 = vcombine.low %v757_v35, %v761_v24  ;;  %v745_v62 = vld [vmem:[#allocation5 + $0x1470] sm:$0xff] }
 0x2c8   :  { %v6900_v2 = vpop.f32.mrf.mxu1  ;;  %7145 = vmatmul.mubr.bf16.vlgmr.msra.gmra.mxu1 %v9525_v40  ;;  %v6861_v3 = vpop.f32.mrf.mxu0  ;;  %7155 = vmatprep.subr.bf16.mxu0 %v8667_v50  ;;  %v8763_v50 = vcombine.high %v749_v19, %v753_v46  ;;  %v857_v14 = vld [vmem:[#allocation5 + $0x17f0] sm:$0xff] }
 0x2c9   :  { %7195 = vmatpush1.bf16.msra.mxu1 %v8802_v22  ;;  %v9638_v9 = vadd.f32 %v6900_v2, %v6860_v1  ;;  %v6862_v11 = vadd.f32 %v6861_v3, %v9633_v7  ;;  %7226 = vmatprep.mubr.bf16.mxu1 %v9536_v49  ;;  %v8786_v7 = vcombine.low %v773_v63, %v777_v0  ;;  %v609_v3 = vld [vmem:[#allocation5 + $0x1030] sm:$0xff] }
 0x2ca   :  { %v6902_v56 = vpop.f32.mrf.mxu1  ;;  %7196 = vmatprep.subr.bf16.mxu1 %v8795_v51  ;;  %v6863_v60 = vpop.f32.mrf.mxu0  ;;  %v8635_v22 = vcombine.high %v621_v43, %v625_v44  ;;  %v613_v51 = vld [vmem:[#allocation5 + $0x1050] sm:$0xff]  ;;  %v8634_v63 = vcombine.low %v621_v43, %v625_v44  ;;  %v8762_v0 = vcombine.low %v749_v19, %v753_v46  ;;  %v8755_v2 = vcombine.high %v741_v57, %v745_v62 }
 0x2cb   :  { %v9643_v42 = vadd.f32 %v6902_v56, %v6862_v11  ;;  %7156 = vmatpush1.bf16.msra.mxu0 %v8666_v45  ;;  %v8627_v1 = vcombine.high %v613_v51, %v617_v52  ;;  %v605_v45 = vld [vmem:[#allocation5 + $0x1010] sm:$0xff]  ;;  %v8626_v11 = vcombine.low %v613_v51, %v617_v52  ;;  %v8754_v56 = vcombine.low %v741_v57, %v745_v62 }
 0x2cc   :  { %v6904_v21 = vpop.f32.mrf.mxu1  ;;  %v6864_v25 = vpop.f32.mrf.mxu0  ;;  %7157 = vmatprep.subr.bf16.mxu0 %v8659_v6  ;;  %v737_v6 = vld [vmem:[#allocation5 + $0x1430] sm:$0xff]  ;;  %v8866_v35 = vcombine.low %v853_v39, %v857_v14 }
 0x2cd   :  { %7197 = vmatpush1.bf16.msra.mxu1 %v8794_v5  ;;  %v733_v5 = vld [vmem:[#allocation5 + $0x1410] sm:$0xff]  ;;  %v8618_v21 = vcombine.low %v605_v45, %v609_v3 }
 0x2ce   :  { %v6905_v26 = vpop.f32.mrf.mxu1  ;;  %7198 = vmatprep.subr.bf16.mxu1 %v8787_v12  ;;  %v8619_v12 = vcombine.high %v605_v45, %v609_v3  ;;  %v8747_v10 = vcombine.high %v733_v5, %v737_v6  ;;  %v729_v60 = vld [vmem:[#allocation5 + $0x13f0] sm:$0xff] }
 0x2cf   :  { %7158 = vmatpush1.bf16.msra.mxu0 %v8658_v23  ;;  %v8746_v23 = vcombine.low %v733_v5, %v737_v6  ;;  %v8739_v25 = vcombine.high %v725_v13, %v729_v60  ;;  %v721_v26 = vld [vmem:[#allocation5 + $0x13b0] sm:$0xff]  ;;  %v8738_v31 = vcombine.low %v725_v13, %v729_v60 }
 0x2d0   :  { %7159 = vmatprep.subr.bf16.mxu0 %v8651_v53  ;;  %v717_v53 = vld [vmem:[#allocation5 + $0x1390] sm:$0xff] }
 0x2d1   :  { %7199 = vmatpush1.bf16.msra.mxu1 %v8786_v7  ;;  %v8867_v7 = vcombine.high %v853_v39, %v857_v14  ;;  %v849_v17 = vld [vmem:[#allocation5 + $0x17b0] sm:$0xff]  ;;  %v8731_v24 = vcombine.high %v717_v53, %v721_v26  ;;  %v8730_v44 = vcombine.low %v717_v53, %v721_v26 }
 0x2d2   :  { %7200 = vmatprep.subr.bf16.mxu1 %v8779_v30  ;;  %v845_v30 = vld [vmem:[#allocation5 + $0x1790] sm:$0xff] }
 0x2d3   :  { %7160 = vmatpush1.bf16.msra.mxu0 %v8650_v37  ;;  %v8859_v37 = vcombine.high %v845_v30, %v849_v17  ;;  %v841_v43 = vld [vmem:[#allocation5 + $0x1770] sm:$0xff]  ;;  %v8858_v19 = vcombine.low %v845_v30, %v849_v17 }
 0x2d4   :  { %7161 = vmatprep.subr.bf16.mxu0 %v8643_v41  ;;  %v713_v41 = vld [vmem:[#allocation5 + $0x1370] sm:$0xff] }
 0x2d5   :  { %7201 = vmatpush1.bf16.msra.mxu1 %v8778_v38  ;;  %v709_v38 = vld [vmem:[#allocation5 + $0x1350] sm:$0xff] }
 0x2d6   :  { %7202 = vmatprep.subr.bf16.mxu1 %v8771_v28  ;;  %v837_v28 = vld [vmem:[#allocation5 + $0x1750] sm:$0xff]  ;;  %v8723_v46 = vcombine.high %v709_v38, %v713_v41  ;;  %v8722_v52 = vcombine.low %v709_v38, %v713_v41 }
 0x2d7   :  { %7162 = vmatpush1.bf16.msra.mxu0 %v8642_v54  ;;  %v8851_v54 = vcombine.high %v837_v28, %v841_v43  ;;  %v833_v51 = vld [vmem:[#allocation5 + $0x1730] sm:$0xff]  ;;  %v8850_v57 = vcombine.low %v837_v28, %v841_v43 }
 0x2d8   :  { %7163 = vmatprep.subr.bf16.mxu0 %v8635_v22  ;;  %v705_v22 = vld [vmem:[#allocation5 + $0x1330] sm:$0xff] }
 0x2d9   :  { %7203 = vmatpush1.bf16.msra.mxu1 %v8770_v48  ;;  %v701_v48 = vld [vmem:[#allocation5 + $0x1310] sm:$0xff] }
 0x2da   :  { %7204 = vmatprep.subr.bf16.mxu1 %v8763_v50  ;;  %v829_v50 = vld [vmem:[#allocation5 + $0x1710] sm:$0xff]  ;;  %v8715_v62 = vcombine.high %v701_v48, %v705_v22  ;;  %v8714_v3 = vcombine.low %v701_v48, %v705_v22 }
 0x2db   :  { %7164 = vmatpush1.bf16.msra.mxu0 %v8634_v63  ;;  %v8843_v63 = vcombine.high %v829_v50, %v833_v51  ;;  %v825_v45 = vld [vmem:[#allocation5 + $0x16f0] sm:$0xff]  ;;  %v8842_v5 = vcombine.low %v829_v50, %v833_v51 }
 0x2dc   :  { %7165 = vmatprep.subr.bf16.mxu0 %v8627_v1  ;;  %v697_v1 = vld [vmem:[#allocation5 + $0x12f0] sm:$0xff] }
 0x2dd   :  { %7205 = vmatpush1.bf16.msra.mxu1 %v8762_v0  ;;  %v693_v0 = vld [vmem:[#allocation5 + $0x12d0] sm:$0xff] }
 0x2de   :  { %7206 = vmatprep.subr.bf16.mxu1 %v8755_v2  ;;  %v821_v2 = vld [vmem:[#allocation5 + $0x16d0] sm:$0xff]  ;;  %v8707_v6 = vcombine.high %v693_v0, %v697_v1  ;;  %v8706_v60 = vcombine.low %v693_v0, %v697_v1 }
 0x2df   :  { %7166 = vmatpush1.bf16.msra.mxu0 %v8626_v11  ;;  %v8835_v11 = vcombine.high %v821_v2, %v825_v45  ;;  %v817_v13 = vld [vmem:[#allocation5 + $0x16b0] sm:$0xff]  ;;  %v8834_v39 = vcombine.low %v821_v2, %v825_v45 }
 0x2e0   :  { %7167 = vmatprep.subr.bf16.mxu0 %v8619_v12  ;;  %v689_v12 = vld [vmem:[#allocation5 + $0x12b0] sm:$0xff] }
 0x2e1   :  { %7207 = vmatpush1.bf16.msra.mxu1 %v8754_v56  ;;  %v685_v56 = vld [vmem:[#allocation5 + $0x1290] sm:$0xff] }
 0x2e2   :  { %7208 = vmatprep.subr.bf16.mxu1 %v8747_v10  ;;  %v813_v10 = vld [vmem:[#allocation5 + $0x1690] sm:$0xff]  ;;  %v8699_v14 = vcombine.high %v685_v56, %v689_v12  ;;  %v8698_v26 = vcombine.low %v685_v56, %v689_v12 }
 0x2e3   :  { %7168 = vmatpush1.bf16.msra.mxu0 %v8618_v21  ;;  %v8827_v21 = vcombine.high %v813_v10, %v817_v13  ;;  %v809_v53 = vld [vmem:[#allocation5 + $0x1670] sm:$0xff]  ;;  %v8826_v30 = vcombine.low %v813_v10, %v817_v13 }
 0x2e4   :  { %7169 = vmatprep.subr.bf16.mxu0 %v8739_v25  ;;  %v681_v25 = vld [vmem:[#allocation5 + $0x1270] sm:$0xff] }
 0x2e5   :  { %7209 = vmatpush1.bf16.msra.mxu1 %v8746_v23  ;;  %v677_v23 = vld [vmem:[#allocation5 + $0x1250] sm:$0xff] }
 0x2e6   :  { %7210 = vmatprep.subr.bf16.mxu1 %v8867_v7  ;;  %v805_v7 = vld [vmem:[#allocation5 + $0x1650] sm:$0xff]  ;;  %v8691_v17 = vcombine.high %v677_v23, %v681_v25  ;;  %v8690_v41 = vcombine.low %v677_v23, %v681_v25 }
 0x2e7   :  { %7170 = vmatpush2.bf16.msra.mxu0 %v8738_v31  ;;  %v8819_v31 = vcombine.high %v805_v7, %v809_v53  ;;  %v801_v38 = vld [vmem:[#allocation5 + $0x1630] sm:$0xff]  ;;  %v8818_v28 = vcombine.low %v805_v7, %v809_v53 }
 0x2e8   :  { %7171 = vmatprep.subr.bf16.mxu0 %v8731_v24  ;;  %v673_v24 = vld [vmem:[#allocation5 + $0x1230] sm:$0xff] }
 0x2e9   :  { %7211 = vmatpush2.bf16.msra.mxu1 %v8866_v35  ;;  %v669_v35 = vld [vmem:[#allocation5 + $0x1210] sm:$0xff] }
 0x2ea   :  { %7212 = vmatprep.subr.bf16.mxu1 %v8859_v37  ;;  %v797_v37 = vld [vmem:[#allocation5 + $0x1610] sm:$0xff]  ;;  %v8683_v43 = vcombine.high %v669_v35, %v673_v24  ;;  %v8682_v22 = vcombine.low %v669_v35, %v673_v24 }
 0x2eb   :  { %7172 = vmatpush2.bf16.msra.mxu0 %v8730_v44  ;;  %v8811_v44 = vcombine.high %v797_v37, %v801_v38  ;;  %v1049_v48 = vld [vmem:[#allocation5 + $0x1df0] sm:$0xff]  ;;  %v8810_v50 = vcombine.low %v797_v37, %v801_v38 }
 0x2ec   :  { %7173 = vmatprep.subr.bf16.mxu0 %v8723_v46  ;;  %v921_v46 = vld [vmem:[#allocation5 + $0x19f0] sm:$0xff] }
 0x2ed   :  { %7213 = vmatpush2.bf16.msra.mxu1 %v8858_v19  ;;  %v917_v19 = vld [vmem:[#allocation5 + $0x19d0] sm:$0xff] }
 0x2ee   :  { %7214 = vmatprep.subr.bf16.mxu1 %v8851_v54  ;;  %v1045_v54 = vld [vmem:[#allocation5 + $0x1dd0] sm:$0xff]  ;;  %v8931_v51 = vcombine.high %v917_v19, %v921_v46  ;;  %v8930_v1 = vcombine.low %v917_v19, %v921_v46 }
 0x2ef   :  { %7174 = vmatpush2.bf16.msra.mxu0 %v8722_v52  ;;  %v9059_v52 = vcombine.high %v1045_v54, %v1049_v48  ;;  %v1041_v0 = vld [vmem:[#allocation5 + $0x1db0] sm:$0xff]  ;;  %v9058_v2 = vcombine.low %v1045_v54, %v1049_v48 }
 0x2f0   :  { %7175 = vmatprep.subr.bf16.mxu0 %v8715_v62  ;;  %v913_v62 = vld [vmem:[#allocation5 + $0x19b0] sm:$0xff] }
 0x2f1   :  { %7215 = vmatpush2.bf16.msra.mxu1 %v8850_v57  ;;  %v909_v57 = vld [vmem:[#allocation5 + $0x1990] sm:$0xff] }
 0x2f2   :  { %7216 = vmatprep.subr.bf16.mxu1 %v8843_v63  ;;  %v1037_v63 = vld [vmem:[#allocation5 + $0x1d90] sm:$0xff]  ;;  %v8923_v45 = vcombine.high %v909_v57, %v913_v62 }
 0x2f3   :  { %7176 = vmatpush2.bf16.msra.mxu0 %v8714_v3  ;;  %v9051_v3 = vcombine.high %v1037_v63, %v1041_v0  ;;  %v1029_v56 = vld [vmem:[#allocation5 + $0x1d50] sm:$0xff] }
 0x2f4   :  { %7177 = vmatprep.subr.bf16.mxu0 %v8707_v6  ;;  %v905_v6 = vld [vmem:[#allocation5 + $0x1970] sm:$0xff] }
 0x2f5   :  { %7217 = vmatpush2.bf16.msra.mxu1 %v8842_v5  ;;  %v901_v5 = vld [vmem:[#allocation5 + $0x1950] sm:$0xff] }
 0x2f6   :  { %7218 = vmatprep.subr.bf16.mxu1 %v8835_v11  ;;  %v1033_v12 = vld [vmem:[#allocation5 + $0x1d70] sm:$0xff]  ;;  %v8914_v37 = vcombine.low %v901_v5, %v905_v6 }
 0x2f7   :  { %7178 = vmatpush2.bf16.msra.mxu0 %v8706_v60  ;;  %v8922_v60 = vcombine.low %v909_v57, %v913_v62  ;;  %v9043_v53 = vcombine.high %v1029_v56, %v1033_v12  ;;  %v889_v19 = vld [vmem:[#allocation5 + $0x18f0] sm:$0xff] }
 0x2f8   :  { %7179 = vmatprep.subr.bf16.mxu0 %v8699_v14  ;;  %v9050_v14 = vcombine.low %v1037_v63, %v1041_v0  ;;  %v1013_v46 = vld [vmem:[#allocation5 + $0x1cd0] sm:$0xff] }
 0x2f9   :  { %7219 = vmatpush2.bf16.msra.mxu1 %v8834_v39  ;;  %v1017_v54 = vld [vmem:[#allocation5 + $0x1cf0] sm:$0xff] }
 0x2fa   :  { %7220 = vmatprep.subr.bf16.mxu1 %v8827_v21  ;;  %v8915_v21 = vcombine.high %v901_v5, %v905_v6  ;;  %v881_v57 = vld [vmem:[#allocation5 + $0x18b0] sm:$0xff] }
 0x2fb   :  { %7180 = vmatpush2.bf16.msra.mxu0 %v8698_v26  ;;  %v893_v26 = vld [vmem:[#allocation5 + $0x1910] sm:$0xff] }
 0x2fc   :  { %7181 = vmatprep.subr.bf16.mxu0 %v8691_v17  ;;  %v1021_v17 = vld [vmem:[#allocation5 + $0x1d10] sm:$0xff] }
 0x2fd   :  { %7221 = vmatpush2.bf16.msra.mxu1 %v8826_v30  ;;  %v897_v30 = vld [vmem:[#allocation5 + $0x1930] sm:$0xff] }
 0x2fe   :  { %7222 = vmatprep.subr.bf16.mxu1 %v8819_v31  ;;  %v1025_v31 = vld [vmem:[#allocation5 + $0x1d30] sm:$0xff]  ;;  %v8906_v48 = vcombine.low %v893_v26, %v897_v30 }
 0x2ff   :  { %7182 = vmatpush2.bf16.msra.mxu0 %v8690_v41  ;;  %v8907_v41 = vcombine.high %v893_v26, %v897_v30  ;;  %v1005_v62 = vld [vmem:[#allocation5 + $0x1c90] sm:$0xff] }
 0x300   :  { %7183 = vmatprep.subr.bf16.mxu0 %v8683_v43  ;;  %v9035_v43 = vcombine.high %v1021_v17, %v1025_v31  ;;  %v1009_v63 = vld [vmem:[#allocation5 + $0x1cb0] sm:$0xff] }
 0x301   :  { %7223 = vmatpush2.bf16.msra.mxu1 %v8818_v28  ;;  %v873_v5 = vld [vmem:[#allocation5 + $0x1870] sm:$0xff] }
 0x302   :  { %7224 = vmatprep.subr.bf16.mxu1 %v8811_v44  ;;  %v885_v44 = vld [vmem:[#allocation5 + $0x18d0] sm:$0xff] }
 0x303   :  { %7184 = vmatpush2.bf16.msra.mxu0 %v8682_v22  ;;  %v9034_v22 = vcombine.low %v1021_v17, %v1025_v31  ;;  %v8898_v0 = vcombine.low %v885_v44, %v889_v19  ;;  %v997_v6 = vld [vmem:[#allocation5 + $0x1c50] sm:$0xff] }
 0x304   :  { %7235 = vmatprep.subr.bf16.mxu0 %v8931_v51  ;;  %v9027_v51 = vcombine.high %v1013_v46, %v1017_v54  ;;  %v981_v30 = vld [vmem:[#allocation5 + $0x1bd0] sm:$0xff] }
 0x305   :  { %7225 = vmatpush2.bf16.msra.mxu1 %v8810_v50  ;;  %v8899_v50 = vcombine.high %v885_v44, %v889_v19  ;;  %v1109_v17 = vld [vmem:[#allocation5 + $0x1fd0] sm:$0xff] }
 0x306   :  { %7276 = vmatprep.subr.bf16.mxu1 %v9059_v52  ;;  %v6941_v11 = vpop.f32.mrf.mxu0  ;;  %7186 = vmatmul.mubr.bf16.vlgmr.msra.gmra.mxu0 %v9543_v4  ;;  %v877_v52 = vld [vmem:[#allocation5 + $0x1890] sm:$0xff] }
 0x307   :  { %v6942_v10 = vadd.f32 %v6941_v11, %v9638_v9  ;;  %7236 = vmatpush1.bf16.msra.mxu0 %v8930_v1  ;;  %7267 = vmatprep.mubr.bf16.mxu0 %v9555_v15  ;;  %v9026_v1 = vcombine.low %v1013_v46, %v1017_v54  ;;  %v1001_v11 = vld [vmem:[#allocation5 + $0x1c70] sm:$0xff] }
 0x308   :  { %v6982_v13 = vpop.f32.mrf.mxu1  ;;  %7227 = vmatmul.mubr.bf16.vlgmr.msra.gmra.mxu1 %v9549_v8  ;;  %v6943_v39 = vpop.f32.mrf.mxu0  ;;  %7237 = vmatprep.subr.bf16.mxu0 %v8923_v45  ;;  %v9019_v45 = vcombine.high %v1005_v62, %v1009_v63  ;;  %v1113_v31 = vld [vmem:[#allocation5 + $0x1ff0] sm:$0xff] }
 0x309   :  { %7277 = vmatpush1.bf16.msra.mxu1 %v9058_v2  ;;  %v9648_v23 = vadd.f32 %v6982_v13, %v6942_v10  ;;  %v6944_v25 = vadd.f32 %v6943_v39, %v9643_v42  ;;  %7308 = vmatprep.mubr.bf16.mxu1 %v9560_v18  ;;  %v9042_v42 = vcombine.low %v1029_v56, %v1033_v12  ;;  %v865_v39 = vld [vmem:[#allocation5 + $0x1830] sm:$0xff] }
 0x30a   :  { %v6984_v7 = vpop.f32.mrf.mxu1  ;;  %7278 = vmatprep.subr.bf16.mxu1 %v9051_v3  ;;  %v6945_v9 = vpop.f32.mrf.mxu0  ;;  %v8891_v2 = vcombine.high %v877_v52, %v881_v57  ;;  %v869_v3 = vld [vmem:[#allocation5 + $0x1850] sm:$0xff]  ;;  %v8890_v56 = vcombine.low %v877_v52, %v881_v57  ;;  %v9018_v12 = vcombine.low %v1005_v62, %v1009_v63  ;;  %v9011_v13 = vcombine.high %v997_v6, %v1001_v11 }
 0x30b   :  { %v9653_v35 = vadd.f32 %v6984_v7, %v6944_v25  ;;  %7238 = vmatpush1.bf16.msra.mxu0 %v8922_v60  ;;  %v8883_v10 = vcombine.high %v869_v3, %v873_v5  ;;  %v861_v60 = vld [vmem:[#allocation5 + $0x1810] sm:$0xff]  ;;  %v8882_v25 = vcombine.low %v869_v3, %v873_v5  ;;  %v9010_v7 = vcombine.low %v997_v6, %v1001_v11 }
 0x30c   :  { %v6986_v24 = vpop.f32.mrf.mxu1  ;;  %v6946_v38 = vpop.f32.mrf.mxu0  ;;  %7239 = vmatprep.subr.bf16.mxu0 %v8915_v21  ;;  %v993_v21 = vld [vmem:[#allocation5 + $0x1c30] sm:$0xff]  ;;  %v9122_v46 = vcombine.low %v1109_v17, %v1113_v31 }
 0x30d   :  { %7279 = vmatpush1.bf16.msra.mxu1 %v9050_v14  ;;  %v989_v14 = vld [vmem:[#allocation5 + $0x1c10] sm:$0xff]  ;;  %v8874_v24 = vcombine.low %v861_v60, %v865_v39 }
 0x30e   :  { %v6987_v28 = vpop.f32.mrf.mxu1  ;;  %7280 = vmatprep.subr.bf16.mxu1 %v9043_v53  ;;  %v8875_v53 = vcombine.high %v861_v60, %v865_v39  ;;  %v9003_v26 = vcombine.high %v989_v14, %v993_v21  ;;  %v985_v9 = vld [vmem:[#allocation5 + $0x1bf0] sm:$0xff] }
 0x30f   :  { %7240 = vmatpush1.bf16.msra.mxu0 %v8914_v37  ;;  %v9002_v37 = vcombine.low %v989_v14, %v993_v21  ;;  %v8995_v38 = vcombine.high %v981_v30, %v985_v9  ;;  %v977_v28 = vld [vmem:[#allocation5 + $0x1bb0] sm:$0xff]  ;;  %v8994_v19 = vcombine.low %v981_v30, %v985_v9 }
 0x310   :  { %7241 = vmatprep.subr.bf16.mxu0 %v8907_v41  ;;  %v973_v41 = vld [vmem:[#allocation5 + $0x1b90] sm:$0xff] }
 0x311   :  { %7281 = vmatpush1.bf16.msra.mxu1 %v9042_v42  ;;  %v9123_v42 = vcombine.high %v1109_v17, %v1113_v31  ;;  %v1105_v44 = vld [vmem:[#allocation5 + $0x1fb0] sm:$0xff]  ;;  %v8987_v54 = vcombine.high %v973_v41, %v977_v28  ;;  %v8986_v57 = vcombine.low %v973_v41, %v977_v28 }
 0x312   :  { %7282 = vmatprep.subr.bf16.mxu1 %v9035_v43  ;;  %v1101_v43 = vld [vmem:[#allocation5 + $0x1f90] sm:$0xff] }
 0x313   :  { %7242 = vmatpush1.bf16.msra.mxu0 %v8906_v48  ;;  %v9115_v48 = vcombine.high %v1101_v43, %v1105_v44  ;;  %v1097_v52 = vld [vmem:[#allocation5 + $0x1f70] sm:$0xff]  ;;  %v9114_v62 = vcombine.low %v1101_v43, %v1105_v44 }
 0x314   :  { %7243 = vmatprep.subr.bf16.mxu0 %v8899_v50  ;;  %v969_v50 = vld [vmem:[#allocation5 + $0x1b70] sm:$0xff] }
 0x315   :  { %7283 = vmatpush1.bf16.msra.mxu1 %v9034_v22  ;;  %v965_v22 = vld [vmem:[#allocation5 + $0x1b50] sm:$0xff] }
 0x316   :  { %7284 = vmatprep.subr.bf16.mxu1 %v9027_v51  ;;  %v1093_v51 = vld [vmem:[#allocation5 + $0x1f50] sm:$0xff]  ;;  %v8979_v63 = vcombine.high %v965_v22, %v969_v50  ;;  %v8978_v5 = vcombine.low %v965_v22, %v969_v50 }
 0x317   :  { %7244 = vmatpush1.bf16.msra.mxu0 %v8898_v0  ;;  %v9107_v0 = vcombine.high %v1093_v51, %v1097_v52  ;;  %v1089_v3 = vld [vmem:[#allocation5 + $0x1f30] sm:$0xff]  ;;  %v9106_v6 = vcombine.low %v1093_v51, %v1097_v52 }
 0x318   :  { %7245 = vmatprep.subr.bf16.mxu0 %v8891_v2  ;;  %v961_v2 = vld [vmem:[#allocation5 + $0x1b30] sm:$0xff] }
 0x319   :  { %7285 = vmatpush1.bf16.msra.mxu1 %v9026_v1  ;;  %v957_v1 = vld [vmem:[#allocation5 + $0x1b10] sm:$0xff] }
 0x31a   :  { %7286 = vmatprep.subr.bf16.mxu1 %v9019_v45  ;;  %v1085_v45 = vld [vmem:[#allocation5 + $0x1f10] sm:$0xff]  ;;  %v8971_v11 = vcombine.high %v957_v1, %v961_v2  ;;  %v8970_v39 = vcombine.low %v957_v1, %v961_v2  ;;  %v282_v1 = vld [vmem:[#allocation5 + $0x5f8] sm:$0xff] }
 0x31b   :  { %7246 = vmatpush1.bf16.msra.mxu0 %v8890_v56  ;;  %v9099_v56 = vcombine.high %v1085_v45, %v1089_v3  ;;  %v1081_v60 = vld [vmem:[#allocation5 + $0x1ef0] sm:$0xff]  ;;  %v9098_v14 = vcombine.low %v1085_v45, %v1089_v3  ;;  %v1135_v45 = vsub.s32 4, %v9565_v32 }
 0x31c   :  { %7247 = vmatprep.subr.bf16.mxu0 %v8883_v10  ;;  %v953_v10 = vld [vmem:[#allocation5 + $0x1af0] sm:$0xff] }
 0x31d   :  { %7287 = vmatpush1.bf16.msra.mxu1 %v9018_v12  ;;  %v949_v12 = vld [vmem:[#allocation5 + $0x1ad0] sm:$0xff] }
 0x31e   :  { %7288 = vmatprep.subr.bf16.mxu1 %v9011_v13  ;;  %v1077_v13 = vld [vmem:[#allocation5 + $0x1ed0] sm:$0xff]  ;;  %v8963_v21 = vcombine.high %v949_v12, %v953_v10  ;;  %v8962_v9 = vcombine.low %v949_v12, %v953_v10  ;;  %v146_v12 = vld [vmem:[#allocation5 + $0x1b8] sm:$0xff] }
 0x31f   :  { %7248 = vmatpush1.bf16.msra.mxu0 %v8882_v25  ;;  %v9091_v25 = vcombine.high %v1077_v13, %v1081_v60  ;;  %v1073_v30 = vld [vmem:[#allocation5 + $0x1eb0] sm:$0xff]  ;;  %v9090_v17 = vcombine.low %v1077_v13, %v1081_v60  ;;  %v270_v10 = vld [vmem:[#allocation5 + $0x598] sm:$0xff]  ;;  %v9294_v60 = vld [vmem:[#allocation7] sm:$0xff] }
 0x320   :  { %7249 = vmatprep.subr.bf16.mxu0 %v8875_v53  ;;  %v945_v53 = vld [vmem:[#allocation5 + $0x1ab0] sm:$0xff]  ;;  %v274_v13 = vld [vmem:[#allocation5 + $0x5b8] sm:$0xff] }
 0x321   :  { %7289 = vmatpush1.bf16.msra.mxu1 %v9010_v7  ;;  %v941_v7 = vld [vmem:[#allocation5 + $0x1a90] sm:$0xff] }
 0x322   :  { %7290 = vmatprep.subr.bf16.mxu1 %v9003_v26  ;;  %v1069_v26 = vld [vmem:[#allocation5 + $0x1e90] sm:$0xff]  ;;  %v8955_v31 = vcombine.high %v941_v7, %v945_v53  ;;  %v8954_v28 = vcombine.low %v941_v7, %v945_v53  ;;  %v8285_v53 = vcombine.high %v270_v10, %v274_v13 }
 0x323   :  { %7250 = vmatpush1.bf16.msra.mxu0 %v8874_v24  ;;  %v9083_v24 = vcombine.high %v1069_v26, %v1073_v30  ;;  %v1065_v41 = vld [vmem:[#allocation5 + $0x1e70] sm:$0xff]  ;;  %v9082_v43 = vcombine.low %v1069_v26, %v1073_v30  ;;  %v134_v26 = vld [vmem:[#allocation5 + $0x158] sm:$0xff] }
 0x324   :  { %7251 = vmatprep.subr.bf16.mxu0 %v8995_v38  ;;  %v937_v38 = vld [vmem:[#allocation5 + $0x1a70] sm:$0xff]  ;;  %v138_v30 = vld [vmem:[#allocation5 + $0x178] sm:$0xff] }
 0x325   :  { %7291 = vmatpush1.bf16.msra.mxu1 %v9002_v37  ;;  %v933_v37 = vld [vmem:[#allocation5 + $0x1a50] sm:$0xff] }
 0x326   :  { %7292 = vmatprep.subr.bf16.mxu1 %v9123_v42  ;;  %v1061_v42 = vld [vmem:[#allocation5 + $0x1e50] sm:$0xff]  ;;  %v8947_v44 = vcombine.high %v933_v37, %v937_v38  ;;  %v8946_v50 = vcombine.low %v933_v37, %v937_v38 }
 0x327   :  { %7252 = vmatpush2.bf16.msra.mxu0 %v8994_v19  ;;  %v9075_v19 = vcombine.high %v1061_v42, %v1065_v41  ;;  %v1057_v22 = vld [vmem:[#allocation5 + $0x1e30] sm:$0xff]  ;;  %v9074_v51 = vcombine.low %v1061_v42, %v1065_v41  ;;  %v8284_v41 = vcombine.low %v270_v10, %v274_v13  ;;  %v110_v10 = vld [vmem:[#allocation5 + $0x98] sm:$0xff] }
 0x328   :  { %7253 = vmatprep.subr.bf16.mxu0 %v8987_v54  ;;  %v929_v54 = vld [vmem:[#allocation5 + $0x1a30] sm:$0xff]  ;;  %v114_v13 = vld [vmem:[#allocation5 + $0xb8] sm:$0xff] }
 0x329   :  { %7293 = vmatpush2.bf16.msra.mxu1 %v9122_v46  ;;  %v925_v46 = vld [vmem:[#allocation5 + $0x1a10] sm:$0xff] }
 0x32a   :  { %7294 = vmatprep.subr.bf16.mxu1 %v9115_v48  ;;  %v1053_v48 = vld [vmem:[#allocation5 + $0x1e10] sm:$0xff]  ;;  %v8939_v52 = vcombine.high %v925_v46, %v929_v54  ;;  %v8938_v2 = vcombine.low %v925_v46, %v929_v54  ;;  %v126_v54 = vld [vmem:[#allocation5 + $0x118] sm:$0xff] }
 0x32b   :  { %7254 = vmatpush2.bf16.msra.mxu0 %v8986_v57  ;;  %v9067_v57 = vcombine.high %v1053_v48, %v1057_v22  ;;  %v9066_v3 = vcombine.low %v1053_v48, %v1057_v22  ;;  %v130_v48 = vld [vmem:[#allocation5 + $0x138] sm:$0xff] }
 0x32c   :  { %7255 = vmatprep.subr.bf16.mxu0 %v8979_v63  ;;  %v154_v63 = vld [vmem:[#allocation5 + $0x1f8] sm:$0xff] }
 0x32d   :  { %7295 = vmatpush2.bf16.msra.mxu1 %v9114_v62  ;;  %v150_v62 = vld [vmem:[#allocation5 + $0x1d8] sm:$0xff] }
 0x32e   :  { %7296 = vmatprep.subr.bf16.mxu1 %v9107_v0  ;;  %v278_v0 = vld [vmem:[#allocation5 + $0x5d8] sm:$0xff] }
 0x32f   :  { %7256 = vmatpush2.bf16.msra.mxu0 %v8978_v5  ;;  %v8165_v5 = vcombine.high %v150_v62, %v154_v63 }
 0x330   :  { %7257 = vmatprep.subr.bf16.mxu0 %v8971_v11  ;;  %v1139_v11 = vsub.s32 5, %v9565_v32 }
 0x331   :  { %7297 = vmatpush2.bf16.msra.mxu1 %v9106_v6  ;;  %v8293_v6 = vcombine.high %v278_v0, %v282_v1 }
 0x332   :  { %7298 = vmatprep.subr.bf16.mxu1 %v9099_v56  ;;  %v142_v56 = vld [vmem:[#allocation5 + $0x198] sm:$0xff]  ;;  %v1140_v7 = vrot.slane %v9294_v60, %v1139_v11  ;;  %v8140_v11 = vcombine.low %v126_v54, %v130_v48 }
 0x333   :  { %7258 = vmatpush2.bf16.msra.mxu0 %v8970_v39  ;;  %v1136_v39 = vrot.slane %v9294_v60, %v1135_v45  ;;  %v8156_v38 = vcombine.low %v142_v56, %v146_v12  ;;  %v238_v60 = vld [vmem:[#allocation5 + $0x498] sm:$0xff] }
 0x334   :  { %7259 = vmatprep.subr.bf16.mxu0 %v8963_v21  ;;  %v8292_v21 = vcombine.low %v278_v0, %v282_v1  ;;  %v8141_v1 = vcombine.high %v126_v54, %v130_v48  ;;  %v214_v48 = vld [vmem:[#allocation5 + $0x3d8] sm:$0xff] }
 0x335   :  { %7299 = vmatpush2.bf16.msra.mxu1 %v9098_v14  ;;  %v8164_v14 = vcombine.low %v150_v62, %v154_v63  ;;  %v8148_v62 = vcombine.low %v134_v26, %v138_v30 }
 0x336   :  { %7300 = vmatprep.subr.bf16.mxu1 %v9091_v25  ;;  %v8157_v25 = vcombine.high %v142_v56, %v146_v12 }
 0x337   :  { %7260 = vmatpush2.bf16.msra.mxu0 %v8962_v9 }
 0x338   :  { %7261 = vmatprep.subr.bf16.mxu0 %v8955_v31  ;;  %v266_v31 = vld [vmem:[#allocation5 + $0x578] sm:$0xff] }
 0x339   :  { %7301 = vmatpush2.bf16.msra.mxu1 %v9090_v17  ;;  %v262_v17 = vld [vmem:[#allocation5 + $0x558] sm:$0xff] }
 0x33a   :  { %7302 = vmatprep.subr.bf16.mxu1 %v9083_v24  ;;  %v8277_v46 = vcombine.high %v262_v17, %v266_v31  ;;  %v8276_v0 = vcombine.low %v262_v17, %v266_v31  ;;  %v8124_v17 = vcombine.low %v110_v10, %v114_v13 }
 0x33b   :  { %7262 = vmatpush2.bf16.msra.mxu0 %v8954_v28  ;;  %v8149_v28 = vcombine.high %v134_v26, %v138_v30  ;;  %v106_v26 = vld [vmem:[#allocation5 + $0x78] sm:$0xff] }
 0x33c   :  { %7263 = vmatprep.subr.bf16.mxu0 %v8947_v44  ;;  %v230_v30 = vld [vmem:[#allocation5 + $0x458] sm:$0xff] }
 0x33d   :  { %7303 = vmatpush2.bf16.msra.mxu1 %v9082_v43 }
 0x33e   :  { %7304 = vmatprep.subr.bf16.mxu1 %v9075_v19 }
 0x33f   :  { %7264 = vmatpush2.bf16.msra.mxu0 %v8946_v50  ;;  %v254_v50 = vld [vmem:[#allocation5 + $0x518] sm:$0xff] }
 0x340   :  { %7265 = vmatprep.subr.bf16.mxu0 %v8939_v52 }
 0x341   :  { %7305 = vmatpush2.bf16.msra.mxu1 %v9074_v51  ;;  %v258_v51 = vld [vmem:[#allocation5 + $0x538] sm:$0xff] }
 0x342   :  { %7306 = vmatprep.subr.bf16.mxu1 %v9067_v57  ;;  %v8269_v45 = vcombine.high %v254_v50, %v258_v51 }
 0x343   :  { %7266 = vmatpush2.bf16.msra.mxu0 %v8938_v2 }
 0x344   :  { %7317 = vmatprep.subr.bf16.mxu0 %v8165_v5  ;;  %v246_v5 = vld [vmem:[#allocation5 + $0x4d8] sm:$0xff] }
 0x345   :  { %7307 = vmatpush2.bf16.msra.mxu1 %v9066_v3  ;;  %v118_v3 = vld [vmem:[#allocation5 + $0xd8] sm:$0xff] }
 0x346   :  { %7358 = vmatprep.subr.bf16.mxu1 %v8293_v6  ;;  %v7023_v9 = vpop.f32.mrf.mxu0  ;;  %7268 = vmatmul.mubr.bf16.vlgmr.msra.gmra.mxu0 %v9571_v55  ;;  %v250_v6 = vld [vmem:[#allocation5 + $0x4f8] sm:$0xff] }
 0x347   :  { %v7024_v24 = vadd.f32 %v7023_v9, %v1136_v39  ;;  %7318 = vmatpush1.bf16.msra.mxu0 %v8164_v14  ;;  %7349 = vmatprep.mubr.bf16.mxu0 %v9485_v58  ;;  %v122_v58 = vld [vmem:[#allocation5 + $0xf8] sm:$0xff]  ;;  %v8261_v12 = vcombine.high %v246_v5, %v250_v6 }
 0x348   :  { %v7064_v37 = vpop.f32.mrf.mxu1  ;;  %7309 = vmatmul.mubr.bf16.vlgmr.msra.gmra.mxu1 %v9575_v61  ;;  %v7025_v42 = vpop.f32.mrf.mxu0  ;;  %7319 = vmatprep.subr.bf16.mxu0 %v8157_v25  ;;  %v8133_v56 = vcombine.high %v118_v3, %v122_v58  ;;  %v242_v39 = vld [vmem:[#allocation5 + $0x4b8] sm:$0xff]  ;;  %v8132_v14 = vcombine.low %v118_v3, %v122_v58  ;;  %v8125_v25 = vcombine.high %v110_v10, %v114_v13 }
 0x349   :  { %7359 = vmatpush1.bf16.msra.mxu1 %v8292_v21  ;;  %v9659_v43 = vadd.f32 %v7064_v37, %v7024_v24  ;;  %v7026_v44 = vadd.f32 %v7025_v42, %v1140_v7  ;;  %7390 = vmatprep.mubr.bf16.mxu1 %v9489_v59  ;;  %v8268_v59 = vcombine.low %v254_v50, %v258_v51  ;;  %v234_v9 = vld [vmem:[#allocation5 + $0x478] sm:$0xff] }
 0x34a   :  { %v7066_v19 = vpop.f32.mrf.mxu1  ;;  %7360 = vmatprep.subr.bf16.mxu1 %v8285_v53  ;;  %v7027_v22 = vpop.f32.mrf.mxu0  ;;  %v8260_v21 = vcombine.low %v246_v5, %v250_v6  ;;  %v8253_v7 = vcombine.high %v238_v60, %v242_v39  ;;  %v102_v53 = vld [vmem:[#allocation5 + $0x58] sm:$0xff]  ;;  %v8252_v31 = vcombine.low %v238_v60, %v242_v39  ;;  %v8245_v37 = vcombine.high %v230_v30, %v234_v9 }
 0x34b   :  { %v9663_v52 = vadd.f32 %v7066_v19, %v7026_v44  ;;  %7320 = vmatpush1.bf16.msra.mxu0 %v8156_v38  ;;  %v8117_v24 = vcombine.high %v102_v53, %v106_v26  ;;  %v94_v38 = vld [vmem:[#allocation5 + $0x18] sm:$0xff]  ;;  %v8116_v44 = vcombine.low %v102_v53, %v106_v26  ;;  %v8244_v19 = vcombine.low %v230_v30, %v234_v9 }
 0x34c   :  { %v7068_v57 = vpop.f32.mrf.mxu1  ;;  %v7028_v63 = vpop.f32.mrf.mxu0  ;;  %7321 = vmatprep.subr.bf16.mxu0 %v8149_v28  ;;  %v98_v42 = vld [vmem:[#allocation5 + $0x38] sm:$0xff] }
 0x34d   :  { %7361 = vmatpush1.bf16.msra.mxu1 %v8284_v41  ;;  %v222_v41 = vld [vmem:[#allocation5 + $0x418] sm:$0xff]  ;;  %v8108_v57 = vcombine.low %v94_v38, %v98_v42 }
 0x34e   :  { %v7069_v2 = vpop.f32.mrf.mxu1  ;;  %7362 = vmatprep.subr.bf16.mxu1 %v8277_v46  ;;  %v226_v28 = vld [vmem:[#allocation5 + $0x438] sm:$0xff]  ;;  %v8109_v46 = vcombine.high %v94_v38, %v98_v42 }
 0x34f   :  { %7322 = vmatpush1.bf16.msra.mxu0 %v8148_v62  ;;  %v8237_v54 = vcombine.high %v222_v41, %v226_v28  ;;  %v218_v22 = vld [vmem:[#allocation5 + $0x3f8] sm:$0xff]  ;;  %v8236_v62 = vcombine.low %v222_v41, %v226_v28 }
 0x350   :  { %7323 = vmatprep.subr.bf16.mxu0 %v8141_v1  ;;  %v342_v50 = vld [vmem:[#allocation5 + $0x7d8] sm:$0xff]  ;;  %v8229_v63 = vcombine.high %v214_v48, %v218_v22  ;;  %v8228_v58 = vcombine.low %v214_v48, %v218_v22 }
 0x351   :  { %7363 = vmatpush1.bf16.msra.mxu1 %v8276_v0  ;;  %v346_v51 = vld [vmem:[#allocation5 + $0x7f8] sm:$0xff] }
 0x352   :  { %7364 = vmatprep.subr.bf16.mxu1 %v8269_v45  ;;  %v8357_v0 = vcombine.high %v342_v50, %v346_v51  ;;  %v206_v1 = vld [vmem:[#allocation5 + $0x398] sm:$0xff]  ;;  %v8356_v5 = vcombine.low %v342_v50, %v346_v51 }
 0x353   :  { %7324 = vmatpush1.bf16.msra.mxu0 %v8140_v11  ;;  %v210_v2 = vld [vmem:[#allocation5 + $0x3b8] sm:$0xff] }
 0x354   :  { %7325 = vmatprep.subr.bf16.mxu0 %v8133_v56  ;;  %v334_v45 = vld [vmem:[#allocation5 + $0x798] sm:$0xff]  ;;  %v8221_v6 = vcombine.high %v206_v1, %v210_v2  ;;  %v8220_v13 = vcombine.low %v206_v1, %v210_v2 }
 0x355   :  { %7365 = vmatpush1.bf16.msra.mxu1 %v8268_v59  ;;  %v338_v3 = vld [vmem:[#allocation5 + $0x7b8] sm:$0xff] }
 0x356   :  { %7366 = vmatprep.subr.bf16.mxu1 %v8261_v12  ;;  %v8349_v11 = vcombine.high %v334_v45, %v338_v3  ;;  %v198_v59 = vld [vmem:[#allocation5 + $0x358] sm:$0xff]  ;;  %v8348_v60 = vcombine.low %v334_v45, %v338_v3 }
 0x357   :  { %7326 = vmatpush1.bf16.msra.mxu0 %v8132_v14  ;;  %v202_v56 = vld [vmem:[#allocation5 + $0x378] sm:$0xff] }
 0x358   :  { %7327 = vmatprep.subr.bf16.mxu0 %v8125_v25  ;;  %v326_v12 = vld [vmem:[#allocation5 + $0x758] sm:$0xff]  ;;  %v8213_v39 = vcombine.high %v198_v59, %v202_v56  ;;  %v8212_v26 = vcombine.low %v198_v59, %v202_v56 }
 0x359   :  { %7367 = vmatpush1.bf16.msra.mxu1 %v8260_v21  ;;  %v330_v10 = vld [vmem:[#allocation5 + $0x778] sm:$0xff] }
 0x35a   :  { %7368 = vmatprep.subr.bf16.mxu1 %v8253_v7  ;;  %v8341_v14 = vcombine.high %v326_v12, %v330_v10  ;;  %v190_v21 = vld [vmem:[#allocation5 + $0x318] sm:$0xff]  ;;  %v8340_v30 = vcombine.low %v326_v12, %v330_v10 }
 0x35b   :  { %7328 = vmatpush1.bf16.msra.mxu0 %v8124_v17  ;;  %v194_v25 = vld [vmem:[#allocation5 + $0x338] sm:$0xff] }
 0x35c   :  { %7329 = vmatprep.subr.bf16.mxu0 %v8117_v24  ;;  %v318_v7 = vld [vmem:[#allocation5 + $0x718] sm:$0xff]  ;;  %v8205_v9 = vcombine.high %v190_v21, %v194_v25  ;;  %v8204_v42 = vcombine.low %v190_v21, %v194_v25 }
 0x35d   :  { %7369 = vmatpush1.bf16.msra.mxu1 %v8252_v31  ;;  %v322_v53 = vld [vmem:[#allocation5 + $0x738] sm:$0xff] }
 0x35e   :  { %7370 = vmatprep.subr.bf16.mxu1 %v8245_v37  ;;  %v8333_v17 = vcombine.high %v318_v7, %v322_v53  ;;  %v182_v31 = vld [vmem:[#allocation5 + $0x2d8] sm:$0xff]  ;;  %v8332_v41 = vcombine.low %v318_v7, %v322_v53 }
 0x35f   :  { %7330 = vmatpush1.bf16.msra.mxu0 %v8116_v44  ;;  %v186_v24 = vld [vmem:[#allocation5 + $0x2f8] sm:$0xff] }
 0x360   :  { %7331 = vmatprep.subr.bf16.mxu0 %v8109_v46  ;;  %v310_v37 = vld [vmem:[#allocation5 + $0x6d8] sm:$0xff]  ;;  %v8197_v28 = vcombine.high %v182_v31, %v186_v24  ;;  %v8196_v22 = vcombine.low %v182_v31, %v186_v24 }
 0x361   :  { %7371 = vmatpush1.bf16.msra.mxu1 %v8244_v19  ;;  %v314_v38 = vld [vmem:[#allocation5 + $0x6f8] sm:$0xff] }
 0x362   :  { %7372 = vmatprep.subr.bf16.mxu1 %v8237_v54  ;;  %v8325_v44 = vcombine.high %v310_v37, %v314_v38  ;;  %v174_v19 = vld [vmem:[#allocation5 + $0x298] sm:$0xff]  ;;  %v8324_v50 = vcombine.low %v310_v37, %v314_v38 }
 0x363   :  { %7332 = vmatpush1.bf16.msra.mxu0 %v8108_v57  ;;  %v178_v46 = vld [vmem:[#allocation5 + $0x2b8] sm:$0xff] }
 0x364   :  { %7333 = vmatprep.subr.bf16.mxu0 %v8229_v63  ;;  %v302_v54 = vld [vmem:[#allocation5 + $0x698] sm:$0xff]  ;;  %v8189_v51 = vcombine.high %v174_v19, %v178_v46  ;;  %v8188_v2 = vcombine.low %v174_v19, %v178_v46 }
 0x365   :  { %7373 = vmatpush1.bf16.msra.mxu1 %v8236_v62  ;;  %v306_v48 = vld [vmem:[#allocation5 + $0x6b8] sm:$0xff] }
 0x366   :  { %7374 = vmatprep.subr.bf16.mxu1 %v8357_v0  ;;  %v8317_v57 = vcombine.high %v302_v54, %v306_v48  ;;  %v166_v62 = vld [vmem:[#allocation5 + $0x258] sm:$0xff]  ;;  %v8316_v45 = vcombine.low %v302_v54, %v306_v48 }
 0x367   :  { %7334 = vmatpush2.bf16.msra.mxu0 %v8228_v58  ;;  %v170_v63 = vld [vmem:[#allocation5 + $0x278] sm:$0xff] }
 0x368   :  { %7335 = vmatprep.subr.bf16.mxu0 %v8221_v6  ;;  %v294_v0 = vld [vmem:[#allocation5 + $0x658] sm:$0xff]  ;;  %v8181_v3 = vcombine.high %v166_v62, %v170_v63  ;;  %v8180_v56 = vcombine.low %v166_v62, %v170_v63 }
 0x369   :  { %7375 = vmatpush2.bf16.msra.mxu1 %v8356_v5  ;;  %v298_v1 = vld [vmem:[#allocation5 + $0x678] sm:$0xff] }
 0x36a   :  { %7376 = vmatprep.subr.bf16.mxu1 %v8349_v11  ;;  %v8309_v58 = vcombine.high %v294_v0, %v298_v1  ;;  %v158_v5 = vld [vmem:[#allocation5 + $0x218] sm:$0xff]  ;;  %v8308_v12 = vcombine.low %v294_v0, %v298_v1 }
 0x36b   :  { %7336 = vmatpush2.bf16.msra.mxu0 %v8220_v13  ;;  %v162_v6 = vld [vmem:[#allocation5 + $0x238] sm:$0xff] }
 0x36c   :  { %7337 = vmatprep.subr.bf16.mxu0 %v8213_v39  ;;  %v286_v11 = vld [vmem:[#allocation5 + $0x618] sm:$0xff]  ;;  %v8173_v10 = vcombine.high %v158_v5, %v162_v6  ;;  %v8172_v25 = vcombine.low %v158_v5, %v162_v6 }
 0x36d   :  { %7377 = vmatpush2.bf16.msra.mxu1 %v8348_v60  ;;  %v290_v59 = vld [vmem:[#allocation5 + $0x638] sm:$0xff] }
 0x36e   :  { %7378 = vmatprep.subr.bf16.mxu1 %v8341_v14  ;;  %v8301_v13 = vcombine.high %v286_v11, %v290_v59  ;;  %v406_v60 = vld [vmem:[#allocation5 + $0x9d8] sm:$0xff]  ;;  %v8300_v7 = vcombine.low %v286_v11, %v290_v59 }
 0x36f   :  { %7338 = vmatpush2.bf16.msra.mxu0 %v8212_v26  ;;  %v410_v39 = vld [vmem:[#allocation5 + $0x9f8] sm:$0xff] }
 0x370   :  { %7339 = vmatprep.subr.bf16.mxu0 %v8205_v9  ;;  %v534_v14 = vld [vmem:[#allocation5 + $0xdd8] sm:$0xff]  ;;  %v8421_v53 = vcombine.high %v406_v60, %v410_v39  ;;  %v8420_v24 = vcombine.low %v406_v60, %v410_v39 }
 0x371   :  { %7379 = vmatpush2.bf16.msra.mxu1 %v8340_v30  ;;  %v538_v21 = vld [vmem:[#allocation5 + $0xdf8] sm:$0xff] }
 0x372   :  { %7380 = vmatprep.subr.bf16.mxu1 %v8333_v17  ;;  %v8549_v26 = vcombine.high %v534_v14, %v538_v21  ;;  %v398_v30 = vld [vmem:[#allocation5 + $0x998] sm:$0xff]  ;;  %v8548_v37 = vcombine.low %v534_v14, %v538_v21 }
 0x373   :  { %7340 = vmatpush2.bf16.msra.mxu0 %v8204_v42  ;;  %v402_v9 = vld [vmem:[#allocation5 + $0x9b8] sm:$0xff] }
 0x374   :  { %7341 = vmatprep.subr.bf16.mxu0 %v8197_v28  ;;  %v526_v17 = vld [vmem:[#allocation5 + $0xd98] sm:$0xff]  ;;  %v8413_v38 = vcombine.high %v398_v30, %v402_v9 }
 0x375   :  { %7381 = vmatpush2.bf16.msra.mxu1 %v8332_v41  ;;  %v530_v31 = vld [vmem:[#allocation5 + $0xdb8] sm:$0xff] }
 0x376   :  { %7382 = vmatprep.subr.bf16.mxu1 %v8325_v44  ;;  %v8541_v42 = vcombine.high %v526_v17, %v530_v31  ;;  %v390_v41 = vld [vmem:[#allocation5 + $0x958] sm:$0xff] }
 0x377   :  { %7342 = vmatpush2.bf16.msra.mxu0 %v8196_v22  ;;  %v394_v28 = vld [vmem:[#allocation5 + $0x978] sm:$0xff]  ;;  %v8412_v22 = vcombine.low %v398_v30, %v402_v9 }
 0x378   :  { %7343 = vmatprep.subr.bf16.mxu0 %v8189_v51  ;;  %v518_v19 = vld [vmem:[#allocation5 + $0xd58] sm:$0xff]  ;;  %v8540_v51 = vcombine.low %v526_v17, %v530_v31  ;;  %v8404_v5 = vcombine.low %v390_v41, %v394_v28 }
 0x379   :  { %7383 = vmatpush2.bf16.msra.mxu1 %v8324_v50  ;;  %v522_v46 = vld [vmem:[#allocation5 + $0xd78] sm:$0xff] }
 0x37a   :  { %7384 = vmatprep.subr.bf16.mxu1 %v8317_v57  ;;  %v8405_v57 = vcombine.high %v390_v41, %v394_v28  ;;  %v382_v1 = vld [vmem:[#allocation5 + $0x918] sm:$0xff] }
 0x37b   :  { %7344 = vmatpush2.bf16.msra.mxu0 %v8188_v2  ;;  %v386_v2 = vld [vmem:[#allocation5 + $0x938] sm:$0xff] }
 0x37c   :  { %7345 = vmatprep.subr.bf16.mxu0 %v8181_v3  ;;  %v8397_v11 = vcombine.high %v382_v1, %v386_v2  ;;  %v8396_v60 = vcombine.low %v382_v1, %v386_v2  ;;  %v366_v21 = vld [vmem:[#allocation5 + $0x898] sm:$0xff] }
 0x37d   :  { %7385 = vmatpush2.bf16.msra.mxu1 %v8316_v45  ;;  %v514_v45 = vld [vmem:[#allocation5 + $0xd38] sm:$0xff] }
 0x37e   :  { %7386 = vmatprep.subr.bf16.mxu1 %v8309_v58  ;;  %v358_v31 = vld [vmem:[#allocation5 + $0x858] sm:$0xff] }
 0x37f   :  { %7346 = vmatpush2.bf16.msra.mxu0 %v8180_v56  ;;  %v602_v1 = vld [vmem:[#allocation5 + $0xff8] sm:$0xff] }
 0x380   :  { %7347 = vmatprep.subr.bf16.mxu0 %v8173_v10  ;;  %v502_v10 = vld [vmem:[#allocation5 + $0xcd8] sm:$0xff] }
 0x381   :  { %7387 = vmatpush2.bf16.msra.mxu1 %v8308_v12  ;;  %v374_v12 = vld [vmem:[#allocation5 + $0x8d8] sm:$0xff] }
 0x382   :  { %7388 = vmatprep.subr.bf16.mxu1 %v8301_v13  ;;  %v506_v13 = vld [vmem:[#allocation5 + $0xcf8] sm:$0xff] }
 0x383   :  { %7348 = vmatpush2.bf16.msra.mxu0 %v8172_v25  ;;  %v8517_v14 = vcombine.high %v502_v10, %v506_v13  ;;  %v370_v25 = vld [vmem:[#allocation5 + $0x8b8] sm:$0xff]  ;;  %v8516_v30 = vcombine.low %v502_v10, %v506_v13 }
 0x384   :  { %7399 = vmatprep.subr.bf16.mxu0 %v8421_v53  ;;  %v498_v53 = vld [vmem:[#allocation5 + $0xcb8] sm:$0xff]  ;;  %v8381_v9 = vcombine.high %v366_v21, %v370_v25 }
 0x385   :  { %7389 = vmatpush2.bf16.msra.mxu1 %v8300_v7  ;;  %v494_v7 = vld [vmem:[#allocation5 + $0xc98] sm:$0xff] }
 0x386   :  { %7440 = vmatprep.subr.bf16.mxu1 %v8549_v26  ;;  %v7105_v44 = vpop.f32.mrf.mxu0  ;;  %7350 = vmatmul.mubr.bf16.vlgmr.msra.gmra.mxu0 %v9495_v16  ;;  %v8533_v16 = vcombine.high %v518_v19, %v522_v46  ;;  %v8509_v17 = vcombine.high %v494_v7, %v498_v53  ;;  %v8508_v41 = vcombine.low %v494_v7, %v498_v53  ;;  %v458_v10 = vld [vmem:[#allocation5 + $0xb78] sm:$0xff] }
 0x387   :  { %v7106_v54 = vadd.f32 %v7105_v44, %v9659_v43  ;;  %7400 = vmatpush1.bf16.msra.mxu0 %v8420_v24  ;;  %7431 = vmatprep.mubr.bf16.mxu0 %v9507_v27  ;;  %v378_v27 = vld [vmem:[#allocation5 + $0x8f8] sm:$0xff] }
 0x388   :  { %v7146_v48 = vpop.f32.mrf.mxu1  ;;  %7391 = vmatmul.mubr.bf16.vlgmr.msra.gmra.mxu1 %v9501_v20  ;;  %v7107_v50 = vpop.f32.mrf.mxu0  ;;  %7401 = vmatprep.subr.bf16.mxu0 %v8413_v38  ;;  %v510_v20 = vld [vmem:[#allocation5 + $0xd18] sm:$0xff]  ;;  %v8389_v39 = vcombine.high %v374_v12, %v378_v27  ;;  %v8388_v26 = vcombine.low %v374_v12, %v378_v27 }
 0x389   :  { %7441 = vmatpush1.bf16.msra.mxu1 %v8548_v37  ;;  %v9668_v62 = vadd.f32 %v7146_v48, %v7106_v54  ;;  %v7108_v63 = vadd.f32 %v7107_v50, %v9663_v52  ;;  %7472 = vmatprep.mubr.bf16.mxu1 %v9512_v29  ;;  %v8532_v52 = vcombine.low %v518_v19, %v522_v46  ;;  %v362_v24 = vld [vmem:[#allocation5 + $0x878] sm:$0xff] }
 0x38a   :  { %v7148_v0 = vpop.f32.mrf.mxu1  ;;  %7442 = vmatprep.subr.bf16.mxu1 %v8541_v42  ;;  %v7109_v43 = vpop.f32.mrf.mxu0  ;;  %v8525_v56 = vcombine.high %v510_v20, %v514_v45  ;;  %v8524_v29 = vcombine.low %v510_v20, %v514_v45  ;;  %v486_v37 = vld [vmem:[#allocation5 + $0xc58] sm:$0xff]  ;;  %v8380_v42 = vcombine.low %v366_v21, %v370_v25  ;;  %v8373_v28 = vcombine.high %v358_v31, %v362_v24 }
 0x38b   :  { %v9673_v3 = vadd.f32 %v7148_v0, %v7108_v63  ;;  %7402 = vmatpush1.bf16.msra.mxu0 %v8412_v22  ;;  %v490_v38 = vld [vmem:[#allocation5 + $0xc78] sm:$0xff]  ;;  %v8372_v22 = vcombine.low %v358_v31, %v362_v24 }
 0x38c   :  { %v7150_v58 = vpop.f32.mrf.mxu1  ;;  %v7110_v6 = vpop.f32.mrf.mxu0  ;;  %7403 = vmatprep.subr.bf16.mxu0 %v8405_v57  ;;  %v8501_v44 = vcombine.high %v486_v37, %v490_v38  ;;  %v350_v19 = vld [vmem:[#allocation5 + $0x818] sm:$0xff]  ;;  %v8500_v50 = vcombine.low %v486_v37, %v490_v38 }
 0x38d   :  { %7443 = vmatpush1.bf16.msra.mxu1 %v8540_v51  ;;  %v354_v46 = vld [vmem:[#allocation5 + $0x838] sm:$0xff] }
 0x38e   :  { %v7151_v59 = vpop.f32.mrf.mxu1  ;;  %7444 = vmatprep.subr.bf16.mxu1 %v8533_v16  ;;  %v478_v54 = vld [vmem:[#allocation5 + $0xc18] sm:$0xff]  ;;  %v8365_v51 = vcombine.high %v350_v19, %v354_v46  ;;  %v8364_v2 = vcombine.low %v350_v19, %v354_v46 }
 0x38f   :  { %7404 = vmatpush1.bf16.msra.mxu0 %v8404_v5  ;;  %v482_v48 = vld [vmem:[#allocation5 + $0xc38] sm:$0xff] }
 0x390   :  { %7405 = vmatprep.subr.bf16.mxu0 %v8397_v11  ;;  %v8493_v57 = vcombine.high %v478_v54, %v482_v48  ;;  %v470_v63 = vld [vmem:[#allocation5 + $0xbd8] sm:$0xff]  ;;  %v8492_v43 = vcombine.low %v478_v54, %v482_v48 }
 0x391   :  { %7445 = vmatpush1.bf16.msra.mxu1 %v8532_v52  ;;  %v474_v0 = vld [vmem:[#allocation5 + $0xbf8] sm:$0xff] }
 0x392   :  { %7446 = vmatprep.subr.bf16.mxu1 %v8525_v56  ;;  %v598_v16 = vld [vmem:[#allocation5 + $0xfd8] sm:$0xff]  ;;  %v8485_v20 = vcombine.high %v470_v63, %v474_v0  ;;  %v8484_v11 = vcombine.low %v470_v63, %v474_v0 }
 0x393   :  { %7406 = vmatpush1.bf16.msra.mxu0 %v8396_v60  ;;  %v8613_v45 = vcombine.high %v598_v16, %v602_v1  ;;  %v462_v58 = vld [vmem:[#allocation5 + $0xb98] sm:$0xff]  ;;  %v8612_v59 = vcombine.low %v598_v16, %v602_v1 }
 0x394   :  { %7407 = vmatprep.subr.bf16.mxu0 %v8389_v39  ;;  %v466_v5 = vld [vmem:[#allocation5 + $0xbb8] sm:$0xff] }
 0x395   :  { %7447 = vmatpush1.bf16.msra.mxu1 %v8524_v29  ;;  %v590_v6 = vld [vmem:[#allocation5 + $0xf98] sm:$0xff]  ;;  %v8477_v56 = vcombine.high %v462_v58, %v466_v5  ;;  %v8476_v29 = vcombine.low %v462_v58, %v466_v5 }
 0x396   :  { %7448 = vmatprep.subr.bf16.mxu1 %v8517_v14  ;;  %v594_v52 = vld [vmem:[#allocation5 + $0xfb8] sm:$0xff] }
 0x397   :  { %7408 = vmatpush1.bf16.msra.mxu0 %v8388_v26  ;;  %v8605_v12 = vcombine.high %v590_v6, %v594_v52  ;;  %v454_v27 = vld [vmem:[#allocation5 + $0xb58] sm:$0xff]  ;;  %v8604_v39 = vcombine.low %v590_v6, %v594_v52 }
 0x398   :  { %7409 = vmatprep.subr.bf16.mxu0 %v8381_v9  ;;  %v582_v13 = vld [vmem:[#allocation5 + $0xf58] sm:$0xff]  ;;  %v8469_v14 = vcombine.high %v454_v27, %v458_v10 }
 0x399   :  { %7449 = vmatpush1.bf16.msra.mxu1 %v8516_v30  ;;  %v586_v60 = vld [vmem:[#allocation5 + $0xf78] sm:$0xff]  ;;  %v8468_v30 = vcombine.low %v454_v27, %v458_v10 }
 0x39a   :  { %7450 = vmatprep.subr.bf16.mxu1 %v8509_v17  ;;  %v8597_v21 = vcombine.high %v582_v13, %v586_v60  ;;  %v446_v25 = vld [vmem:[#allocation5 + $0xb18] sm:$0xff]  ;;  %v8596_v9 = vcombine.low %v582_v13, %v586_v60 }
 0x39b   :  { %7410 = vmatpush1.bf16.msra.mxu0 %v8380_v42  ;;  %v450_v7 = vld [vmem:[#allocation5 + $0xb38] sm:$0xff] }
 0x39c   :  { %7411 = vmatprep.subr.bf16.mxu0 %v8373_v28  ;;  %v574_v53 = vld [vmem:[#allocation5 + $0xf18] sm:$0xff]  ;;  %v8461_v17 = vcombine.high %v446_v25, %v450_v7 }
 0x39d   :  { %7451 = vmatpush1.bf16.msra.mxu1 %v8508_v41  ;;  %v578_v26 = vld [vmem:[#allocation5 + $0xf38] sm:$0xff]  ;;  %v8460_v41 = vcombine.low %v446_v25, %v450_v7 }
 0x39e   :  { %7452 = vmatprep.subr.bf16.mxu1 %v8501_v44  ;;  %v8589_v31 = vcombine.high %v574_v53, %v578_v26  ;;  %v438_v24 = vld [vmem:[#allocation5 + $0xad8] sm:$0xff]  ;;  %v8588_v28 = vcombine.low %v574_v53, %v578_v26 }
 0x39f   :  { %7412 = vmatpush1.bf16.msra.mxu0 %v8372_v22  ;;  %v442_v37 = vld [vmem:[#allocation5 + $0xaf8] sm:$0xff] }
 0x3a0   :  { %7413 = vmatprep.subr.bf16.mxu0 %v8365_v51  ;;  %v566_v38 = vld [vmem:[#allocation5 + $0xed8] sm:$0xff]  ;;  %v8453_v44 = vcombine.high %v438_v24, %v442_v37 }
 0x3a1   :  { %7453 = vmatpush1.bf16.msra.mxu1 %v8500_v50  ;;  %v570_v42 = vld [vmem:[#allocation5 + $0xef8] sm:$0xff]  ;;  %v8452_v50 = vcombine.low %v438_v24, %v442_v37 }
 0x3a2   :  { %7454 = vmatprep.subr.bf16.mxu1 %v8493_v57  ;;  %v8581_v19 = vcombine.high %v566_v38, %v570_v42  ;;  %v430_v46 = vld [vmem:[#allocation5 + $0xa98] sm:$0xff]  ;;  %v8580_v51 = vcombine.low %v566_v38, %v570_v42 }
 0x3a3   :  { %7414 = vmatpush1.bf16.msra.mxu0 %v8364_v2  ;;  %v434_v54 = vld [vmem:[#allocation5 + $0xab8] sm:$0xff] }
 0x3a4   :  { %7415 = vmatprep.subr.bf16.mxu0 %v8485_v20  ;;  %v558_v48 = vld [vmem:[#allocation5 + $0xe98] sm:$0xff]  ;;  %v8445_v57 = vcombine.high %v430_v46, %v434_v54 }
 0x3a5   :  { %7455 = vmatpush1.bf16.msra.mxu1 %v8492_v43  ;;  %v562_v22 = vld [vmem:[#allocation5 + $0xeb8] sm:$0xff]  ;;  %v8444_v43 = vcombine.low %v430_v46, %v434_v54 }
 0x3a6   :  { %7456 = vmatprep.subr.bf16.mxu1 %v8613_v45  ;;  %v8573_v63 = vcombine.high %v558_v48, %v562_v22  ;;  %v422_v0 = vld [vmem:[#allocation5 + $0xa58] sm:$0xff]  ;;  %v8572_v20 = vcombine.low %v558_v48, %v562_v22 }
 0x3a7   :  { %7416 = vmatpush2.bf16.msra.mxu0 %v8484_v11  ;;  %v426_v16 = vld [vmem:[#allocation5 + $0xa78] sm:$0xff] }
 0x3a8   :  { %7417 = vmatprep.subr.bf16.mxu0 %v8477_v56  ;;  %v550_v1 = vld [vmem:[#allocation5 + $0xe58] sm:$0xff]  ;;  %v8437_v45 = vcombine.high %v422_v0, %v426_v16 }
 0x3a9   :  { %7457 = vmatpush2.bf16.msra.mxu1 %v8612_v59  ;;  %v554_v2 = vld [vmem:[#allocation5 + $0xe78] sm:$0xff]  ;;  %v8436_v59 = vcombine.low %v422_v0, %v426_v16 }
 0x3aa   :  { %7458 = vmatprep.subr.bf16.mxu1 %v8605_v12  ;;  %v8565_v58 = vcombine.high %v550_v1, %v554_v2  ;;  %v414_v5 = vld [vmem:[#allocation5 + $0xa18] sm:$0xff]  ;;  %v8564_v56 = vcombine.low %v550_v1, %v554_v2 }
 0x3ab   :  { %7418 = vmatpush2.bf16.msra.mxu0 %v8476_v29  ;;  %v418_v6 = vld [vmem:[#allocation5 + $0xa38] sm:$0xff] }
 0x3ac   :  { %7419 = vmatprep.subr.bf16.mxu0 %v8469_v14  ;;  %v542_v52 = vld [vmem:[#allocation5 + $0xe18] sm:$0xff]  ;;  %v8429_v12 = vcombine.high %v414_v5, %v418_v6 }
 0x3ad   :  { %7459 = vmatpush2.bf16.msra.mxu1 %v8604_v39  ;;  %v546_v11 = vld [vmem:[#allocation5 + $0xe38] sm:$0xff]  ;;  %v8428_v39 = vcombine.low %v414_v5, %v418_v6 }
 0x3ae   :  { %7460 = vmatprep.subr.bf16.mxu1 %v8597_v21  ;;  %v8557_v27 = vcombine.high %v542_v52, %v546_v11  ;;  %v662_v10 = vld [vmem:[#allocation5 + $0x11d8] sm:$0xff]  ;;  %v8556_v14 = vcombine.low %v542_v52, %v546_v11 }
 0x3af   :  { %7420 = vmatpush2.bf16.msra.mxu0 %v8468_v30  ;;  %v666_v13 = vld [vmem:[#allocation5 + $0x11f8] sm:$0xff] }
 0x3b0   :  { %7421 = vmatprep.subr.bf16.mxu0 %v8461_v17  ;;  %v790_v60 = vld [vmem:[#allocation5 + $0x15d8] sm:$0xff]  ;;  %v8677_v21 = vcombine.high %v662_v10, %v666_v13 }
 0x3b1   :  { %7461 = vmatpush2.bf16.msra.mxu1 %v8596_v9  ;;  %v794_v29 = vld [vmem:[#allocation5 + $0x15f8] sm:$0xff]  ;;  %v8676_v9 = vcombine.low %v662_v10, %v666_v13 }
 0x3b2   :  { %7462 = vmatprep.subr.bf16.mxu1 %v8589_v31  ;;  %v8805_v25 = vcombine.high %v790_v60, %v794_v29  ;;  %v654_v7 = vld [vmem:[#allocation5 + $0x1198] sm:$0xff]  ;;  %v8804_v17 = vcombine.low %v790_v60, %v794_v29 }
 0x3b3   :  { %7422 = vmatpush2.bf16.msra.mxu0 %v8460_v41  ;;  %v658_v53 = vld [vmem:[#allocation5 + $0x11b8] sm:$0xff] }
 0x3b4   :  { %7423 = vmatprep.subr.bf16.mxu0 %v8453_v44  ;;  %v782_v26 = vld [vmem:[#allocation5 + $0x1598] sm:$0xff]  ;;  %v8669_v31 = vcombine.high %v654_v7, %v658_v53  ;;  %v8668_v46 = vcombine.low %v654_v7, %v658_v53 }
 0x3b5   :  { %7463 = vmatpush2.bf16.msra.mxu1 %v8588_v28  ;;  %v786_v30 = vld [vmem:[#allocation5 + $0x15b8] sm:$0xff] }
 0x3b6   :  { %7464 = vmatprep.subr.bf16.mxu1 %v8581_v19  ;;  %v8797_v24 = vcombine.high %v782_v26, %v786_v30  ;;  %v646_v37 = vld [vmem:[#allocation5 + $0x1158] sm:$0xff]  ;;  %v8796_v48 = vcombine.low %v782_v26, %v786_v30 }
 0x3b7   :  { %7424 = vmatpush2.bf16.msra.mxu0 %v8452_v50  ;;  %v650_v38 = vld [vmem:[#allocation5 + $0x1178] sm:$0xff] }
 0x3b8   :  { %7425 = vmatprep.subr.bf16.mxu0 %v8445_v57  ;;  %v774_v41 = vld [vmem:[#allocation5 + $0x1558] sm:$0xff]  ;;  %v8661_v22 = vcombine.high %v646_v37, %v650_v38 }
 0x3b9   :  { %7465 = vmatpush2.bf16.msra.mxu1 %v8580_v51  ;;  %v778_v28 = vld [vmem:[#allocation5 + $0x1578] sm:$0xff] }
 0x3ba   :  { %7466 = vmatprep.subr.bf16.mxu1 %v8573_v63  ;;  %v638_v63 = vld [vmem:[#allocation5 + $0x1118] sm:$0xff] }
 0x3bb   :  { %7426 = vmatpush2.bf16.msra.mxu0 %v8444_v43  ;;  %v642_v0 = vld [vmem:[#allocation5 + $0x1138] sm:$0xff]  ;;  %v8660_v43 = vcombine.low %v646_v37, %v650_v38 }
 0x3bc   :  { %7427 = vmatprep.subr.bf16.mxu0 %v8437_v45  ;;  %v770_v16 = vld [vmem:[#allocation5 + $0x1538] sm:$0xff]  ;;  %v8653_v45 = vcombine.high %v638_v63, %v642_v0 }
 0x3bd   :  { %7467 = vmatpush2.bf16.msra.mxu1 %v8572_v20  ;;  %v630_v6 = vld [vmem:[#allocation5 + $0x10d8] sm:$0xff] }
 0x3be   :  { %7468 = vmatprep.subr.bf16.mxu1 %v8565_v58  ;;  %v758_v52 = vld [vmem:[#allocation5 + $0x14d8] sm:$0xff] }
 0x3bf   :  { %7428 = vmatpush2.bf16.msra.mxu0 %v8436_v59  ;;  %v762_v11 = vld [vmem:[#allocation5 + $0x14f8] sm:$0xff]  ;;  %v8652_v59 = vcombine.low %v638_v63, %v642_v0 }
 0x3c0   :  { %7429 = vmatprep.subr.bf16.mxu0 %v8429_v12  ;;  %v8773_v12 = vcombine.high %v758_v52, %v762_v11  ;;  %v626_v10 = vld [vmem:[#allocation5 + $0x10b8] sm:$0xff] }
 0x3c1   :  { %7469 = vmatpush2.bf16.msra.mxu1 %v8564_v56  ;;  %v750_v13 = vld [vmem:[#allocation5 + $0x1498] sm:$0xff] }
 0x3c2   :  { %7470 = vmatprep.subr.bf16.mxu1 %v8557_v27  ;;  %v622_v27 = vld [vmem:[#allocation5 + $0x1098] sm:$0xff] }
 0x3c3   :  { %7430 = vmatpush2.bf16.msra.mxu0 %v8428_v39  ;;  %v754_v60 = vld [vmem:[#allocation5 + $0x14b8] sm:$0xff]  ;;  %v8772_v39 = vcombine.low %v758_v52, %v762_v11  ;;  %v8636_v30 = vcombine.low %v622_v27, %v626_v10 }
 0x3c4   :  { %7481 = vmatprep.subr.bf16.mxu0 %v8677_v21  ;;  %v8765_v21 = vcombine.high %v750_v13, %v754_v60  ;;  %v618_v7 = vld [vmem:[#allocation5 + $0x1078] sm:$0xff] }
 0x3c5   :  { %7471 = vmatpush2.bf16.msra.mxu1 %v8556_v14  ;;  %v8637_v14 = vcombine.high %v622_v27, %v626_v10  ;;  %v742_v53 = vld [vmem:[#allocation5 + $0x1458] sm:$0xff] }
 0x3c6   :  { %7522 = vmatprep.subr.bf16.mxu1 %v8805_v25  ;;  %v7187_v42 = vpop.f32.mrf.mxu0  ;;  %7432 = vmatmul.mubr.bf16.vlgmr.msra.gmra.mxu0 %v9519_v36  ;;  %v8789_v36 = vcombine.high %v774_v41, %v778_v28  ;;  %v614_v25 = vld [vmem:[#allocation5 + $0x1058] sm:$0xff] }
 0x3c7   :  { %v7188_v44 = vadd.f32 %v7187_v42, %v9668_v62  ;;  %7482 = vmatpush1.bf16.msra.mxu0 %v8676_v9  ;;  %7513 = vmatprep.mubr.bf16.mxu0 %v9531_v47  ;;  %v634_v47 = vld [vmem:[#allocation5 + $0x10f8] sm:$0xff]  ;;  %v8764_v9 = vcombine.low %v750_v13, %v754_v60 }
 0x3c8   :  { %v7228_v19 = vpop.f32.mrf.mxu1  ;;  %7473 = vmatmul.mubr.bf16.vlgmr.msra.gmra.mxu1 %v9525_v40  ;;  %v7189_v54 = vpop.f32.mrf.mxu0  ;;  %7483 = vmatprep.subr.bf16.mxu0 %v8669_v31  ;;  %v766_v40 = vld [vmem:[#allocation5 + $0x1518] sm:$0xff]  ;;  %v8645_v56 = vcombine.high %v630_v6, %v634_v47  ;;  %v8644_v29 = vcombine.low %v630_v6, %v634_v47 }
 0x3c9   :  { %7523 = vmatpush1.bf16.msra.mxu1 %v8804_v17  ;;  %v9678_v50 = vadd.f32 %v7228_v19, %v7188_v44  ;;  %v7190_v51 = vadd.f32 %v7189_v54, %v9673_v3  ;;  %7554 = vmatprep.mubr.bf16.mxu1 %v9536_v49  ;;  %v8788_v3 = vcombine.low %v774_v41, %v778_v28  ;;  %v746_v26 = vld [vmem:[#allocation5 + $0x1478] sm:$0xff] }
 0x3ca   :  { %v7230_v57 = vpop.f32.mrf.mxu1  ;;  %7524 = vmatprep.subr.bf16.mxu1 %v8797_v24  ;;  %v7191_v62 = vpop.f32.mrf.mxu0  ;;  %v8781_v5 = vcombine.high %v766_v40, %v770_v16  ;;  %v8780_v49 = vcombine.low %v766_v40, %v770_v16  ;;  %v8629_v17 = vcombine.high %v614_v25, %v618_v7  ;;  %v8757_v31 = vcombine.high %v742_v53, %v746_v26  ;;  %v606_v24 = vld [vmem:[#allocation5 + $0x1018] sm:$0xff] }
 0x3cb   :  { %v9683_v1 = vadd.f32 %v7230_v57, %v7190_v51  ;;  %7484 = vmatpush1.bf16.msra.mxu0 %v8668_v46  ;;  %v610_v37 = vld [vmem:[#allocation5 + $0x1038] sm:$0xff]  ;;  %v8628_v41 = vcombine.low %v614_v25, %v618_v7  ;;  %v8756_v28 = vcombine.low %v742_v53, %v746_v26 }
 0x3cc   :  { %v7232_v2 = vpop.f32.mrf.mxu1  ;;  %v7192_v20 = vpop.f32.mrf.mxu0  ;;  %7485 = vmatprep.subr.bf16.mxu0 %v8661_v22  ;;  %v734_v38 = vld [vmem:[#allocation5 + $0x1418] sm:$0xff]  ;;  %v8621_v44 = vcombine.high %v606_v24, %v610_v37  ;;  %v8620_v51 = vcombine.low %v606_v24, %v610_v37 }
 0x3cd   :  { %7525 = vmatpush1.bf16.msra.mxu1 %v8796_v48  ;;  %v738_v42 = vld [vmem:[#allocation5 + $0x1438] sm:$0xff] }
 0x3ce   :  { %v7233_v58 = vpop.f32.mrf.mxu1  ;;  %7526 = vmatprep.subr.bf16.mxu1 %v8789_v36  ;;  %v8749_v19 = vcombine.high %v734_v38, %v738_v42  ;;  %v726_v46 = vld [vmem:[#allocation5 + $0x13d8] sm:$0xff]  ;;  %v8748_v57 = vcombine.low %v734_v38, %v738_v42 }
 0x3cf   :  { %7486 = vmatpush1.bf16.msra.mxu0 %v8660_v43  ;;  %v730_v54 = vld [vmem:[#allocation5 + $0x13f8] sm:$0xff] }
 0x3d0   :  { %7487 = vmatprep.subr.bf16.mxu0 %v8653_v45  ;;  %v854_v48 = vld [vmem:[#allocation5 + $0x17d8] sm:$0xff]  ;;  %v8741_v36 = vcombine.high %v726_v46, %v730_v54  ;;  %v8740_v2 = vcombine.low %v726_v46, %v730_v54 }
 0x3d1   :  { %7527 = vmatpush1.bf16.msra.mxu1 %v8788_v3  ;;  %v858_v22 = vld [vmem:[#allocation5 + $0x17f8] sm:$0xff] }
 0x3d2   :  { %7528 = vmatprep.subr.bf16.mxu1 %v8781_v5  ;;  %v8869_v63 = vcombine.high %v854_v48, %v858_v22  ;;  %v718_v0 = vld [vmem:[#allocation5 + $0x1398] sm:$0xff]  ;;  %v8868_v43 = vcombine.low %v854_v48, %v858_v22 }
 0x3d3   :  { %7488 = vmatpush1.bf16.msra.mxu0 %v8652_v59  ;;  %v722_v62 = vld [vmem:[#allocation5 + $0x13b8] sm:$0xff] }
 0x3d4   :  { %7489 = vmatprep.subr.bf16.mxu0 %v8645_v56  ;;  %v846_v40 = vld [vmem:[#allocation5 + $0x1798] sm:$0xff]  ;;  %v8733_v20 = vcombine.high %v718_v0, %v722_v62  ;;  %v8732_v47 = vcombine.low %v718_v0, %v722_v62 }
 0x3d5   :  { %7529 = vmatpush1.bf16.msra.mxu1 %v8780_v49  ;;  %v850_v16 = vld [vmem:[#allocation5 + $0x17b8] sm:$0xff] }
 0x3d6   :  { %7530 = vmatprep.subr.bf16.mxu1 %v8773_v12  ;;  %v8861_v3 = vcombine.high %v846_v40, %v850_v16  ;;  %v710_v45 = vld [vmem:[#allocation5 + $0x1358] sm:$0xff]  ;;  %v8860_v52 = vcombine.low %v846_v40, %v850_v16 }
 0x3d7   :  { %7490 = vmatpush1.bf16.msra.mxu0 %v8644_v29  ;;  %v714_v58 = vld [vmem:[#allocation5 + $0x1378] sm:$0xff] }
 0x3d8   :  { %7491 = vmatprep.subr.bf16.mxu0 %v8637_v14  ;;  %v838_v5 = vld [vmem:[#allocation5 + $0x1758] sm:$0xff]  ;;  %v8725_v11 = vcombine.high %v710_v45, %v714_v58  ;;  %v8724_v10 = vcombine.low %v710_v45, %v714_v58 }
 0x3d9   :  { %7531 = vmatpush1.bf16.msra.mxu1 %v8772_v39  ;;  %v842_v6 = vld [vmem:[#allocation5 + $0x1778] sm:$0xff] }
 0x3da   :  { %7532 = vmatprep.subr.bf16.mxu1 %v8765_v21  ;;  %v8853_v59 = vcombine.high %v838_v5, %v842_v6  ;;  %v702_v49 = vld [vmem:[#allocation5 + $0x1318] sm:$0xff]  ;;  %v8852_v13 = vcombine.low %v838_v5, %v842_v6 }
 0x3db   :  { %7492 = vmatpush1.bf16.msra.mxu0 %v8636_v30  ;;  %v706_v56 = vld [vmem:[#allocation5 + $0x1338] sm:$0xff] }
 0x3dc   :  { %7493 = vmatprep.subr.bf16.mxu0 %v8629_v17  ;;  %v830_v12 = vld [vmem:[#allocation5 + $0x1718] sm:$0xff]  ;;  %v8717_v60 = vcombine.high %v702_v49, %v706_v56  ;;  %v8716_v7 = vcombine.low %v702_v49, %v706_v56 }
 0x3dd   :  { %7533 = vmatpush1.bf16.msra.mxu1 %v8764_v9  ;;  %v834_v27 = vld [vmem:[#allocation5 + $0x1738] sm:$0xff] }
 0x3de   :  { %7534 = vmatprep.subr.bf16.mxu1 %v8757_v31  ;;  %v8845_v29 = vcombine.high %v830_v12, %v834_v27  ;;  %v694_v39 = vld [vmem:[#allocation5 + $0x12d8] sm:$0xff]  ;;  %v8844_v53 = vcombine.low %v830_v12, %v834_v27 }
 0x3df   :  { %7494 = vmatpush1.bf16.msra.mxu0 %v8628_v41  ;;  %v698_v14 = vld [vmem:[#allocation5 + $0x12f8] sm:$0xff] }
 0x3e0   :  { %7495 = vmatprep.subr.bf16.mxu0 %v8621_v44  ;;  %v822_v21 = vld [vmem:[#allocation5 + $0x16d8] sm:$0xff]  ;;  %v8709_v26 = vcombine.high %v694_v39, %v698_v14  ;;  %v8708_v37 = vcombine.low %v694_v39, %v698_v14 }
 0x3e1   :  { %7535 = vmatpush1.bf16.msra.mxu1 %v8756_v28  ;;  %v826_v25 = vld [vmem:[#allocation5 + $0x16f8] sm:$0xff] }
 0x3e2   :  { %7536 = vmatprep.subr.bf16.mxu1 %v8749_v19  ;;  %v8837_v30 = vcombine.high %v822_v21, %v826_v25  ;;  %v686_v9 = vld [vmem:[#allocation5 + $0x1298] sm:$0xff]  ;;  %v8836_v38 = vcombine.low %v822_v21, %v826_v25 }
 0x3e3   :  { %7496 = vmatpush1.bf16.msra.mxu0 %v8620_v51  ;;  %v690_v17 = vld [vmem:[#allocation5 + $0x12b8] sm:$0xff] }
 0x3e4   :  { %7497 = vmatprep.subr.bf16.mxu0 %v8741_v36  ;;  %v814_v31 = vld [vmem:[#allocation5 + $0x1698] sm:$0xff]  ;;  %v8701_v42 = vcombine.high %v686_v9, %v690_v17  ;;  %v8700_v54 = vcombine.low %v686_v9, %v690_v17 }
 0x3e5   :  { %7537 = vmatpush1.bf16.msra.mxu1 %v8748_v57  ;;  %v818_v24 = vld [vmem:[#allocation5 + $0x16b8] sm:$0xff] }
 0x3e6   :  { %7538 = vmatprep.subr.bf16.mxu1 %v8869_v63  ;;  %v8829_v41 = vcombine.high %v814_v31, %v818_v24  ;;  %v678_v28 = vld [vmem:[#allocation5 + $0x1258] sm:$0xff]  ;;  %v8828_v48 = vcombine.low %v814_v31, %v818_v24 }
 0x3e7   :  { %7498 = vmatpush2.bf16.msra.mxu0 %v8740_v2  ;;  %v682_v44 = vld [vmem:[#allocation5 + $0x1278] sm:$0xff] }
 0x3e8   :  { %7499 = vmatprep.subr.bf16.mxu0 %v8733_v20  ;;  %v806_v19 = vld [vmem:[#allocation5 + $0x1658] sm:$0xff]  ;;  %v8693_v22 = vcombine.high %v678_v28, %v682_v44  ;;  %v8692_v62 = vcombine.low %v678_v28, %v682_v44 }
 0x3e9   :  { %7539 = vmatpush2.bf16.msra.mxu1 %v8868_v43  ;;  %v810_v46 = vld [vmem:[#allocation5 + $0x1678] sm:$0xff] }
 0x3ea   :  { %7540 = vmatprep.subr.bf16.mxu1 %v8861_v3  ;;  %v8821_v51 = vcombine.high %v806_v19, %v810_v46  ;;  %v670_v57 = vld [vmem:[#allocation5 + $0x1218] sm:$0xff]  ;;  %v8820_v40 = vcombine.low %v806_v19, %v810_v46 }
 0x3eb   :  { %7500 = vmatpush2.bf16.msra.mxu0 %v8732_v47  ;;  %v674_v36 = vld [vmem:[#allocation5 + $0x1238] sm:$0xff] }
 0x3ec   :  { %7501 = vmatprep.subr.bf16.mxu0 %v8725_v11  ;;  %v798_v63 = vld [vmem:[#allocation5 + $0x1618] sm:$0xff]  ;;  %v8685_v16 = vcombine.high %v670_v57, %v674_v36  ;;  %v8684_v58 = vcombine.low %v670_v57, %v674_v36 }
 0x3ed   :  { %7541 = vmatpush2.bf16.msra.mxu1 %v8860_v52  ;;  %v802_v0 = vld [vmem:[#allocation5 + $0x1638] sm:$0xff] }
 0x3ee   :  { %7542 = vmatprep.subr.bf16.mxu1 %v8853_v59  ;;  %v8813_v2 = vcombine.high %v798_v63, %v802_v0  ;;  %v918_v43 = vld [vmem:[#allocation5 + $0x19d8] sm:$0xff]  ;;  %v8812_v5 = vcombine.low %v798_v63, %v802_v0 }
 0x3ef   :  { %7502 = vmatpush2.bf16.msra.mxu0 %v8724_v10  ;;  %v922_v20 = vld [vmem:[#allocation5 + $0x19f8] sm:$0xff] }
 0x3f0   :  { %7503 = vmatprep.subr.bf16.mxu0 %v8717_v60  ;;  %v1046_v3 = vld [vmem:[#allocation5 + $0x1dd8] sm:$0xff]  ;;  %v8933_v6 = vcombine.high %v918_v43, %v922_v20  ;;  %v8932_v56 = vcombine.low %v918_v43, %v922_v20 }
 0x3f1   :  { %7543 = vmatpush2.bf16.msra.mxu1 %v8852_v13  ;;  %v1050_v45 = vld [vmem:[#allocation5 + $0x1df8] sm:$0xff] }
 0x3f2   :  { %7544 = vmatprep.subr.bf16.mxu1 %v8845_v29  ;;  %v9061_v47 = vcombine.high %v1046_v3, %v1050_v45  ;;  %v910_v52 = vld [vmem:[#allocation5 + $0x1998] sm:$0xff]  ;;  %v9060_v12 = vcombine.low %v1046_v3, %v1050_v45 }
 0x3f3   :  { %7504 = vmatpush2.bf16.msra.mxu0 %v8716_v7  ;;  %v914_v11 = vld [vmem:[#allocation5 + $0x19b8] sm:$0xff] }
 0x3f4   :  { %7505 = vmatprep.subr.bf16.mxu0 %v8709_v26  ;;  %v1038_v59 = vld [vmem:[#allocation5 + $0x1d98] sm:$0xff]  ;;  %v8925_v27 = vcombine.high %v910_v52, %v914_v11  ;;  %v8924_v7 = vcombine.low %v910_v52, %v914_v11 }
 0x3f5   :  { %7545 = vmatpush2.bf16.msra.mxu1 %v8844_v53  ;;  %v1042_v49 = vld [vmem:[#allocation5 + $0x1db8] sm:$0xff] }
 0x3f6   :  { %7546 = vmatprep.subr.bf16.mxu1 %v8837_v30  ;;  %v9053_v10 = vcombine.high %v1038_v59, %v1042_v49  ;;  %v902_v13 = vld [vmem:[#allocation5 + $0x1958] sm:$0xff]  ;;  %v9052_v26 = vcombine.low %v1038_v59, %v1042_v49 }
 0x3f7   :  { %7506 = vmatpush2.bf16.msra.mxu0 %v8708_v37  ;;  %v906_v60 = vld [vmem:[#allocation5 + $0x1978] sm:$0xff] }
 0x3f8   :  { %7507 = vmatprep.subr.bf16.mxu0 %v8701_v42  ;;  %v1030_v39 = vld [vmem:[#allocation5 + $0x1d58] sm:$0xff]  ;;  %v8917_v30 = vcombine.high %v902_v13, %v906_v60  ;;  %v8916_v28 = vcombine.low %v902_v13, %v906_v60 }
 0x3f9   :  { %7547 = vmatpush2.bf16.msra.mxu1 %v8836_v38  ;;  %v1034_v14 = vld [vmem:[#allocation5 + $0x1d78] sm:$0xff] }
 0x3fa   :  { %7548 = vmatprep.subr.bf16.mxu1 %v8829_v41  ;;  %v894_v24 = vld [vmem:[#allocation5 + $0x1918] sm:$0xff] }
 0x3fb   :  { %7508 = vmatpush2.bf16.msra.mxu0 %v8700_v54  ;;  %v898_v37 = vld [vmem:[#allocation5 + $0x1938] sm:$0xff] }
 0x3fc   :  { %7509 = vmatprep.subr.bf16.mxu0 %v8693_v22  ;;  %v1026_v38 = vld [vmem:[#allocation5 + $0x1d38] sm:$0xff]  ;;  %v8909_v19 = vcombine.high %v894_v24, %v898_v37  ;;  %v8908_v57 = vcombine.low %v894_v24, %v898_v37 }
 0x3fd   :  { %7549 = vmatpush2.bf16.msra.mxu1 %v8828_v48  ;;  %v886_v48 = vld [vmem:[#allocation5 + $0x18d8] sm:$0xff] }
 0x3fe   :  { %7550 = vmatprep.subr.bf16.mxu1 %v8821_v51  ;;  %v1014_v22 = vld [vmem:[#allocation5 + $0x1cd8] sm:$0xff] }
 0x3ff   :  { %7510 = vmatpush2.bf16.msra.mxu0 %v8692_v62  ;;  %v1018_v51 = vld [vmem:[#allocation5 + $0x1cf8] sm:$0xff] }
 0x400   :  { %7511 = vmatprep.subr.bf16.mxu0 %v8685_v16  ;;  %v9029_v63 = vcombine.high %v1014_v22, %v1018_v51  ;;  %v878_v0 = vld [vmem:[#allocation5 + $0x1898] sm:$0xff]  ;;  %v9028_v43 = vcombine.low %v1014_v22, %v1018_v51 }
 0x401   :  { %7551 = vmatpush2.bf16.msra.mxu1 %v8820_v40  ;;  %v882_v62 = vld [vmem:[#allocation5 + $0x18b8] sm:$0xff] }
 0x402   :  { %7552 = vmatprep.subr.bf16.mxu1 %v8813_v2  ;;  %v1006_v40 = vld [vmem:[#allocation5 + $0x1c98] sm:$0xff]  ;;  %v8893_v20 = vcombine.high %v878_v0, %v882_v62 }
 0x403   :  { %7512 = vmatpush2.bf16.msra.mxu0 %v8684_v58  ;;  %v1010_v16 = vld [vmem:[#allocation5 + $0x1cb8] sm:$0xff] }
 0x404   :  { %7563 = vmatprep.subr.bf16.mxu0 %v8933_v6  ;;  %v9021_v3 = vcombine.high %v1006_v40, %v1010_v16  ;;  %v870_v45 = vld [vmem:[#allocation5 + $0x1858] sm:$0xff]  ;;  %v9020_v52 = vcombine.low %v1006_v40, %v1010_v16 }
 0x405   :  { %7553 = vmatpush2.bf16.msra.mxu1 %v8812_v5  ;;  %v874_v58 = vld [vmem:[#allocation5 + $0x1878] sm:$0xff] }
 0x406   :  { %7604 = vmatprep.subr.bf16.mxu1 %v9061_v47  ;;  %v7269_v29 = vpop.f32.mrf.mxu0  ;;  %7514 = vmatmul.mubr.bf16.vlgmr.msra.gmra.mxu0 %v9543_v4  ;;  %v9045_v4 = vcombine.high %v1030_v39, %v1034_v14  ;;  %v998_v5 = vld [vmem:[#allocation5 + $0x1c58] sm:$0xff]  ;;  %v8892_v47 = vcombine.low %v878_v0, %v882_v62  ;;  %v8885_v11 = vcombine.high %v870_v45, %v874_v58 }
 0x407   :  { %v7270_v21 = vadd.f32 %v7269_v29, %v9678_v50  ;;  %7564 = vmatpush1.bf16.msra.mxu0 %v8932_v56  ;;  %7595 = vmatprep.mubr.bf16.mxu0 %v9555_v15  ;;  %v890_v15 = vld [vmem:[#allocation5 + $0x18f8] sm:$0xff] }
 0x408   :  { %v7310_v25 = vpop.f32.mrf.mxu1  ;;  %7555 = vmatmul.mubr.bf16.vlgmr.msra.gmra.mxu1 %v9549_v8  ;;  %v7271_v53 = vpop.f32.mrf.mxu0  ;;  %7565 = vmatprep.subr.bf16.mxu0 %v8925_v27  ;;  %v1022_v8 = vld [vmem:[#allocation5 + $0x1d18] sm:$0xff]  ;;  %v8901_v36 = vcombine.high %v886_v48, %v890_v15  ;;  %v8900_v2 = vcombine.low %v886_v48, %v890_v15 }
 0x409   :  { %7605 = vmatpush1.bf16.msra.mxu1 %v9060_v12  ;;  %v9688_v9 = vadd.f32 %v7310_v25, %v7270_v21  ;;  %v7272_v17 = vadd.f32 %v7271_v53, %v9683_v1  ;;  %7636 = vmatprep.mubr.bf16.mxu1 %v9560_v18  ;;  %v9044_v1 = vcombine.low %v1030_v39, %v1034_v14  ;;  %v1002_v6 = vld [vmem:[#allocation5 + $0x1c78] sm:$0xff] }
 0x40a   :  { %v7312_v31 = vpop.f32.mrf.mxu1  ;;  %7606 = vmatprep.subr.bf16.mxu1 %v9053_v10  ;;  %v7273_v50 = vpop.f32.mrf.mxu0  ;;  %v9037_v54 = vcombine.high %v1022_v8, %v1026_v38  ;;  %v9036_v18 = vcombine.low %v1022_v8, %v1026_v38  ;;  %v9013_v59 = vcombine.high %v998_v5, %v1002_v6  ;;  %v862_v49 = vld [vmem:[#allocation5 + $0x1818] sm:$0xff]  ;;  %v8884_v10 = vcombine.low %v870_v45, %v874_v58 }
 0x40b   :  { %v9693_v42 = vadd.f32 %v7312_v31, %v7272_v17  ;;  %7566 = vmatpush1.bf16.msra.mxu0 %v8924_v7  ;;  %v866_v56 = vld [vmem:[#allocation5 + $0x1838] sm:$0xff]  ;;  %v9012_v13 = vcombine.low %v998_v5, %v1002_v6 }
 0x40c   :  { %v7314_v41 = vpop.f32.mrf.mxu1  ;;  %v7274_v44 = vpop.f32.mrf.mxu0  ;;  %7567 = vmatprep.subr.bf16.mxu0 %v8917_v30  ;;  %v990_v12 = vld [vmem:[#allocation5 + $0x1c18] sm:$0xff]  ;;  %v8877_v60 = vcombine.high %v862_v49, %v866_v56  ;;  %v8876_v7 = vcombine.low %v862_v49, %v866_v56 }
 0x40d   :  { %7607 = vmatpush1.bf16.msra.mxu1 %v9052_v26  ;;  %v994_v27 = vld [vmem:[#allocation5 + $0x1c38] sm:$0xff] }
 0x40e   :  { %v7315_v46 = vpop.f32.mrf.mxu1  ;;  %7608 = vmatprep.subr.bf16.mxu1 %v9045_v4  ;;  %v9005_v29 = vcombine.high %v990_v12, %v994_v27  ;;  %v982_v39 = vld [vmem:[#allocation5 + $0x1bd8] sm:$0xff]  ;;  %v9004_v53 = vcombine.low %v990_v12, %v994_v27 }
 0x40f   :  { %7568 = vmatpush1.bf16.msra.mxu0 %v8916_v28  ;;  %v986_v14 = vld [vmem:[#allocation5 + $0x1bf8] sm:$0xff] }
 0x410   :  { %7569 = vmatprep.subr.bf16.mxu0 %v8909_v19  ;;  %v1110_v21 = vld [vmem:[#allocation5 + $0x1fd8] sm:$0xff]  ;;  %v8997_v26 = vcombine.high %v982_v39, %v986_v14  ;;  %v8996_v37 = vcombine.low %v982_v39, %v986_v14 }
 0x411   :  { %7609 = vmatpush1.bf16.msra.mxu1 %v9044_v1  ;;  %v1114_v25 = vld [vmem:[#allocation5 + $0x1ff8] sm:$0xff] }
 0x412   :  { %7610 = vmatprep.subr.bf16.mxu1 %v9037_v54  ;;  %v9125_v30 = vcombine.high %v1110_v21, %v1114_v25  ;;  %v974_v17 = vld [vmem:[#allocation5 + $0x1b98] sm:$0xff]  ;;  %v9124_v50 = vcombine.low %v1110_v21, %v1114_v25 }
 0x413   :  { %7570 = vmatpush1.bf16.msra.mxu0 %v8908_v57  ;;  %v978_v31 = vld [vmem:[#allocation5 + $0x1bb8] sm:$0xff] }
 0x414   :  { %7571 = vmatprep.subr.bf16.mxu0 %v8901_v36  ;;  %v1102_v4 = vld [vmem:[#allocation5 + $0x1f98] sm:$0xff]  ;;  %v8989_v8 = vcombine.high %v974_v17, %v978_v31  ;;  %v8988_v19 = vcombine.low %v974_v17, %v978_v31 }
 0x415   :  { %7611 = vmatpush1.bf16.msra.mxu1 %v9036_v18  ;;  %v1106_v24 = vld [vmem:[#allocation5 + $0x1fb8] sm:$0xff] }
 0x416   :  { %7612 = vmatprep.subr.bf16.mxu1 %v9029_v63  ;;  %v9117_v38 = vcombine.high %v1102_v4, %v1106_v24  ;;  %v966_v41 = vld [vmem:[#allocation5 + $0x1b58] sm:$0xff]  ;;  %v9116_v46 = vcombine.low %v1102_v4, %v1106_v24  ;;  %v1143_v4 = vsub.s32 6, %v9565_v32 }
 0x417   :  { %7572 = vmatpush1.bf16.msra.mxu0 %v8900_v2  ;;  %v970_v28 = vld [vmem:[#allocation5 + $0x1b78] sm:$0xff] }
 0x418   :  { %7573 = vmatprep.subr.bf16.mxu0 %v8893_v20  ;;  %v1094_v44 = vld [vmem:[#allocation5 + $0x1f58] sm:$0xff]  ;;  %v8981_v54 = vcombine.high %v966_v41, %v970_v28  ;;  %v8980_v18 = vcombine.low %v966_v41, %v970_v28  ;;  %v7668_v28 = vld [vmem:[#allocation8 + $0x78] sm:$0xff] }
 0x419   :  { %7613 = vmatpush1.bf16.msra.mxu1 %v9028_v43  ;;  %v1098_v1 = vld [vmem:[#allocation5 + $0x1f78] sm:$0xff] }
 0x41a   :  { %7614 = vmatprep.subr.bf16.mxu1 %v9021_v3  ;;  %v9109_v48 = vcombine.high %v1094_v44, %v1098_v1  ;;  %v958_v15 = vld [vmem:[#allocation5 + $0x1b18] sm:$0xff]  ;;  %v9108_v36 = vcombine.low %v1094_v44, %v1098_v1  ;;  %v7700_v44 = vld [vmem:[#allocation8 + $0x178] sm:$0xff] }
 0x41b   :  { %7574 = vmatpush1.bf16.msra.mxu0 %v8892_v47  ;;  %v962_v22 = vld [vmem:[#allocation5 + $0x1b38] sm:$0xff] }
 0x41c   :  { %7575 = vmatprep.subr.bf16.mxu0 %v8885_v11  ;;  %v1086_v51 = vld [vmem:[#allocation5 + $0x1f18] sm:$0xff]  ;;  %v8973_v63 = vcombine.high %v958_v15, %v962_v22  ;;  %v8972_v43 = vcombine.low %v958_v15, %v962_v22 }
 0x41d   :  { %7615 = vmatpush1.bf16.msra.mxu1 %v9020_v52  ;;  %v1090_v57 = vld [vmem:[#allocation5 + $0x1f38] sm:$0xff] }
 0x41e   :  { %7616 = vmatprep.subr.bf16.mxu1 %v9013_v59  ;;  %v9101_v0 = vcombine.high %v1086_v51, %v1090_v57  ;;  %v950_v62 = vld [vmem:[#allocation5 + $0x1ad8] sm:$0xff]  ;;  %v9100_v20 = vcombine.low %v1086_v51, %v1090_v57 }
 0x41f   :  { %7576 = vmatpush1.bf16.msra.mxu0 %v8884_v10  ;;  %v954_v40 = vld [vmem:[#allocation5 + $0x1af8] sm:$0xff] }
 0x420   :  { %7577 = vmatprep.subr.bf16.mxu0 %v8877_v60  ;;  %v1078_v16 = vld [vmem:[#allocation5 + $0x1ed8] sm:$0xff]  ;;  %v8965_v3 = vcombine.high %v950_v62, %v954_v40  ;;  %v8964_v52 = vcombine.low %v950_v62, %v954_v40  ;;  %v7681_v40 = vld [vmem:[#allocation8 + $0xe0] sm:$0xff] }
 0x421   :  { %7617 = vmatpush1.bf16.msra.mxu1 %v9012_v13  ;;  %v1082_v2 = vld [vmem:[#allocation5 + $0x1ef8] sm:$0xff] }
 0x422   :  { %7618 = vmatprep.subr.bf16.mxu1 %v9005_v29  ;;  %v9093_v45 = vcombine.high %v1078_v16, %v1082_v2  ;;  %v942_v58 = vld [vmem:[#allocation5 + $0x1a98] sm:$0xff]  ;;  %v9092_v11 = vcombine.low %v1078_v16, %v1082_v2 }
 0x423   :  { %7578 = vmatpush1.bf16.msra.mxu0 %v8876_v7  ;;  %v946_v5 = vld [vmem:[#allocation5 + $0x1ab8] sm:$0xff] }
 0x424   :  { %7579 = vmatprep.subr.bf16.mxu0 %v8997_v26  ;;  %v1070_v6 = vld [vmem:[#allocation5 + $0x1e98] sm:$0xff]  ;;  %v8957_v59 = vcombine.high %v942_v58, %v946_v5  ;;  %v8956_v13 = vcombine.low %v942_v58, %v946_v5  ;;  %v7680_v58 = vld [vmem:[#allocation8 + $0xd8] sm:$0xff] }
 0x425   :  { %7619 = vmatpush1.bf16.msra.mxu1 %v9004_v53  ;;  %v1074_v47 = vld [vmem:[#allocation5 + $0x1eb8] sm:$0xff] }
 0x426   :  { %7620 = vmatprep.subr.bf16.mxu1 %v9125_v30  ;;  %v9085_v49 = vcombine.high %v1070_v6, %v1074_v47  ;;  %v934_v56 = vld [vmem:[#allocation5 + $0x1a58] sm:$0xff]  ;;  %v9084_v60 = vcombine.low %v1070_v6, %v1074_v47  ;;  %v7712_v6 = vld [vmem:[#allocation8 + $0x1d8] sm:$0xff] }
 0x427   :  { %7580 = vmatpush2.bf16.msra.mxu0 %v8996_v37  ;;  %v938_v12 = vld [vmem:[#allocation5 + $0x1a78] sm:$0xff]  ;;  %v7684_v37 = vld [vmem:[#allocation8 + $0xf8] sm:$0xff] }
 0x428   :  { %7581 = vmatprep.subr.bf16.mxu0 %v8989_v8  ;;  %v1062_v27 = vld [vmem:[#allocation5 + $0x1e58] sm:$0xff]  ;;  %v8949_v29 = vcombine.high %v934_v56, %v938_v12  ;;  %v8948_v53 = vcombine.low %v934_v56, %v938_v12  ;;  %v7716_v8 = vld [vmem:[#allocation8 + $0x1f8] sm:$0xff]  ;;  %v7678_v12 = vld [vmem:[#allocation8 + $0xc8] sm:$0xff] }
 0x429   :  { %7621 = vmatpush2.bf16.msra.mxu1 %v9124_v50  ;;  %v1066_v10 = vld [vmem:[#allocation5 + $0x1e78] sm:$0xff]  ;;  %v1147_v50 = vsub.s32 7, %v9565_v32  ;;  %v7664_v47 = vld [vmem:[#allocation8 + $0x58] sm:$0xff] }
 0x42a   :  { %7622 = vmatprep.subr.bf16.mxu1 %v9117_v38  ;;  %v9077_v39 = vcombine.high %v1062_v27, %v1066_v10  ;;  %v926_v14 = vld [vmem:[#allocation5 + $0x1a18] sm:$0xff]  ;;  %v9076_v26 = vcombine.low %v1062_v27, %v1066_v10  ;;  %v9295_v38 = vld [vmem:[#allocation7] sm:$0xff]  ;;  %v7710_v27 = vld [vmem:[#allocation8 + $0x1c8] sm:$0xff] }
 0x42b   :  { %7582 = vmatpush2.bf16.msra.mxu0 %v8988_v19  ;;  %v930_v21 = vld [vmem:[#allocation5 + $0x1a38] sm:$0xff]  ;;  %v1144_v41 = vrot.slane %v9295_v38, %v1143_v4  ;;  %v1148_v1 = vrot.slane %v9295_v38, %v1147_v50  ;;  %v7646_v19 = vmax.f32 %v9613_v34, 0.0  ;;  %v7662_v10 = vld [vmem:[#allocation8 + $0x48] sm:$0xff]  ;;  %v7705_v38 = vld [vmem:[#allocation8 + $0x1a0] sm:$0xff] }
 0x42c   :  { %7583 = vmatprep.subr.bf16.mxu0 %v8981_v54  ;;  %v1054_v25 = vld [vmem:[#allocation5 + $0x1e18] sm:$0xff]  ;;  %v8941_v30 = vcombine.high %v926_v14, %v930_v21  ;;  %v8940_v31 = vcombine.low %v926_v14, %v930_v21  ;;  %v7693_v14 = vld [vmem:[#allocation8 + $0x140] sm:$0xff]  ;;  %v7676_v21 = vld [vmem:[#allocation8 + $0xb8] sm:$0xff] }
 0x42d   :  { %7623 = vmatpush2.bf16.msra.mxu1 %v9116_v46  ;;  %v1058_v7 = vld [vmem:[#allocation5 + $0x1e38] sm:$0xff]  ;;  %v7674_v4 = vld [vmem:[#allocation8 + $0xa8] sm:$0xff] }
 0x42e   :  { %7624 = vmatprep.subr.bf16.mxu1 %v9109_v48  ;;  %v9069_v17 = vcombine.high %v1054_v25, %v1058_v7  ;;  %v9068_v24 = vcombine.low %v1054_v25, %v1058_v7  ;;  %v7683_v54 = vld [vmem:[#allocation8 + $0xf0] sm:$0xff]  ;;  %v7648_v48 = vmax.f32 %v9653_v35, 0.0  ;;  %v7666_v35 = vld [vmem:[#allocation8 + $0x68] sm:$0xff]  ;;  %v7708_v25 = vld [vmem:[#allocation8 + $0x1b8] sm:$0xff] }
 0x42f   :  { %7584 = vmatpush2.bf16.msra.mxu0 %v8980_v18  ;;  %v7715_v22 = vld [vmem:[#allocation8 + $0x1f0] sm:$0xff]  ;;  %v7660_v7 = vld [vmem:[#allocation8 + $0x38] sm:$0xff]  ;;  %v7690_v50 = vld [vmem:[#allocation8 + $0x128] sm:$0xff] }
 0x430   :  { %7585 = vmatprep.subr.bf16.mxu0 %v8973_v63  ;;  %v7667_v51 = vld [vmem:[#allocation8 + $0x70] sm:$0xff] }
 0x431   :  { %7625 = vmatpush2.bf16.msra.mxu1 %v9108_v36  ;;  %v7699_v18 = vld [vmem:[#allocation8 + $0x170] sm:$0xff]  ;;  %v7682_v36 = vld [vmem:[#allocation8 + $0xe8] sm:$0xff] }
 0x432   :  { %7626 = vmatprep.subr.bf16.mxu1 %v9101_v0  ;;  %v7714_v0 = vld [vmem:[#allocation8 + $0x1e8] sm:$0xff]  ;;  %v7695_v56 = vld [vmem:[#allocation8 + $0x150] sm:$0xff] }
 0x433   :  { %7586 = vmatpush2.bf16.msra.mxu0 %v8972_v43  ;;  %v7713_v43 = vld [vmem:[#allocation8 + $0x1e0] sm:$0xff] }
 0x434   :  { %7587 = vmatprep.subr.bf16.mxu0 %v8965_v3 }
 0x435   :  { %7627 = vmatpush2.bf16.msra.mxu1 %v9100_v20  ;;  %v7665_v20 = vld [vmem:[#allocation8 + $0x60] sm:$0xff] }
 0x436   :  { %7628 = vmatprep.subr.bf16.mxu1 %v9093_v45  ;;  %v7697_v45 = vld [vmem:[#allocation8 + $0x160] sm:$0xff] }
 0x437   :  { %7588 = vmatpush2.bf16.msra.mxu0 %v8964_v52  ;;  %v7696_v52 = vld [vmem:[#allocation8 + $0x158] sm:$0xff] }
 0x438   :  { %7589 = vmatprep.subr.bf16.mxu0 %v8957_v59  ;;  %v7711_v59 = vld [vmem:[#allocation8 + $0x1d0] sm:$0xff] }
 0x439   :  { %7629 = vmatpush2.bf16.msra.mxu1 %v9092_v11  ;;  %v7679_v11 = vld [vmem:[#allocation8 + $0xd0] sm:$0xff] }
 0x43a   :  { %7630 = vmatprep.subr.bf16.mxu1 %v9085_v49  ;;  %v7663_v49 = vld [vmem:[#allocation8 + $0x50] sm:$0xff] }
 0x43b   :  { %7590 = vmatpush2.bf16.msra.mxu0 %v8956_v13  ;;  %v7694_v13 = vld [vmem:[#allocation8 + $0x148] sm:$0xff] }
 0x43c   :  { %7591 = vmatprep.subr.bf16.mxu0 %v8949_v29  ;;  %v7709_v29 = vld [vmem:[#allocation8 + $0x1c0] sm:$0xff] }
 0x43d   :  { %7631 = vmatpush2.bf16.msra.mxu1 %v9084_v60  ;;  %v7677_v60 = vld [vmem:[#allocation8 + $0xc0] sm:$0xff] }
 0x43e   :  { %7632 = vmatprep.subr.bf16.mxu1 %v9077_v39  ;;  %v7661_v39 = vld [vmem:[#allocation8 + $0x40] sm:$0xff] }
 0x43f   :  { %7592 = vmatpush2.bf16.msra.mxu0 %v8948_v53  ;;  %v7692_v53 = vld [vmem:[#allocation8 + $0x138] sm:$0xff] }
 0x440   :  { %7593 = vmatprep.subr.bf16.mxu0 %v8941_v30  ;;  %v7707_v30 = vld [vmem:[#allocation8 + $0x1b0] sm:$0xff] }
 0x441   :  { %7633 = vmatpush2.bf16.msra.mxu1 %v9076_v26  ;;  %v7675_v26 = vld [vmem:[#allocation8 + $0xb0] sm:$0xff] }
 0x442   :  { %7634 = vmatprep.subr.bf16.mxu1 %v9069_v17  ;;  %v7659_v17 = vld [vmem:[#allocation8 + $0x30] sm:$0xff] }
 0x443   :  { %7594 = vmatpush2.bf16.msra.mxu0 %v8940_v31  ;;  %v7691_v31 = vld [vmem:[#allocation8 + $0x130] sm:$0xff] }
 0x444   :  { %9127 = vmatprep.subr.mxu0 %v7684_v37  ;;  %v7658_v37 = vld [vmem:[#allocation8 + $0x28] sm:$0xff] }
 0x445   :  { %7635 = vmatpush2.bf16.msra.mxu1 %v9068_v24  ;;  %v7706_v24 = vld [vmem:[#allocation8 + $0x1a8] sm:$0xff] }
 0x446   :  { %9162 = vmatprep.subr.mxu1 %v7716_v8  ;;  %v7351_v46 = vpop.f32.mrf.mxu0  ;;  %7596 = vmatmul.mubr.bf16.vlgmr.msra.gmra.mxu0 %v9571_v55  ;;  %v7673_v8 = vld [vmem:[#allocation8 + $0xa0] sm:$0xff] }
 0x447   :  { %v7352_v15 = vadd.f32 %v7351_v46, %v1144_v41  ;;  %9128 = vmatpush3.msra.mxu0 %v7668_v28  ;;  %7852 = vmatprep.mubr.f32.mxu0 %v7646_v19  ;;  %v7657_v41 = vld [vmem:[#allocation8 + $0x20] sm:$0xff]  ;;  %v7656_v19 = vld [vmem:[#allocation8 + $0x18] sm:$0xff] }
 0x448   :  { %v7392_v32 = vpop.f32.mrf.mxu1  ;;  %7637 = vmatmul.mubr.bf16.vlgmr.msra.gmra.mxu1 %v9575_v61  ;;  %v7353_v57 = vpop.f32.mrf.mxu0  ;;  %9129 = vmatprep.subr.mxu0 %v7683_v54  ;;  %v7698_v61 = vld [vmem:[#allocation8 + $0x168] sm:$0xff]  ;;  %v7689_v28 = vld [vmem:[#allocation8 + $0x120] sm:$0xff]  ;;  %v7688_v46 = vld [vmem:[#allocation8 + $0x118] sm:$0xff] }
 0x449   :  { %9163 = vmatpush3.msra.mxu1 %v7700_v44  ;;  %v9701_v63 = vadd.f32 %v7392_v32, %v7352_v15  ;;  %7922 = vmatprep.mubr.f32.mxu1 %v7648_v48  ;;  %v7354_v34 = vadd.f32 %v7353_v57, %v1148_v1  ;;  %v7672_v44 = vld [vmem:[#allocation8 + $0x98] sm:$0xff]  ;;  %v7671_v54 = vld [vmem:[#allocation8 + $0x90] sm:$0xff]  ;;  %v7654_v57 = vld [vmem:[#allocation8 + $0x8] sm:$0xff] }
 0x44a   :  { %v7394_v55 = vpop.f32.mrf.mxu1  ;;  %9164 = vmatprep.subr.mxu1 %v7715_v22  ;;  %9130 = vmatpush3.msra.mxu0 %v7667_v51  ;;  %v7355_v62 = vpop.f32.mrf.mxu0  ;;  %v7704_v1 = vld [vmem:[#allocation8 + $0x198] sm:$0xff]  ;;  %v7703_v48 = vld [vmem:[#allocation8 + $0x190] sm:$0xff]  ;;  %v7670_v22 = vld [vmem:[#allocation8 + $0x88] sm:$0xff] }
 0x44b   :  { %v9703_v16 = vadd.f32 %v7394_v55, %v7354_v34  ;;  %9165 = vmatpush3.msra.mxu1 %v7699_v18  ;;  %9131 = vmatprep.subr.mxu0 %v7682_v36  ;;  %v7655_v15 = vld [vmem:[#allocation8 + $0x10] sm:$0xff]  ;;  %v7702_v51 = vld [vmem:[#allocation8 + $0x188] sm:$0xff]  ;;  %v7669_v36 = vld [vmem:[#allocation8 + $0x80] sm:$0xff] }
 0x44c   :  { %v7396_v2 = vpop.f32.mrf.mxu1  ;;  %9166 = vmatprep.subr.mxu1 %v7714_v0  ;;  %9132 = vmatpush3.msra.mxu0 %v7666_v35  ;;  %v7356_v3 = vpop.f32.mrf.mxu0  ;;  %v7687_v32 = vld [vmem:[#allocation8 + $0x110] sm:$0xff]  ;;  %v7686_v18 = vld [vmem:[#allocation8 + $0x108] sm:$0xff]  ;;  %v7701_v34 = vld [vmem:[#allocation8 + $0x180] sm:$0xff]  ;;  %v7645_v35 = vmax.f32 %v9608_v33, 0.0 }
 0x44d   :  { %9167 = vmatpush3.msra.mxu1 %v7698_v61  ;;  %9133 = vmatprep.subr.mxu0 %v7681_v40  ;;  %v7653_v55 = vld [vmem:[#allocation8] sm:$0xff]  ;;  %v7748_v62 = vld [vmem:[#allocation8 + $0x2f8] sm:$0xff]  ;;  %v7647_v61 = vmax.f32 %v9648_v23, 0.0  ;;  %v7650_v2 = vmax.f32 %v9693_v42, 0.0  ;;  %v7731_v3 = vld [vmem:[#allocation8 + $0x270] sm:$0xff] }
 0x44e   :  { %v7397_v5 = vpop.f32.mrf.mxu1  ;;  %9168 = vmatprep.subr.mxu1 %v7713_v43  ;;  %9134 = vmatpush3.msra.mxu0 %v7665_v20  ;;  %v7685_v0 = vld [vmem:[#allocation8 + $0x100] sm:$0xff]  ;;  %v7732_v40 = vld [vmem:[#allocation8 + $0x278] sm:$0xff]  ;;  %v7747_v43 = vld [vmem:[#allocation8 + $0x2f0] sm:$0xff] }
 0x44f   :  { %9169 = vmatpush3.msra.mxu1 %v7697_v45  ;;  %9135 = vmatprep.subr.mxu0 %v7680_v58  ;;  %v7780_v20 = vld [vmem:[#allocation8 + $0x3f8] sm:$0xff]  ;;  %v7746_v33 = vld [vmem:[#allocation8 + $0x2e8] sm:$0xff]  ;;  %v7779_v58 = vld [vmem:[#allocation8 + $0x3f0] sm:$0xff] }
 0x450   :  { %9170 = vmatprep.subr.mxu1 %v7712_v6  ;;  %9136 = vmatpush3.msra.mxu0 %v7664_v47  ;;  %v7764_v45 = vld [vmem:[#allocation8 + $0x378] sm:$0xff]  ;;  %v7730_v5 = vld [vmem:[#allocation8 + $0x268] sm:$0xff]  ;;  %v7763_v23 = vld [vmem:[#allocation8 + $0x370] sm:$0xff] }
 0x451   :  { %9171 = vmatpush3.msra.mxu1 %v7696_v52  ;;  %9137 = vmatprep.subr.mxu0 %v7679_v11  ;;  %v7745_v6 = vld [vmem:[#allocation8 + $0x2e0] sm:$0xff]  ;;  %v7778_v42 = vld [vmem:[#allocation8 + $0x3e8] sm:$0xff]  ;;  %v7744_v11 = vld [vmem:[#allocation8 + $0x2d8] sm:$0xff] }
 0x452   :  { %9172 = vmatprep.subr.mxu1 %v7711_v59  ;;  %9138 = vmatpush3.msra.mxu0 %v7663_v49  ;;  %v7729_v47 = vld [vmem:[#allocation8 + $0x260] sm:$0xff]  ;;  %v7762_v52 = vld [vmem:[#allocation8 + $0x368] sm:$0xff]  ;;  %v7728_v49 = vld [vmem:[#allocation8 + $0x258] sm:$0xff] }
 0x453   :  { %9173 = vmatpush3.msra.mxu1 %v7695_v56  ;;  %9139 = vmatprep.subr.mxu0 %v7678_v12  ;;  %v7777_v59 = vld [vmem:[#allocation8 + $0x3e0] sm:$0xff]  ;;  %v7743_v12 = vld [vmem:[#allocation8 + $0x2d0] sm:$0xff] }
 0x454   :  { %9174 = vmatprep.subr.mxu1 %v7710_v27  ;;  %9140 = vmatpush3.msra.mxu0 %v7662_v10  ;;  %v7761_v56 = vld [vmem:[#allocation8 + $0x360] sm:$0xff]  ;;  %v7776_v27 = vld [vmem:[#allocation8 + $0x3d8] sm:$0xff]  ;;  %v7727_v10 = vld [vmem:[#allocation8 + $0x250] sm:$0xff] }
 0x455   :  { %9175 = vmatpush3.msra.mxu1 %v7694_v13  ;;  %9141 = vmatprep.subr.mxu0 %v7677_v60  ;;  %v7760_v13 = vld [vmem:[#allocation8 + $0x358] sm:$0xff]  ;;  %v7742_v60 = vld [vmem:[#allocation8 + $0x2c8] sm:$0xff] }
 0x456   :  { %9176 = vmatprep.subr.mxu1 %v7709_v29  ;;  %9142 = vmatpush3.msra.mxu0 %v7661_v39  ;;  %v7775_v29 = vld [vmem:[#allocation8 + $0x3d0] sm:$0xff]  ;;  %v7726_v39 = vld [vmem:[#allocation8 + $0x248] sm:$0xff] }
 0x457   :  { %9177 = vmatpush3.msra.mxu1 %v7693_v14  ;;  %9143 = vmatprep.subr.mxu0 %v7676_v21  ;;  %v7759_v14 = vld [vmem:[#allocation8 + $0x350] sm:$0xff]  ;;  %v7741_v21 = vld [vmem:[#allocation8 + $0x2c0] sm:$0xff] }
 0x458   :  { %9178 = vmatprep.subr.mxu1 %v7708_v25  ;;  %9144 = vmatpush3.msra.mxu0 %v7660_v7  ;;  %v7774_v25 = vld [vmem:[#allocation8 + $0x3c8] sm:$0xff]  ;;  %v7725_v7 = vld [vmem:[#allocation8 + $0x240] sm:$0xff] }
 0x459   :  { %9179 = vmatpush3.msra.mxu1 %v7692_v53  ;;  %9145 = vmatprep.subr.mxu0 %v7675_v26  ;;  %v7758_v53 = vld [vmem:[#allocation8 + $0x348] sm:$0xff]  ;;  %v7740_v26 = vld [vmem:[#allocation8 + $0x2b8] sm:$0xff] }
 0x45a   :  { %9180 = vmatprep.subr.mxu1 %v7707_v30  ;;  %9146 = vmatpush3.msra.mxu0 %v7659_v17  ;;  %v7773_v30 = vld [vmem:[#allocation8 + $0x3c0] sm:$0xff]  ;;  %v7724_v17 = vld [vmem:[#allocation8 + $0x238] sm:$0xff] }
 0x45b   :  { %9181 = vmatpush3.msra.mxu1 %v7691_v31  ;;  %9147 = vmatprep.subr.mxu0 %v7674_v4  ;;  %v7757_v31 = vld [vmem:[#allocation8 + $0x340] sm:$0xff]  ;;  %v7739_v4 = vld [vmem:[#allocation8 + $0x2b0] sm:$0xff] }
 0x45c   :  { %9182 = vmatprep.subr.mxu1 %v7706_v24  ;;  %9148 = vmatpush3.msra.mxu0 %v7658_v37  ;;  %v7772_v24 = vld [vmem:[#allocation8 + $0x3b8] sm:$0xff]  ;;  %v7723_v37 = vld [vmem:[#allocation8 + $0x230] sm:$0xff] }
 0x45d   :  { %9183 = vmatpush3.msra.mxu1 %v7690_v50  ;;  %9149 = vmatprep.subr.mxu0 %v7673_v8  ;;  %v7756_v50 = vld [vmem:[#allocation8 + $0x338] sm:$0xff]  ;;  %v7738_v8 = vld [vmem:[#allocation8 + $0x2a8] sm:$0xff] }
 0x45e   :  { %9184 = vmatprep.subr.mxu1 %v7705_v38  ;;  %9150 = vmatpush3.msra.mxu0 %v7657_v41  ;;  %v7771_v38 = vld [vmem:[#allocation8 + $0x3b0] sm:$0xff]  ;;  %v7722_v41 = vld [vmem:[#allocation8 + $0x228] sm:$0xff] }
 0x45f   :  { %9185 = vmatpush3.msra.mxu1 %v7689_v28  ;;  %9151 = vmatprep.subr.mxu0 %v7672_v44  ;;  %v7755_v28 = vld [vmem:[#allocation8 + $0x330] sm:$0xff]  ;;  %v7737_v44 = vld [vmem:[#allocation8 + $0x2a0] sm:$0xff] }
 0x460   :  { %9186 = vmatprep.subr.mxu1 %v7704_v1  ;;  %9152 = vmatpush3.msra.mxu0 %v7656_v19  ;;  %v7770_v1 = vld [vmem:[#allocation8 + $0x3a8] sm:$0xff]  ;;  %v7721_v19 = vld [vmem:[#allocation8 + $0x220] sm:$0xff] }
 0x461   :  { %9187 = vmatpush3.msra.mxu1 %v7688_v46  ;;  %9153 = vmatprep.subr.mxu0 %v7671_v54  ;;  %v7754_v46 = vld [vmem:[#allocation8 + $0x328] sm:$0xff]  ;;  %v7736_v54 = vld [vmem:[#allocation8 + $0x298] sm:$0xff] }
 0x462   :  { %9188 = vmatprep.subr.mxu1 %v7703_v48  ;;  %9154 = vmatpush3.msra.mxu0 %v7655_v15  ;;  %v7720_v48 = vld [vmem:[#allocation8 + $0x218] sm:$0xff]  ;;  %v7735_v15 = vld [vmem:[#allocation8 + $0x290] sm:$0xff] }
 0x463   :  { %9189 = vmatpush3.msra.mxu1 %v7687_v32  ;;  %9155 = vmatprep.subr.mxu0 %v7670_v22  ;;  %v7719_v32 = vld [vmem:[#allocation8 + $0x210] sm:$0xff]  ;;  %v7734_v22 = vld [vmem:[#allocation8 + $0x288] sm:$0xff] }
 0x464   :  { %9190 = vmatprep.subr.mxu1 %v7702_v51  ;;  %9156 = vmatpush3.msra.mxu0 %v7654_v57  ;;  %v7718_v51 = vld [vmem:[#allocation8 + $0x208] sm:$0xff]  ;;  %v7733_v57 = vld [vmem:[#allocation8 + $0x280] sm:$0xff] }
 0x465   :  { %9191 = vmatpush3.msra.mxu1 %v7686_v18  ;;  %9157 = vmatprep.subr.mxu0 %v7669_v36  ;;  %v7717_v18 = vld [vmem:[#allocation8 + $0x200] sm:$0xff]  ;;  %v7649_v36 = vmax.f32 %v9688_v9, 0.0  ;;  %v7752_v9 = vld [vmem:[#allocation8 + $0x318] sm:$0xff] }
 0x466   :  { %9192 = vmatprep.subr.mxu1 %v7701_v34  ;;  %9158 = vmatpush3.msra.mxu0 %v7653_v55 }
 0x467   :  { %9193 = vmatpush3.msra.mxu1 %v7685_v0  ;;  %7853 = vmatmul.mubr.f32.vlgmr.msra.gmra.mxu0 %v7645_v35  ;;  %v7769_v35 = vld [vmem:[#allocation8 + $0x3a0] sm:$0xff] }
 0x468   :  { %7923 = vmatmul.mubr.f32.vlgmr.msra.gmra.mxu1 %v7647_v61  ;;  %9197 = vmatprep.subr.mxu0 %v7748_v62  ;;  %v7753_v61 = vld [vmem:[#allocation8 + $0x320] sm:$0xff] }
 0x469   :  { %9198 = vmatpush3.msra.mxu0 %v7732_v40  ;;  %7992 = vmatprep.mubr.f32.mxu0 %v7650_v2 }
 0x46a   :  { %9199 = vmatprep.subr.mxu0 %v7747_v43  ;;  %9232 = vmatprep.subr.mxu1 %v7780_v20  ;;  %v7768_v20 = vld [vmem:[#allocation8 + $0x398] sm:$0xff] }
 0x46b   :  { %9200 = vmatpush3.msra.mxu0 %v7731_v3  ;;  %9233 = vmatpush3.msra.mxu1 %v7764_v45 }
 0x46c   :  { %9201 = vmatprep.subr.mxu0 %v7746_v33  ;;  %9234 = vmatprep.subr.mxu1 %v7779_v58  ;;  %v7767_v58 = vld [vmem:[#allocation8 + $0x390] sm:$0xff] }
 0x46d   :  { %9202 = vmatpush3.msra.mxu0 %v7730_v5  ;;  %9235 = vmatpush3.msra.mxu1 %v7763_v23  ;;  %v7751_v5 = vld [vmem:[#allocation8 + $0x310] sm:$0xff] }
 0x46e   :  { %9203 = vmatprep.subr.mxu0 %v7745_v6  ;;  %9236 = vmatprep.subr.mxu1 %v7778_v42  ;;  %v7766_v6 = vld [vmem:[#allocation8 + $0x388] sm:$0xff] }
 0x46f   :  { %9204 = vmatpush3.msra.mxu0 %v7729_v47  ;;  %9237 = vmatpush3.msra.mxu1 %v7762_v52  ;;  %v7750_v42 = vld [vmem:[#allocation8 + $0x308] sm:$0xff]  ;;  %v7765_v47 = vld [vmem:[#allocation8 + $0x380] sm:$0xff] }
 0x470   :  { %9205 = vmatprep.subr.mxu0 %v7744_v11  ;;  %9238 = vmatprep.subr.mxu1 %v7777_v59 }
 0x471   :  { %9206 = vmatpush3.msra.mxu0 %v7728_v49  ;;  %9239 = vmatpush3.msra.mxu1 %v7761_v56 }
 0x472   :  { %9207 = vmatprep.subr.mxu0 %v7743_v12  ;;  %9240 = vmatprep.subr.mxu1 %v7776_v27 }
 0x473   :  { %9208 = vmatpush3.msra.mxu0 %v7727_v10  ;;  %9241 = vmatpush3.msra.mxu1 %v7760_v13 }
 0x474   :  { %9209 = vmatprep.subr.mxu0 %v7742_v60  ;;  %9242 = vmatprep.subr.mxu1 %v7775_v29 }
 0x475   :  { %9210 = vmatpush3.msra.mxu0 %v7726_v39  ;;  %9243 = vmatpush3.msra.mxu1 %v7759_v14 }
 0x476   :  { %9211 = vmatprep.subr.mxu0 %v7741_v21  ;;  %9244 = vmatprep.subr.mxu1 %v7774_v25 }
 0x477   :  { %9212 = vmatpush3.msra.mxu0 %v7725_v7  ;;  %9245 = vmatpush3.msra.mxu1 %v7758_v53 }
 0x478   :  { %9213 = vmatprep.subr.mxu0 %v7740_v26  ;;  %9246 = vmatprep.subr.mxu1 %v7773_v30 }
 0x479   :  { %9214 = vmatpush3.msra.mxu0 %v7724_v17  ;;  %9247 = vmatpush3.msra.mxu1 %v7757_v31 }
 0x47a   :  { %9215 = vmatprep.subr.mxu0 %v7739_v4  ;;  %9248 = vmatprep.subr.mxu1 %v7772_v24 }
 0x47b   :  { %9216 = vmatpush3.msra.mxu0 %v7723_v37  ;;  %9249 = vmatpush3.msra.mxu1 %v7756_v50 }
 0x47c   :  { %9217 = vmatprep.subr.mxu0 %v7738_v8  ;;  %9250 = vmatprep.subr.mxu1 %v7771_v38 }
 0x47d   :  { %9218 = vmatpush3.msra.mxu0 %v7722_v41  ;;  %9251 = vmatpush3.msra.mxu1 %v7755_v28 }
 0x47e   :  { %9219 = vmatprep.subr.mxu0 %v7737_v44  ;;  %9252 = vmatprep.subr.mxu1 %v7770_v1 }
 0x47f   :  { %9220 = vmatpush3.msra.mxu0 %v7721_v19  ;;  %9253 = vmatpush3.msra.mxu1 %v7754_v46  ;;  %v9126_v19 = vld [vmem:[#allocation10] ss:$0 sm:$0xff] }
 0x480   :  { %9221 = vmatprep.subr.mxu0 %v7736_v54  ;;  %9254 = vmatprep.subr.mxu1 %v7769_v35 }
 0x481   :  { %9222 = vmatpush3.msra.mxu0 %v7720_v48  ;;  %9255 = vmatpush3.msra.mxu1 %v7753_v61 }
 0x482   :  { %9223 = vmatprep.subr.mxu0 %v7735_v15  ;;  %9256 = vmatprep.subr.mxu1 %v7768_v20 }
 0x483   :  { %9224 = vmatpush3.msra.mxu0 %v7719_v32  ;;  %9257 = vmatpush3.msra.mxu1 %v7752_v9 }
 0x484   :  { %9225 = vmatprep.subr.mxu0 %v7734_v22  ;;  %9258 = vmatprep.subr.mxu1 %v7767_v58 }
 0x485   :  { %9226 = vmatpush3.msra.mxu0 %v7718_v51  ;;  %9259 = vmatpush3.msra.mxu1 %v7751_v5 }
 0x486   :  { %9227 = vmatprep.subr.mxu0 %v7733_v57  ;;  %v7433_v34 = vpop.f32.mrf.mxu0  ;;  %9260 = vmatprep.subr.mxu1 %v7766_v6 }
 0x487   :  { %9228 = vmatpush3.msra.mxu0 %v7717_v18  ;;  %v7434_v55 = vadd.f32 %v7433_v34, %v9701_v63  ;;  %9261 = vmatpush3.msra.mxu1 %v7750_v42 }
 0x488   :  { %v7474_v0 = vpop.f32.mrf.mxu1  ;;  %7993 = vmatmul.mubr.f32.vlgmr.msra.gmra.mxu0 %v7649_v36  ;;  %v7435_v62 = vpop.f32.mrf.mxu0  ;;  %9262 = vmatprep.subr.mxu1 %v7765_v47 }
 0x489   :  { %v7475_v40 = vadd.f32 %v7474_v0, %v7434_v55  ;;  %v7436_v2 = vadd.f32 %v7435_v62, %v9703_v16  ;;  %v7749_v16 = vld [vmem:[#allocation8 + $0x300] sm:$0xff] }
 0x48a   :  { %v7476_v43 = vpop.f32.mrf.mxu1  ;;  %v7437_v3 = vpop.f32.mrf.mxu0  ;;  %9263 = vmatpush3.msra.mxu1 %v7749_v16 }
 0x48b   :  { %v7477_v45 = vadd.f32 %v7476_v43, %v7436_v2 }
 0x48c   :  { %v7478_v33 = vpop.f32.mrf.mxu1  ;;  %v7438_v63 = vpop.f32.mrf.mxu0 }
 0x48e   :  { %v7479_v23 = vpop.f32.mrf.mxu1 }
 0x4c6   :  { %v7515_v52 = vpop.f32.mrf.mxu0 }
 0x4c7   :  { %v7516_v11 = vadd.f32 %v7515_v52, %v7475_v40 }
 0x4c8   :  { %v7556_v59 = vpop.f32.mrf.mxu1  ;;  %v7517_v49 = vpop.f32.mrf.mxu0 }
 0x4c9   :  { %v7557_v56 = vadd.f32 %v7556_v59, %v7516_v11  ;;  %v7518_v29 = vadd.f32 %v7517_v49, %v7477_v45 }
 0x4ca   :  { %v7558_v12 = vpop.f32.mrf.mxu1  ;;  %v7519_v27 = vpop.f32.mrf.mxu0 }
 0x4cb   :  { %v7559_v14 = vadd.f32 %v7558_v12, %v7518_v29 }
 0x4cc   :  { %v7560_v10 = vpop.f32.mrf.mxu1  ;;  %v7520_v13 = vpop.f32.mrf.mxu0 }
 0x4ce   :  { %v7561_v60 = vpop.f32.mrf.mxu1 }
 0x506   :  { %v7597_v39 = vpop.f32.mrf.mxu0 }
 0x507   :  { %v7598_v21 = vadd.f32 %v7597_v39, %v7557_v56 }
 0x508   :  { %v7638_v25 = vpop.f32.mrf.mxu1  ;;  %v7599_v7 = vpop.f32.mrf.mxu0 }
 0x509   :  { %v7600_v53 = vadd.f32 %v7599_v7, %v7559_v14  ;;  %v7639_v30 = vadd.f32 %v7638_v25, %v7598_v21 }
 0x50a   :  { %v7640_v26 = vpop.f32.mrf.mxu1  ;;  %v7601_v17 = vpop.f32.mrf.mxu0 }
 0x50b   :  { %v7641_v31 = vadd.f32 %v7640_v26, %v7600_v53  ;;  %v7651_v8 = vmax.f32 %v7639_v30, 0.0 }
 0x50c   :  { %v7642_v4 = vpop.f32.mrf.mxu1  ;;  %v7602_v24 = vpop.f32.mrf.mxu0 }
 0x50d   :  { %v7652_v37 = vmax.f32 %v7641_v31, 0.0 }
 0x50e   :  { %v7643_v50 = vpop.f32.mrf.mxu1 }
 0x50f   :  { %8062 = vmatprep.mubr.f32.mxu1 %v7652_v37 }
 0x510   :  { %8063 = vmatmul.mubr.f32.vlgmr.msra.gmra.mxu1 %v7651_v8 }
 0x527   :  { %v9159_v38 = vpop.f32.mrf.mxu0 }
 0x528   :  { %v9194_v28 = vpop.f32.mrf.mxu1 }
 0x529   :  { %v9160_v41 = vpop.f32.mrf.mxu0 }
 0x52a   :  { %v9161_v1 = vadd.f32 %v9160_v41, %v9159_v38  ;;  %v9195_v46 = vpop.f32.mrf.mxu1 }
 0x52b   :  { %v9196_v15 = vadd.f32 %v9195_v46, %v9194_v28 }
 0x52c   :  { %v7855_v48 = vadd.f32 %v9161_v1, %v9126_v19 }
 0x52e   :  { %v7925_v51 = vadd.f32 %v9196_v15, %v7855_v48 }
 0x548   :  { %v9229_v44 = vpop.f32.mrf.mxu0 }
 0x54a   :  { %v9230_v54 = vpop.f32.mrf.mxu0 }
 0x54b   :  { %v9231_v32 = vadd.f32 %v9230_v54, %v9229_v44 }
 0x54d   :  { %v7995_v18 = vadd.f32 %v9231_v32, %v7925_v51 }
 0x5d0   :  { %v9264_v22 = vpop.f32.mrf.mxu1 }
 0x5d2   :  { %v9265_v57 = vpop.f32.mrf.mxu1 }
 0x5d3   :  { %v9266_v36 = vadd.f32 %v9265_v57, %v9264_v22 }
 0x5d5   :  { %v8065_v34 = vadd.f32 %v9266_v36, %v7995_v18 }
 0x5d7   :  { %8068 = vst [vmem:[#allocation11] sm:$0xff] %v8065_v34 }
 0x5d8   :  { %9407 = shalt.err (!%p9404_p1)
}
 0x5d9   :  { %8078 = dma.vmem_to_hbm [thread:$0]  %s8076_s4, 128, %s9719_s5, [#allocation4]  }
 0x5da   :  { %9422 = dma.done.wait [#allocation4], 128  }
 0x5db   :  { %9423 = vsyncadd [#allocation4], 4294967168 }
 0x5dc   :  { %8082 = vsyncpa [#allocation3], 1 }
 0x5dd   :  { %8083 = vsyncpa [#allocation6], 1 }
 0x5de   :  { %8084 = vsyncpa [#allocation9], 1 }
 0x5df   :  { %8085 = vsyncpa [#allocation4], 1 }

</bundles_post_ra>
